<compile_context>
chip_gen: v6e
topology: v6e:2x2x1
jax: 0.10.0
libtpu: 0.0.40
codegen_flags: <defaults>
</compile_context>

<pallas_src>
import functools
import math

import jax
import jax.numpy as jnp
from jax import lax
from jax.experimental import pallas as pl
from jax.experimental.pallas import tpu as pltpu

# ---- constants fixed at module __init__ (exp(log(x)) == x up to fp rounding) ----
A_Q, A_QDOT, A_QDDOT, A_QDDDOT = 1e-5, 1e-3, 1e-5, 1e-3
A_CONSTRAINT, A_OBSTACLE, TIME_MUL = 0.1, 0.1, 1.0
# deterministic stand-ins for the injected end-effector / obstacle distance functions
X_LO, X_HI = 0.6, 1.4
Y_LO, Y_HI = -0.45, 0.45
Z_TABLE = 0.16
PUCK_RADIUS = 0.1


def _huber(x):
    # torch.nn.HuberLoss(reduction='none'), delta=1.0, target=0
    ax = jnp.abs(x)
    return jnp.where(ax < 1.0, 0.5 * x * x, ax - 0.5)


def _hitting_kernel(nq_ref, nt_ref, tri_ref, e_ref, et_ref, lims_ref,
                    wfk_ref, bfk_ref,
                    qcps_ref, tcps_ref, puck_ref,
                    traj_out, time_out, scal_out):
    f32 = jnp.float32
    T = tri_ref.shape[0]
    Bt = tcps_ref.shape[1]
    dot = functools.partial(jnp.dot, preferred_element_type=f32)

    qc = qcps_ref[...]                   # (C, D_pad*Bt)   dof-major lane layout
    tc = tcps_ref[...]                   # (Ct, Bt)
    pk = puck_ref[...]                   # (1, 2*Bt)       [x lanes | y lanes]
    lims = lims_ref[...]                 # (4, D_pad*Bt)

    # --- two stacked basis matmuls (instead of 7 micro-matmuls) ---
    q_all = dot(nq_ref[...], qc)         # (4T, D_pad*Bt)
    t_all = dot(nt_ref[...], tc)         # (3T, Bt)

    q           = q_all[0 * T:1 * T]
    q_dot_tau   = q_all[1 * T:2 * T]
    q_ddot_tau  = q_all[2 * T:3 * T]
    q_dddot_tau = q_all[3 * T:4 * T]

    dtau = t_all[0:T]                    # (T, Bt)
    inv_T = f32(1.0 / T)
    # single exact reciprocal (this copy is also the returned dt / t_cumsum path)
    dt = pl.reciprocal(dtau, approx=False) * inv_T            # (T, Bt)

    t_cumsum = dot(tri_ref[...], dt)                          # (T, Bt) cumsum via MXU
    t_total = t_cumsum[T - 1:T]                               # (1, Bt) == sum(dt), last tri row is ones
    t_loss = _huber(t_total)                                  # (1, Bt)

    # one expansion matmul broadcasts dtau/ddtau/dddtau/dt onto every dof lane
    texp = jnp.concatenate([t_all, dt], axis=0)               # (4T, Bt)
    texp_bd = dot(texp, e_ref[...])                           # (4T, D_pad*Bt)
    dtau_bd   = texp_bd[0 * T:1 * T]
    ddtau_bd  = texp_bd[1 * T:2 * T]
    dddtau_bd = texp_bd[2 * T:3 * T]
    dt_bd     = texp_bd[3 * T:4 * T]

    dtau2 = dtau_bd * dtau_bd
    q_dot  = q_dot_tau * dtau_bd
    q_ddot = q_ddot_tau * dtau2 + ddtau_bd * q_dot
    # Horner-factored; identical to torch:
    #   Q'''t'^3 + 3 Q'' t'' t'^2 + Q' t''' t'^2 + Q' t''^2 t'
    q_dddot = (dtau2 * (q_dddot_tau * dtau_bd
                        + 3.0 * q_ddot_tau * ddtau_bd
                        + q_dot_tau * dddtau_bd)
               + q_dot * ddtau_bd * ddtau_bd)

    def row_loss(v, lim):                # -> (1, D_pad*Bt)  dt-weighted sum over time
        l = _huber(jnp.maximum(jnp.abs(v) - lim, 0.0))
        return jnp.sum(l * dt_bd, axis=0, keepdims=True)

    r_q    = row_loss(q, lims[0:1])
    r_qd   = row_loss(q_dot, lims[1:2])
    r_qdd  = row_loss(q_ddot, lims[2:3])
    r_qddd = row_loss(q_dddot, lims[3:4])

    # stack the four rows, then contract the dof lanes per batch with ONE matmul
    s4 = lax.broadcasted_iota(jnp.int32, (4, 1), 0)
    rows = (jnp.where(s4 == 0, r_q, 0.0) + jnp.where(s4 == 1, r_qd, 0.0)
            + jnp.where(s4 == 2, r_qdd, 0.0) + jnp.where(s4 == 3, r_qddd, 0.0))
    qlosses = dot(rows, et_ref[...])     # (4, Bt): [sum_q, sum_qdot, sum_qddot, sum_qdddot]

    # --- forward kinematics stand-in: block-diagonal affine map of tanh(q) ---
    # TODO(synk): real injected manipulator FK / end-effector constraint / obstacle
    #             distance functions are external dependencies and not reproduced.
    pos = dot(jnp.tanh(q), wfk_ref[...]) + bfk_ref[...]       # (T, 3*Bt) coord-major
    x = pos[:, 0:Bt]
    y = pos[:, Bt:2 * Bt]
    z = pos[:, 2 * Bt:3 * Bt]

    x_viol = jnp.maximum(X_LO - x, 0.0) + jnp.maximum(x - X_HI, 0.0)
    y_viol = jnp.maximum(Y_LO - y, 0.0) + jnp.maximum(y - Y_HI, 0.0)
    z_viol = jnp.abs(z - Z_TABLE)
    x_l = jnp.sum(_huber(x_viol) * dt, axis=0, keepdims=True)   # (1, Bt)
    y_l = jnp.sum(_huber(y_viol) * dt, axis=0, keepdims=True)
    z_l = jnp.sum(_huber(z_viol) * dt, axis=0, keepdims=True)
    constraint_sum = x_l + y_l + z_l

    px = pk[:, 0:Bt]
    py = pk[:, Bt:2 * Bt]
    dx = x - px
    dy = y - py
    dist = jnp.sqrt(dx * dx + dy * dy)
    obs = jnp.sum(_huber(jnp.maximum(PUCK_RADIUS - dist, 0.0)) * dt,
                  axis=0, keepdims=True)                        # (1, Bt)

    alpha4 = jnp.where(s4 == 0, A_Q,
             jnp.where(s4 == 1, A_QDOT,
             jnp.where(s4 == 2, A_QDDOT, A_QDDDOT)))
    model = (jnp.sum(alpha4 * qlosses, axis=0, keepdims=True)
             + A_CONSTRAINT * constraint_sum + A_OBSTACLE * obs
             + TIME_MUL * t_loss)                               # (1, Bt)

    # --- packed, lane-dense output slabs (refs are 2-D thanks to pl.Squeezed) ---
    traj_out[0 * T:1 * T, :] = q
    traj_out[1 * T:2 * T, :] = q_dot
    traj_out[2 * T:3 * T, :] = q_ddot
    traj_out[3 * T:4 * T, :] = q_dddot

    time_out[0:T, :] = dt
    time_out[T:2 * T, :] = t_cumsum

    s8 = lax.broadcasted_iota(jnp.int32, (8, 1), 0)
    misc = (jnp.where(s8 == 0, model, 0.0)
            + jnp.where(s8 == 1, constraint_sum, 0.0)
            + jnp.where(s8 == 2, obs, 0.0)
            + jnp.where(s8 == 3, t_total, 0.0)
            + jnp.where(s8 == 4, t_loss, 0.0)
            + jnp.where(s8 == 5, x_l, 0.0)
            + jnp.where(s8 == 6, y_l, 0.0)
            + jnp.where(s8 == 7, z_l, 0.0))
    scal_out[0:4, :] = qlosses
    scal_out[4:12, :] = misc


def hitting_loss_forward(q_cps, t_cps, puck_pos,
                         bsp_N, bsp_dN, bsp_ddN, bsp_dddN,
                         bspt_N, bspt_dN, bspt_ddN,
                         q_limits, q_dot_limits, q_ddot_limits, q_dddot_limits,
                         w_fk, b_fk, *,
                         batch_tile=None, vmem_limit_bytes=32 << 20):
    f32 = jnp.float32
    B, C, D = q_cps.shape

    # accept (T, C) or (1, T, C) basis matrices (torch bsp.N has a leading singleton)
    def _m(a):
        a = jnp.asarray(a, f32)
        return a.reshape(a.shape[-2], a.shape[-1])

    bsp_N, bsp_dN, bsp_ddN, bsp_dddN = map(_m, (bsp_N, bsp_dN, bsp_ddN, bsp_dddN))
    bspt_N, bspt_dN, bspt_ddN = map(_m, (bspt_N, bspt_dN, bspt_ddN))
    T = bsp_N.shape[0]
    Ct = bspt_N.shape[1]

    # --- dof padding: multiple of 8; zero-padded dof contributes exactly 0 loss ---
    D_pad = max(8, -(-D // 8) * 8)
    # lane quantum so that D_pad * Bt is a multiple of 128
    quantum = 128 // math.gcd(D_pad, 128)

    # --- batch chunking: fold Bt batch elements into the lane dimension ---
    if batch_tile is None:
        half = -(-B // 2)                               # keep >= 2 chunks for v7x megacore
        batch_tile = max(quantum,
                         min(4 * quantum,               # cap DB at ~512 lanes by default
                             quantum * (-(-half // quantum))))
    Bt = int(batch_tile)
    nchunks = -(-B // Bt)
    Bp = nchunks * Bt
    DB = D_pad * Bt

    q_cps_p = jnp.pad(q_cps.astype(f32), ((0, Bp - B), (0, 0), (0, D_pad - D)))
    t_cps2 = jnp.asarray(t_cps, f32).reshape(B, Ct)
    t_cps_p = jnp.pad(t_cps2, ((0, Bp - B), (0, 0)),
                      constant_values=1.0)              # keep dtau finite in padded lanes
    puck_p = jnp.pad(puck_pos.astype(f32), ((0, Bp - B), (0, 0)))

    # per-chunk, dof-major lane layout: lane index = d*Bt + b
    qcps_r = (q_cps_p.reshape(nchunks, Bt, C, D_pad)
              .transpose(0, 2, 3, 1).reshape(nchunks, C, DB))
    tcps_r = t_cps_p.reshape(nchunks, Bt, Ct).transpose(0, 2, 1)            # (n, Ct, Bt)
    puck_r = puck_p.reshape(nchunks, Bt, 2).transpose(0, 2, 1).reshape(nchunks, 1, 2 * Bt)

    # stacked basis matrices: 2 matmul operands instead of 7
    NQ = jnp.concatenate([bsp_N, bsp_dN, bsp_ddN, bsp_dddN], axis=0)        # (4T, C)
    NT = jnp.concatenate([bspt_N, bspt_dN, bspt_ddN], axis=0)               # (3T, Ct)

    # constant helper operands (DMA'd once per step; constant index_map)
    tri = jnp.tril(jnp.ones((T, T), f32))                                   # cumsum operator
    E = jnp.tile(jnp.eye(Bt, dtype=f32), (1, D_pad))                        # (Bt, DB) expand
    ET = E.T                                                                # (DB, Bt) contract

    def lim(v):
        vp = jnp.pad(jnp.asarray(v, f32).reshape(D), (0, D_pad - D))        # zero limit on padded dof
        return jnp.repeat(vp, Bt)
    lims = jnp.stack([lim(q_limits), lim(q_dot_limits),
                      lim(q_ddot_limits), lim(q_dddot_limits)], axis=0)     # (4, DB)

    w_fk_p = jnp.pad(jnp.asarray(w_fk, f32).reshape(D, 3), ((0, D_pad - D), (0, 0)))
    wfk_big = jnp.kron(w_fk_p, jnp.eye(Bt, dtype=f32))                      # (DB, 3*Bt) block-diag FK
    bfk_big = jnp.repeat(jnp.asarray(b_fk, f32).reshape(3), Bt).reshape(1, 3 * Bt)

    def const_spec(a):
        return pl.BlockSpec(a.shape, lambda n: (0,) * a.ndim)

    def chunk_spec(shape):
        return pl.BlockSpec((pl.Squeezed(),) + shape, lambda n: (n, 0, 0))

    in_specs = [
        const_spec(NQ), const_spec(NT), const_spec(tri),
        const_spec(E), const_spec(ET), const_spec(lims),
        const_spec(wfk_big), const_spec(bfk_big),
        chunk_spec((C, DB)), chunk_spec((Ct, Bt)), chunk_spec((1, 2 * Bt)),
    ]
    out_shapes = (jax.ShapeDtypeStruct((nchunks, 4 * T, DB), f32),
                  jax.ShapeDtypeStruct((nchunks, 2 * T, Bt), f32),
                  jax.ShapeDtypeStruct((nchunks, 12, Bt), f32))
    out_specs = [chunk_spec((4 * T, DB)), chunk_spec((2 * T, Bt)), chunk_spec((12, Bt))]

    traj, times, scal = pl.pallas_call(
        _hitting_kernel,
        out_shape=out_shapes,
        grid_spec=pltpu.PrefetchScalarGridSpec(
            num_scalar_prefetch=0,
            grid=(nchunks,),
            in_specs=in_specs,
            out_specs=out_specs),
        compiler_params=pltpu.CompilerParams(
            dimension_semantics=("parallel",),
            vmem_limit_bytes=int(vmem_limit_bytes)),
    )(NQ, NT, tri, E, ET, lims, wfk_big, bfk_big, qcps_r, tcps_r, puck_r)

    # --- unpack the lane-dense slabs back to the torch-style layout (plain XLA) ---
    # TODO(synk): consumers that can accept the packed dof-major layout (or only the
    #             scalar losses) should skip this transpose to save HBM traffic.
    traj_u = (traj.reshape(nchunks, 4, T, D_pad, Bt)
              .transpose(1, 0, 4, 2, 3).reshape(4, Bp, T, D_pad)[:, :B, :, :D])
    q3, qd3, qdd3, qddd3 = traj_u[0], traj_u[1], traj_u[2], traj_u[3]

    times_u = (times.reshape(nchunks, 2, T, Bt)
               .transpose(1, 0, 3, 2).reshape(2, Bp, T)[:, :B])
    dt_b, tcum_b = times_u[0], times_u[1]

    scal_u = scal.transpose(0, 2, 1).reshape(Bp, 12)[:B]
    sum_q, sum_qd = scal_u[:, 0], scal_u[:, 1]
    sum_qdd, sum_qddd = scal_u[:, 2], scal_u[:, 3]
    model = scal_u[:, 4]
    sum_constraint = scal_u[:, 5]
    sum_obstacle = scal_u[:, 6]
    t_total = scal_u[:, 7]
    t_loss = scal_u[:, 8:9]
    x_l, y_l, z_l = scal_u[:, 9:10], scal_u[:, 10:11], scal_u[:, 11:12]

    return (model,                      # model_loss        (B,)
            sum_constraint,             # sum_constraint    (B,)
            sum_obstacle,               # sum_obstacle      (B,)
            sum_q, sum_qd, sum_qdd, sum_qddd,
            q3, qd3, qdd3, qddd3,       # (B, T, D) each
            t_total,                    # t                 (B,)
            tcum_b,                     # t_cumsum          (B, T)
            t_loss,                     # t_loss            (B, 1)
            dt_b,                       # dt                (B, T)
            x_l, y_l, z_l)              # x/y/z loss        (B, 1)


if __name__ == "__main__":
    B, T, C, Ct, D = 2, 64, 8, 8, 7
    key = jax.random.PRNGKey(0)
    ks = jax.random.split(key, 10)

    # Deterministic synthetic B-spline basis matrices (bsp.N has shape (1, T, C) in
    # torch; the leading singleton dim is dropped since einsum 'ijk,lkm->ljm' ignores it).
    bsp_N = jax.nn.softmax(jax.random.normal(ks[0], (T, C)), axis=-1)
    bsp_dN = 0.1 * jax.random.normal(ks[1], (T, C))
    bsp_ddN = 0.1 * jax.random.normal(ks[2], (T, C))
    bsp_dddN = 0.1 * jax.random.normal(ks[3], (T, C))
    bspt_N = jax.nn.softmax(jax.random.normal(ks[4], (T, Ct)), axis=-1)
    bspt_dN = 0.1 * jax.random.normal(ks[5], (T, Ct))
    bspt_ddN = 0.1 * jax.random.normal(ks[6], (T, Ct))

    q_cps = 1.5 * jax.random.normal(ks[7], (B, C, D))
    t_cps = 0.5 + jnp.abs(jax.random.normal(ks[8], (B, Ct, 1)))   # ensures dtau_dt > 0
    puck_pos = jnp.array([[1.0, 0.2], [0.9, -0.1]], dtype=jnp.float32)

    q_limits = jnp.full((D,), 2.9, jnp.float32)
    q_dot_limits = jnp.full((D,), 1.5, jnp.float32)
    q_ddot_limits = jnp.full((D,), 10.0, jnp.float32)
    q_dddot_limits = jnp.full((D,), 100.0, jnp.float32)

    w_fk = 0.3 * jax.random.normal(ks[9], (D, 3))                 # synthetic FK weights
    b_fk = jnp.array([1.0, 0.0, 0.16], jnp.float32)

    outs = hitting_loss_forward(q_cps, t_cps, puck_pos,
                                bsp_N, bsp_dN, bsp_ddN, bsp_dddN,
                                bspt_N, bspt_dN, bspt_ddN,
                                q_limits, q_dot_limits, q_ddot_limits, q_dddot_limits,
                                w_fk, b_fk)
    jax.block_until_ready(outs)
    print("KERNEL_OK")
</pallas_src>

<mosaic_0001>
module attributes {stable_mosaic.version = 11 : i64} {
  func.func @_hitting_kernel(%arg0: i32, %arg1: memref<256x8xf32, #tpu.memory_space<vmem>>, %arg2: memref<192x8xf32, #tpu.memory_space<vmem>>, %arg3: memref<64x64xf32, #tpu.memory_space<vmem>>, %arg4: memref<16x128xf32, #tpu.memory_space<vmem>>, %arg5: memref<128x16xf32, #tpu.memory_space<vmem>>, %arg6: memref<4x128xf32, #tpu.memory_space<vmem>>, %arg7: memref<128x48xf32, #tpu.memory_space<vmem>>, %arg8: memref<1x48xf32, #tpu.memory_space<vmem>>, %arg9: memref<1x8x128xf32, #tpu.memory_space<vmem>>, %arg10: memref<1x8x16xf32, #tpu.memory_space<vmem>>, %arg11: memref<1x1x32xf32, #tpu.memory_space<vmem>>, %arg12: memref<1x256x128xf32, #tpu.memory_space<vmem>>, %arg13: memref<1x128x16xf32, #tpu.memory_space<vmem>>, %arg14: memref<1x12x16xf32, #tpu.memory_space<vmem>>) attributes {dimension_semantics = [#tpu.dimension_semantics<parallel>], iteration_bounds = array<i64: 1>, scalar_prefetch = 0 : i64, scratch_operands = 0 : i64, tpu.core_type = #tpu.core_type<tc>, window_params = [{pipeline_mode = #tpu.pipeline_mode<synchronous>, transform_indices = @transform_0, window_bounds = array<i64: 256, 8>}, {pipeline_mode = #tpu.pipeline_mode<synchronous>, transform_indices = @transform_1, window_bounds = array<i64: 192, 8>}, {pipeline_mode = #tpu.pipeline_mode<synchronous>, transform_indices = @transform_2, window_bounds = array<i64: 64, 64>}, {pipeline_mode = #tpu.pipeline_mode<synchronous>, transform_indices = @transform_3, window_bounds = array<i64: 16, 128>}, {pipeline_mode = #tpu.pipeline_mode<synchronous>, transform_indices = @transform_4, window_bounds = array<i64: 128, 16>}, {pipeline_mode = #tpu.pipeline_mode<synchronous>, transform_indices = @transform_5, window_bounds = array<i64: 4, 128>}, {pipeline_mode = #tpu.pipeline_mode<synchronous>, transform_indices = @transform_6, window_bounds = array<i64: 128, 48>}, {pipeline_mode = #tpu.pipeline_mode<synchronous>, transform_indices = @transform_7, window_bounds = array<i64: 1, 48>}, {transform_indices = @transform_8, window_bounds = array<i64: 1, 8, 128>}, {transform_indices = @transform_9, window_bounds = array<i64: 1, 8, 16>}, {transform_indices = @transform_10, window_bounds = array<i64: 1, 1, 32>}, {transform_indices = @transform_11, window_bounds = array<i64: 1, 256, 128>}, {transform_indices = @transform_12, window_bounds = array<i64: 1, 128, 16>}, {transform_indices = @transform_13, window_bounds = array<i64: 1, 12, 16>}]} {
    %c0 = arith.constant 0 : index
    %c0_0 = arith.constant 0 : index
    %c0_1 = arith.constant 0 : index
    %0 = vector.load %arg9[%c0, %c0_0, %c0_1] : memref<1x8x128xf32, #tpu.memory_space<vmem>>, vector<1x8x128xf32>
    %1 = vector.shape_cast %0 : vector<1x8x128xf32> to vector<8x128xf32>
    %c0_2 = arith.constant 0 : index
    %c0_3 = arith.constant 0 : index
    %c0_4 = arith.constant 0 : index
    %2 = vector.load %arg10[%c0_2, %c0_3, %c0_4] : memref<1x8x16xf32, #tpu.memory_space<vmem>>, vector<1x8x16xf32>
    %3 = vector.shape_cast %2 : vector<1x8x16xf32> to vector<8x16xf32>
    %c0_5 = arith.constant 0 : index
    %c0_6 = arith.constant 0 : index
    %c0_7 = arith.constant 0 : index
    %4 = vector.load %arg11[%c0_5, %c0_6, %c0_7] : memref<1x1x32xf32, #tpu.memory_space<vmem>>, vector<1x1x32xf32>
    %5 = vector.shape_cast %4 : vector<1x1x32xf32> to vector<1x32xf32>
    %c0_8 = arith.constant 0 : index
    %c0_9 = arith.constant 0 : index
    %6 = vector.load %arg6[%c0_8, %c0_9] : memref<4x128xf32, #tpu.memory_space<vmem>>, vector<4x128xf32>
    %c0_10 = arith.constant 0 : index
    %c0_11 = arith.constant 0 : index
    %7 = vector.load %arg1[%c0_10, %c0_11] : memref<256x8xf32, #tpu.memory_space<vmem>>, vector<256x8xf32>
    %cst = arith.constant dense<0.000000e+00> : vector<256x128xf32>
    %8 = tpu.matmul %7, %1, %cst {dimension_numbers = #tpu.dot_dimension_numbers<[1], [0], [0], [1], [0, 0, 1, 1], [], []>} : vector<256x8xf32>, vector<8x128xf32>, vector<256x128xf32> -> vector<256x128xf32>
    %c0_12 = arith.constant 0 : index
    %c0_13 = arith.constant 0 : index
    %9 = vector.load %arg2[%c0_12, %c0_13] : memref<192x8xf32, #tpu.memory_space<vmem>>, vector<192x8xf32>
    %cst_14 = arith.constant dense<0.000000e+00> : vector<192x16xf32>
    %10 = tpu.matmul %9, %3, %cst_14 {dimension_numbers = #tpu.dot_dimension_numbers<[1], [0], [0], [1], [0, 0, 1, 1], [], []>} : vector<192x8xf32>, vector<8x16xf32>, vector<192x16xf32> -> vector<192x16xf32>
    %11 = vector.extract_strided_slice %8 {offsets = [0, 0], sizes = [64, 128], strides = [1, 1]} : vector<256x128xf32> to vector<64x128xf32>
    %12 = vector.extract_strided_slice %8 {offsets = [64, 0], sizes = [64, 128], strides = [1, 1]} : vector<256x128xf32> to vector<64x128xf32>
    %13 = vector.extract_strided_slice %8 {offsets = [128, 0], sizes = [64, 128], strides = [1, 1]} : vector<256x128xf32> to vector<64x128xf32>
    %14 = vector.extract_strided_slice %8 {offsets = [192, 0], sizes = [64, 128], strides = [1, 1]} : vector<256x128xf32> to vector<64x128xf32>
    %15 = vector.extract_strided_slice %10 {offsets = [0, 0], sizes = [64, 16], strides = [1, 1]} : vector<192x16xf32> to vector<64x16xf32>
    %16 = tpu.reciprocal %15 : vector<64x16xf32> -> vector<64x16xf32>
    %cst_15 = arith.constant 1.562500e-02 : f32
    %17 = vector.broadcast %cst_15 : f32 to vector<64x16xf32>
    %18 = arith.mulf %16, %17 : vector<64x16xf32>
    %c0_16 = arith.constant 0 : index
    %c0_17 = arith.constant 0 : index
    %19 = vector.load %arg3[%c0_16, %c0_17] : memref<64x64xf32, #tpu.memory_space<vmem>>, vector<64x64xf32>
    %cst_18 = arith.constant dense<0.000000e+00> : vector<64x16xf32>
    %20 = tpu.matmul %19, %18, %cst_18 {dimension_numbers = #tpu.dot_dimension_numbers<[1], [0], [0], [1], [0, 0, 1, 1], [], []>} : vector<64x64xf32>, vector<64x16xf32>, vector<64x16xf32> -> vector<64x16xf32>
    %21 = vector.extract_strided_slice %20 {offsets = [63, 0], sizes = [1, 16], strides = [1, 1]} : vector<64x16xf32> to vector<1x16xf32>
    %22 = math.absf %21 : vector<1x16xf32>
    %cst_19 = arith.constant 1.000000e+00 : f32
    %23 = vector.broadcast %cst_19 : f32 to vector<1x16xf32>
    %24 = arith.cmpf olt, %22, %23 : vector<1x16xf32>
    %cst_20 = arith.constant 5.000000e-01 : f32
    %25 = vector.broadcast %cst_20 : f32 to vector<1x16xf32>
    %26 = arith.mulf %25, %21 : vector<1x16xf32>
    %27 = arith.mulf %26, %21 : vector<1x16xf32>
    %cst_21 = arith.constant 5.000000e-01 : f32
    %28 = vector.broadcast %cst_21 : f32 to vector<1x16xf32>
    %29 = arith.subf %22, %28 : vector<1x16xf32>
    %30 = arith.select %24, %27, %29 : vector<1x16xi1>, vector<1x16xf32>
    %31 = tpu.concatenate %10, %18 in 0 : vector<192x16xf32>, vector<64x16xf32> -> vector<256x16xf32>
    %c0_22 = arith.constant 0 : index
    %c0_23 = arith.constant 0 : index
    %32 = vector.load %arg4[%c0_22, %c0_23] : memref<16x128xf32, #tpu.memory_space<vmem>>, vector<16x128xf32>
    %cst_24 = arith.constant dense<0.000000e+00> : vector<256x128xf32>
    %33 = tpu.matmul %31, %32, %cst_24 {dimension_numbers = #tpu.dot_dimension_numbers<[1], [0], [0], [1], [0, 0, 1, 1], [], []>} : vector<256x16xf32>, vector<16x128xf32>, vector<256x128xf32> -> vector<256x128xf32>
    %34 = vector.extract_strided_slice %33 {offsets = [0, 0], sizes = [64, 128], strides = [1, 1]} : vector<256x128xf32> to vector<64x128xf32>
    %35 = vector.extract_strided_slice %33 {offsets = [64, 0], sizes = [64, 128], strides = [1, 1]} : vector<256x128xf32> to vector<64x128xf32>
    %36 = vector.extract_strided_slice %33 {offsets = [128, 0], sizes = [64, 128], strides = [1, 1]} : vector<256x128xf32> to vector<64x128xf32>
    %37 = vector.extract_strided_slice %33 {offsets = [192, 0], sizes = [64, 128], strides = [1, 1]} : vector<256x128xf32> to vector<64x128xf32>
    %38 = arith.mulf %34, %34 : vector<64x128xf32>
    %39 = arith.mulf %12, %34 : vector<64x128xf32>
    %40 = arith.mulf %13, %38 : vector<64x128xf32>
    %41 = arith.mulf %35, %39 : vector<64x128xf32>
    %42 = arith.addf %40, %41 : vector<64x128xf32>
    %43 = arith.mulf %14, %34 : vector<64x128xf32>
    %cst_25 = arith.constant 3.000000e+00 : f32
    %44 = vector.broadcast %cst_25 : f32 to vector<64x128xf32>
    %45 = arith.mulf %44, %13 : vector<64x128xf32>
    %46 = arith.mulf %45, %35 : vector<64x128xf32>
    %47 = arith.addf %43, %46 : vector<64x128xf32>
    %48 = arith.mulf %12, %36 : vector<64x128xf32>
    %49 = arith.addf %47, %48 : vector<64x128xf32>
    %50 = arith.mulf %38, %49 : vector<64x128xf32>
    %51 = arith.mulf %39, %35 : vector<64x128xf32>
    %52 = arith.mulf %51, %35 : vector<64x128xf32>
    %53 = arith.addf %50, %52 : vector<64x128xf32>
    %54 = vector.extract_strided_slice %6 {offsets = [0, 0], sizes = [1, 128], strides = [1, 1]} : vector<4x128xf32> to vector<1x128xf32>
    %55 = math.absf %11 : vector<64x128xf32>
    %56 = vector.broadcast %54 : vector<1x128xf32> to vector<64x128xf32>
    %57 = arith.subf %55, %56 : vector<64x128xf32>
    %cst_26 = arith.constant 0.000000e+00 : f32
    %58 = vector.broadcast %cst_26 : f32 to vector<64x128xf32>
    %59 = arith.maximumf %57, %58 : vector<64x128xf32>
    %60 = math.absf %59 : vector<64x128xf32>
    %cst_27 = arith.constant 1.000000e+00 : f32
    %61 = vector.broadcast %cst_27 : f32 to vector<64x128xf32>
    %62 = arith.cmpf olt, %60, %61 : vector<64x128xf32>
    %cst_28 = arith.constant 5.000000e-01 : f32
    %63 = vector.broadcast %cst_28 : f32 to vector<64x128xf32>
    %64 = arith.mulf %63, %59 : vector<64x128xf32>
    %65 = arith.mulf %64, %59 : vector<64x128xf32>
    %cst_29 = arith.constant 5.000000e-01 : f32
    %66 = vector.broadcast %cst_29 : f32 to vector<64x128xf32>
    %67 = arith.subf %60, %66 : vector<64x128xf32>
    %68 = arith.select %62, %65, %67 : vector<64x128xi1>, vector<64x128xf32>
    %69 = arith.mulf %68, %37 : vector<64x128xf32>
    %cst_30 = arith.constant dense<0.000000e+00> : vector<128xf32>
    %70 = vector.multi_reduction <add>, %69, %cst_30 [0] : vector<64x128xf32> to vector<128xf32>
    %71 = vector.shape_cast %70 : vector<128xf32> to vector<1x128xf32>
    %72 = vector.extract_strided_slice %6 {offsets = [1, 0], sizes = [1, 128], strides = [1, 1]} : vector<4x128xf32> to vector<1x128xf32>
    %73 = math.absf %39 : vector<64x128xf32>
    %74 = vector.broadcast %72 : vector<1x128xf32> to vector<64x128xf32>
    %75 = arith.subf %73, %74 : vector<64x128xf32>
    %cst_31 = arith.constant 0.000000e+00 : f32
    %76 = vector.broadcast %cst_31 : f32 to vector<64x128xf32>
    %77 = arith.maximumf %75, %76 : vector<64x128xf32>
    %78 = math.absf %77 : vector<64x128xf32>
    %cst_32 = arith.constant 1.000000e+00 : f32
    %79 = vector.broadcast %cst_32 : f32 to vector<64x128xf32>
    %80 = arith.cmpf olt, %78, %79 : vector<64x128xf32>
    %cst_33 = arith.constant 5.000000e-01 : f32
    %81 = vector.broadcast %cst_33 : f32 to vector<64x128xf32>
    %82 = arith.mulf %81, %77 : vector<64x128xf32>
    %83 = arith.mulf %82, %77 : vector<64x128xf32>
    %cst_34 = arith.constant 5.000000e-01 : f32
    %84 = vector.broadcast %cst_34 : f32 to vector<64x128xf32>
    %85 = arith.subf %78, %84 : vector<64x128xf32>
    %86 = arith.select %80, %83, %85 : vector<64x128xi1>, vector<64x128xf32>
    %87 = arith.mulf %86, %37 : vector<64x128xf32>
    %cst_35 = arith.constant dense<0.000000e+00> : vector<128xf32>
    %88 = vector.multi_reduction <add>, %87, %cst_35 [0] : vector<64x128xf32> to vector<128xf32>
    %89 = vector.shape_cast %88 : vector<128xf32> to vector<1x128xf32>
    %90 = vector.extract_strided_slice %6 {offsets = [2, 0], sizes = [1, 128], strides = [1, 1]} : vector<4x128xf32> to vector<1x128xf32>
    %91 = math.absf %42 : vector<64x128xf32>
    %92 = vector.broadcast %90 : vector<1x128xf32> to vector<64x128xf32>
    %93 = arith.subf %91, %92 : vector<64x128xf32>
    %cst_36 = arith.constant 0.000000e+00 : f32
    %94 = vector.broadcast %cst_36 : f32 to vector<64x128xf32>
    %95 = arith.maximumf %93, %94 : vector<64x128xf32>
    %96 = math.absf %95 : vector<64x128xf32>
    %cst_37 = arith.constant 1.000000e+00 : f32
    %97 = vector.broadcast %cst_37 : f32 to vector<64x128xf32>
    %98 = arith.cmpf olt, %96, %97 : vector<64x128xf32>
    %cst_38 = arith.constant 5.000000e-01 : f32
    %99 = vector.broadcast %cst_38 : f32 to vector<64x128xf32>
    %100 = arith.mulf %99, %95 : vector<64x128xf32>
    %101 = arith.mulf %100, %95 : vector<64x128xf32>
    %cst_39 = arith.constant 5.000000e-01 : f32
    %102 = vector.broadcast %cst_39 : f32 to vector<64x128xf32>
    %103 = arith.subf %96, %102 : vector<64x128xf32>
    %104 = arith.select %98, %101, %103 : vector<64x128xi1>, vector<64x128xf32>
    %105 = arith.mulf %104, %37 : vector<64x128xf32>
    %cst_40 = arith.constant dense<0.000000e+00> : vector<128xf32>
    %106 = vector.multi_reduction <add>, %105, %cst_40 [0] : vector<64x128xf32> to vector<128xf32>
    %107 = vector.shape_cast %106 : vector<128xf32> to vector<1x128xf32>
    %108 = vector.extract_strided_slice %6 {offsets = [3, 0], sizes = [1, 128], strides = [1, 1]} : vector<4x128xf32> to vector<1x128xf32>
    %109 = math.absf %53 : vector<64x128xf32>
    %110 = vector.broadcast %108 : vector<1x128xf32> to vector<64x128xf32>
    %111 = arith.subf %109, %110 : vector<64x128xf32>
    %cst_41 = arith.constant 0.000000e+00 : f32
    %112 = vector.broadcast %cst_41 : f32 to vector<64x128xf32>
    %113 = arith.maximumf %111, %112 : vector<64x128xf32>
    %114 = math.absf %113 : vector<64x128xf32>
    %cst_42 = arith.constant 1.000000e+00 : f32
    %115 = vector.broadcast %cst_42 : f32 to vector<64x128xf32>
    %116 = arith.cmpf olt, %114, %115 : vector<64x128xf32>
    %cst_43 = arith.constant 5.000000e-01 : f32
    %117 = vector.broadcast %cst_43 : f32 to vector<64x128xf32>
    %118 = arith.mulf %117, %113 : vector<64x128xf32>
    %119 = arith.mulf %118, %113 : vector<64x128xf32>
    %cst_44 = arith.constant 5.000000e-01 : f32
    %120 = vector.broadcast %cst_44 : f32 to vector<64x128xf32>
    %121 = arith.subf %114, %120 : vector<64x128xf32>
    %122 = arith.select %116, %119, %121 : vector<64x128xi1>, vector<64x128xf32>
    %123 = arith.mulf %122, %37 : vector<64x128xf32>
    %cst_45 = arith.constant dense<0.000000e+00> : vector<128xf32>
    %124 = vector.multi_reduction <add>, %123, %cst_45 [0] : vector<64x128xf32> to vector<128xf32>
    %125 = vector.shape_cast %124 : vector<128xf32> to vector<1x128xf32>
    %126 = tpu.iota {dimensions = array<i32: 0>} : vector<4x1xi32>
    %c0_i32 = arith.constant 0 : i32
    %127 = vector.broadcast %c0_i32 : i32 to vector<4x1xi32>
    %128 = arith.cmpi eq, %126, %127 : vector<4x1xi32>
    %cst_46 = arith.constant 0.000000e+00 : f32
    %129 = vector.shape_cast %128 : vector<4x1xi1> to vector<4x1xi1>
    %130 = vector.broadcast %129 : vector<4x1xi1> to vector<4x128xi1>
    %131 = vector.shape_cast %71 : vector<1x128xf32> to vector<1x128xf32>
    %132 = vector.broadcast %131 : vector<1x128xf32> to vector<4x128xf32>
    %133 = vector.broadcast %cst_46 : f32 to vector<4x128xf32>
    %134 = arith.select %130, %132, %133 : vector<4x128xi1>, vector<4x128xf32>
    %c1_i32 = arith.constant 1 : i32
    %135 = vector.broadcast %c1_i32 : i32 to vector<4x1xi32>
    %136 = arith.cmpi eq, %126, %135 : vector<4x1xi32>
    %cst_47 = arith.constant 0.000000e+00 : f32
    %137 = vector.shape_cast %136 : vector<4x1xi1> to vector<4x1xi1>
    %138 = vector.broadcast %137 : vector<4x1xi1> to vector<4x128xi1>
    %139 = vector.shape_cast %89 : vector<1x128xf32> to vector<1x128xf32>
    %140 = vector.broadcast %139 : vector<1x128xf32> to vector<4x128xf32>
    %141 = vector.broadcast %cst_47 : f32 to vector<4x128xf32>
    %142 = arith.select %138, %140, %141 : vector<4x128xi1>, vector<4x128xf32>
    %143 = arith.addf %134, %142 : vector<4x128xf32>
    %c2_i32 = arith.constant 2 : i32
    %144 = vector.broadcast %c2_i32 : i32 to vector<4x1xi32>
    %145 = arith.cmpi eq, %126, %144 : vector<4x1xi32>
    %cst_48 = arith.constant 0.000000e+00 : f32
    %146 = vector.shape_cast %145 : vector<4x1xi1> to vector<4x1xi1>
    %147 = vector.broadcast %146 : vector<4x1xi1> to vector<4x128xi1>
    %148 = vector.shape_cast %107 : vector<1x128xf32> to vector<1x128xf32>
    %149 = vector.broadcast %148 : vector<1x128xf32> to vector<4x128xf32>
    %150 = vector.broadcast %cst_48 : f32 to vector<4x128xf32>
    %151 = arith.select %147, %149, %150 : vector<4x128xi1>, vector<4x128xf32>
    %152 = arith.addf %143, %151 : vector<4x128xf32>
    %c3_i32 = arith.constant 3 : i32
    %153 = vector.broadcast %c3_i32 : i32 to vector<4x1xi32>
    %154 = arith.cmpi eq, %126, %153 : vector<4x1xi32>
    %cst_49 = arith.constant 0.000000e+00 : f32
    %155 = vector.shape_cast %154 : vector<4x1xi1> to vector<4x1xi1>
    %156 = vector.broadcast %155 : vector<4x1xi1> to vector<4x128xi1>
    %157 = vector.shape_cast %125 : vector<1x128xf32> to vector<1x128xf32>
    %158 = vector.broadcast %157 : vector<1x128xf32> to vector<4x128xf32>
    %159 = vector.broadcast %cst_49 : f32 to vector<4x128xf32>
    %160 = arith.select %156, %158, %159 : vector<4x128xi1>, vector<4x128xf32>
    %161 = arith.addf %152, %160 : vector<4x128xf32>
    %c0_50 = arith.constant 0 : index
    %c0_51 = arith.constant 0 : index
    %162 = vector.load %arg5[%c0_50, %c0_51] : memref<128x16xf32, #tpu.memory_space<vmem>>, vector<128x16xf32>
    %cst_52 = arith.constant dense<0.000000e+00> : vector<4x16xf32>
    %163 = tpu.matmul %161, %162, %cst_52 {dimension_numbers = #tpu.dot_dimension_numbers<[1], [0], [0], [1], [0, 0, 1, 1], [], []>} : vector<4x128xf32>, vector<128x16xf32>, vector<4x16xf32> -> vector<4x16xf32>
    %164 = math.tanh %11 : vector<64x128xf32>
    %c0_53 = arith.constant 0 : index
    %c0_54 = arith.constant 0 : index
    %165 = vector.load %arg7[%c0_53, %c0_54] : memref<128x48xf32, #tpu.memory_space<vmem>>, vector<128x48xf32>
    %cst_55 = arith.constant dense<0.000000e+00> : vector<64x48xf32>
    %166 = tpu.matmul %164, %165, %cst_55 {dimension_numbers = #tpu.dot_dimension_numbers<[1], [0], [0], [1], [0, 0, 1, 1], [], []>} : vector<64x128xf32>, vector<128x48xf32>, vector<64x48xf32> -> vector<64x48xf32>
    %c0_56 = arith.constant 0 : index
    %c0_57 = arith.constant 0 : index
    %167 = vector.load %arg8[%c0_56, %c0_57] : memref<1x48xf32, #tpu.memory_space<vmem>>, vector<1x48xf32>
    %168 = vector.broadcast %167 : vector<1x48xf32> to vector<64x48xf32>
    %169 = arith.addf %166, %168 : vector<64x48xf32>
    %170 = vector.extract_strided_slice %169 {offsets = [0, 0], sizes = [64, 16], strides = [1, 1]} : vector<64x48xf32> to vector<64x16xf32>
    %171 = vector.extract_strided_slice %169 {offsets = [0, 16], sizes = [64, 16], strides = [1, 1]} : vector<64x48xf32> to vector<64x16xf32>
    %172 = vector.extract_strided_slice %169 {offsets = [0, 32], sizes = [64, 16], strides = [1, 1]} : vector<64x48xf32> to vector<64x16xf32>
    %cst_58 = arith.constant 6.000000e-01 : f32
    %173 = vector.broadcast %cst_58 : f32 to vector<64x16xf32>
    %174 = arith.subf %173, %170 : vector<64x16xf32>
    %cst_59 = arith.constant 0.000000e+00 : f32
    %175 = vector.broadcast %cst_59 : f32 to vector<64x16xf32>
    %176 = arith.maximumf %174, %175 : vector<64x16xf32>
    %cst_60 = arith.constant 1.400000e+00 : f32
    %177 = vector.broadcast %cst_60 : f32 to vector<64x16xf32>
    %178 = arith.subf %170, %177 : vector<64x16xf32>
    %cst_61 = arith.constant 0.000000e+00 : f32
    %179 = vector.broadcast %cst_61 : f32 to vector<64x16xf32>
    %180 = arith.maximumf %178, %179 : vector<64x16xf32>
    %181 = arith.addf %176, %180 : vector<64x16xf32>
    %cst_62 = arith.constant -4.500000e-01 : f32
    %182 = vector.broadcast %cst_62 : f32 to vector<64x16xf32>
    %183 = arith.subf %182, %171 : vector<64x16xf32>
    %cst_63 = arith.constant 0.000000e+00 : f32
    %184 = vector.broadcast %cst_63 : f32 to vector<64x16xf32>
    %185 = arith.maximumf %183, %184 : vector<64x16xf32>
    %cst_64 = arith.constant 4.500000e-01 : f32
    %186 = vector.broadcast %cst_64 : f32 to vector<64x16xf32>
    %187 = arith.subf %171, %186 : vector<64x16xf32>
    %cst_65 = arith.constant 0.000000e+00 : f32
    %188 = vector.broadcast %cst_65 : f32 to vector<64x16xf32>
    %189 = arith.maximumf %187, %188 : vector<64x16xf32>
    %190 = arith.addf %185, %189 : vector<64x16xf32>
    %cst_66 = arith.constant 1.600000e-01 : f32
    %191 = vector.broadcast %cst_66 : f32 to vector<64x16xf32>
    %192 = arith.subf %172, %191 : vector<64x16xf32>
    %193 = math.absf %192 : vector<64x16xf32>
    %194 = math.absf %181 : vector<64x16xf32>
    %cst_67 = arith.constant 1.000000e+00 : f32
    %195 = vector.broadcast %cst_67 : f32 to vector<64x16xf32>
    %196 = arith.cmpf olt, %194, %195 : vector<64x16xf32>
    %cst_68 = arith.constant 5.000000e-01 : f32
    %197 = vector.broadcast %cst_68 : f32 to vector<64x16xf32>
    %198 = arith.mulf %197, %181 : vector<64x16xf32>
    %199 = arith.mulf %198, %181 : vector<64x16xf32>
    %cst_69 = arith.constant 5.000000e-01 : f32
    %200 = vector.broadcast %cst_69 : f32 to vector<64x16xf32>
    %201 = arith.subf %194, %200 : vector<64x16xf32>
    %202 = arith.select %196, %199, %201 : vector<64x16xi1>, vector<64x16xf32>
    %203 = arith.mulf %202, %18 : vector<64x16xf32>
    %cst_70 = arith.constant dense<0.000000e+00> : vector<16xf32>
    %204 = vector.multi_reduction <add>, %203, %cst_70 [0] : vector<64x16xf32> to vector<16xf32>
    %205 = vector.shape_cast %204 : vector<16xf32> to vector<1x16xf32>
    %206 = math.absf %190 : vector<64x16xf32>
    %cst_71 = arith.constant 1.000000e+00 : f32
    %207 = vector.broadcast %cst_71 : f32 to vector<64x16xf32>
    %208 = arith.cmpf olt, %206, %207 : vector<64x16xf32>
    %cst_72 = arith.constant 5.000000e-01 : f32
    %209 = vector.broadcast %cst_72 : f32 to vector<64x16xf32>
    %210 = arith.mulf %209, %190 : vector<64x16xf32>
    %211 = arith.mulf %210, %190 : vector<64x16xf32>
    %cst_73 = arith.constant 5.000000e-01 : f32
    %212 = vector.broadcast %cst_73 : f32 to vector<64x16xf32>
    %213 = arith.subf %206, %212 : vector<64x16xf32>
    %214 = arith.select %208, %211, %213 : vector<64x16xi1>, vector<64x16xf32>
    %215 = arith.mulf %214, %18 : vector<64x16xf32>
    %cst_74 = arith.constant dense<0.000000e+00> : vector<16xf32>
    %216 = vector.multi_reduction <add>, %215, %cst_74 [0] : vector<64x16xf32> to vector<16xf32>
    %217 = vector.shape_cast %216 : vector<16xf32> to vector<1x16xf32>
    %218 = math.absf %193 : vector<64x16xf32>
    %cst_75 = arith.constant 1.000000e+00 : f32
    %219 = vector.broadcast %cst_75 : f32 to vector<64x16xf32>
    %220 = arith.cmpf olt, %218, %219 : vector<64x16xf32>
    %cst_76 = arith.constant 5.000000e-01 : f32
    %221 = vector.broadcast %cst_76 : f32 to vector<64x16xf32>
    %222 = arith.mulf %221, %193 : vector<64x16xf32>
    %223 = arith.mulf %222, %193 : vector<64x16xf32>
    %cst_77 = arith.constant 5.000000e-01 : f32
    %224 = vector.broadcast %cst_77 : f32 to vector<64x16xf32>
    %225 = arith.subf %218, %224 : vector<64x16xf32>
    %226 = arith.select %220, %223, %225 : vector<64x16xi1>, vector<64x16xf32>
    %227 = arith.mulf %226, %18 : vector<64x16xf32>
    %cst_78 = arith.constant dense<0.000000e+00> : vector<16xf32>
    %228 = vector.multi_reduction <add>, %227, %cst_78 [0] : vector<64x16xf32> to vector<16xf32>
    %229 = vector.shape_cast %228 : vector<16xf32> to vector<1x16xf32>
    %230 = arith.addf %205, %217 : vector<1x16xf32>
    %231 = arith.addf %230, %229 : vector<1x16xf32>
    %232 = vector.extract_strided_slice %5 {offsets = [0, 0], sizes = [1, 16], strides = [1, 1]} : vector<1x32xf32> to vector<1x16xf32>
    %233 = vector.extract_strided_slice %5 {offsets = [0, 16], sizes = [1, 16], strides = [1, 1]} : vector<1x32xf32> to vector<1x16xf32>
    %234 = vector.broadcast %232 : vector<1x16xf32> to vector<64x16xf32>
    %235 = arith.subf %170, %234 : vector<64x16xf32>
    %236 = vector.broadcast %233 : vector<1x16xf32> to vector<64x16xf32>
    %237 = arith.subf %171, %236 : vector<64x16xf32>
    %238 = arith.mulf %235, %235 : vector<64x16xf32>
    %239 = arith.mulf %237, %237 : vector<64x16xf32>
    %240 = arith.addf %238, %239 : vector<64x16xf32>
    %241 = math.sqrt %240 : vector<64x16xf32>
    %cst_79 = arith.constant 1.000000e-01 : f32
    %242 = vector.broadcast %cst_79 : f32 to vector<64x16xf32>
    %243 = arith.subf %242, %241 : vector<64x16xf32>
    %cst_80 = arith.constant 0.000000e+00 : f32
    %244 = vector.broadcast %cst_80 : f32 to vector<64x16xf32>
    %245 = arith.maximumf %243, %244 : vector<64x16xf32>
    %246 = math.absf %245 : vector<64x16xf32>
    %cst_81 = arith.constant 1.000000e+00 : f32
    %247 = vector.broadcast %cst_81 : f32 to vector<64x16xf32>
    %248 = arith.cmpf olt, %246, %247 : vector<64x16xf32>
    %cst_82 = arith.constant 5.000000e-01 : f32
    %249 = vector.broadcast %cst_82 : f32 to vector<64x16xf32>
    %250 = arith.mulf %249, %245 : vector<64x16xf32>
    %251 = arith.mulf %250, %245 : vector<64x16xf32>
    %cst_83 = arith.constant 5.000000e-01 : f32
    %252 = vector.broadcast %cst_83 : f32 to vector<64x16xf32>
    %253 = arith.subf %246, %252 : vector<64x16xf32>
    %254 = arith.select %248, %251, %253 : vector<64x16xi1>, vector<64x16xf32>
    %255 = arith.mulf %254, %18 : vector<64x16xf32>
    %cst_84 = arith.constant dense<0.000000e+00> : vector<16xf32>
    %256 = vector.multi_reduction <add>, %255, %cst_84 [0] : vector<64x16xf32> to vector<16xf32>
    %257 = vector.shape_cast %256 : vector<16xf32> to vector<1x16xf32>
    %c0_i32_85 = arith.constant 0 : i32
    %258 = vector.broadcast %c0_i32_85 : i32 to vector<4x1xi32>
    %259 = arith.cmpi eq, %126, %258 : vector<4x1xi32>
    %c1_i32_86 = arith.constant 1 : i32
    %260 = vector.broadcast %c1_i32_86 : i32 to vector<4x1xi32>
    %261 = arith.cmpi eq, %126, %260 : vector<4x1xi32>
    %c2_i32_87 = arith.constant 2 : i32
    %262 = vector.broadcast %c2_i32_87 : i32 to vector<4x1xi32>
    %263 = arith.cmpi eq, %126, %262 : vector<4x1xi32>
    %cst_88 = arith.constant 9.99999974E-6 : f32
    %cst_89 = arith.constant 1.000000e-03 : f32
    %264 = vector.broadcast %cst_88 : f32 to vector<4x1xf32>
    %265 = vector.broadcast %cst_89 : f32 to vector<4x1xf32>
    %266 = arith.select %263, %264, %265 : vector<4x1xi1>, vector<4x1xf32>
    %cst_90 = arith.constant 1.000000e-03 : f32
    %267 = vector.broadcast %cst_90 : f32 to vector<4x1xf32>
    %268 = arith.select %261, %267, %266 : vector<4x1xi1>, vector<4x1xf32>
    %cst_91 = arith.constant 9.99999974E-6 : f32
    %269 = vector.broadcast %cst_91 : f32 to vector<4x1xf32>
    %270 = arith.select %259, %269, %268 : vector<4x1xi1>, vector<4x1xf32>
    %271 = vector.broadcast %270 : vector<4x1xf32> to vector<4x16xf32>
    %272 = arith.mulf %271, %163 : vector<4x16xf32>
    %cst_92 = arith.constant dense<0.000000e+00> : vector<16xf32>
    %273 = vector.multi_reduction <add>, %272, %cst_92 [0] : vector<4x16xf32> to vector<16xf32>
    %274 = vector.shape_cast %273 : vector<16xf32> to vector<1x16xf32>
    %cst_93 = arith.constant 1.000000e-01 : f32
    %275 = vector.broadcast %cst_93 : f32 to vector<1x16xf32>
    %276 = arith.mulf %275, %231 : vector<1x16xf32>
    %277 = arith.addf %274, %276 : vector<1x16xf32>
    %cst_94 = arith.constant 1.000000e-01 : f32
    %278 = vector.broadcast %cst_94 : f32 to vector<1x16xf32>
    %279 = arith.mulf %278, %257 : vector<1x16xf32>
    %280 = arith.addf %277, %279 : vector<1x16xf32>
    %cst_95 = arith.constant 1.000000e+00 : f32
    %281 = vector.broadcast %cst_95 : f32 to vector<1x16xf32>
    %282 = arith.mulf %281, %30 : vector<1x16xf32>
    %283 = arith.addf %280, %282 : vector<1x16xf32>
    %c0_96 = arith.constant 0 : index
    %c0_97 = arith.constant 0 : index
    %c0_98 = arith.constant 0 : index
    %284 = vector.load %arg12[%c0_96, %c0_97, %c0_98] : memref<1x256x128xf32, #tpu.memory_space<vmem>>, vector<1x64x128xf32>
    %285 = vector.shape_cast %284 : vector<1x64x128xf32> to vector<64x128xf32>
    %286 = vector.shape_cast %11 : vector<64x128xf32> to vector<1x64x128xf32>
    tpu.vector_store %arg12[%c0_96, %c0_97, %c0_98], %286 {strides = array<i32>} : memref<1x256x128xf32, #tpu.memory_space<vmem>>, vector<1x64x128xf32>,
    %c0_99 = arith.constant 0 : index
    %c64 = arith.constant 64 : index
    %c0_100 = arith.constant 0 : index
    %287 = vector.load %arg12[%c0_99, %c64, %c0_100] : memref<1x256x128xf32, #tpu.memory_space<vmem>>, vector<1x64x128xf32>
    %288 = vector.shape_cast %287 : vector<1x64x128xf32> to vector<64x128xf32>
    %289 = vector.shape_cast %39 : vector<64x128xf32> to vector<1x64x128xf32>
    tpu.vector_store %arg12[%c0_99, %c64, %c0_100], %289 {strides = array<i32>} : memref<1x256x128xf32, #tpu.memory_space<vmem>>, vector<1x64x128xf32>,
    %c0_101 = arith.constant 0 : index
    %c128 = arith.constant 128 : index
    %c0_102 = arith.constant 0 : index
    %290 = vector.load %arg12[%c0_101, %c128, %c0_102] : memref<1x256x128xf32, #tpu.memory_space<vmem>>, vector<1x64x128xf32>
    %291 = vector.shape_cast %290 : vector<1x64x128xf32> to vector<64x128xf32>
    %292 = vector.shape_cast %42 : vector<64x128xf32> to vector<1x64x128xf32>
    tpu.vector_store %arg12[%c0_101, %c128, %c0_102], %292 {strides = array<i32>} : memref<1x256x128xf32, #tpu.memory_space<vmem>>, vector<1x64x128xf32>,
    %c0_103 = arith.constant 0 : index
    %c192 = arith.constant 192 : index
    %c0_104 = arith.constant 0 : index
    %293 = vector.load %arg12[%c0_103, %c192, %c0_104] : memref<1x256x128xf32, #tpu.memory_space<vmem>>, vector<1x64x128xf32>
    %294 = vector.shape_cast %293 : vector<1x64x128xf32> to vector<64x128xf32>
    %295 = vector.shape_cast %53 : vector<64x128xf32> to vector<1x64x128xf32>
    tpu.vector_store %arg12[%c0_103, %c192, %c0_104], %295 {strides = array<i32>} : memref<1x256x128xf32, #tpu.memory_space<vmem>>, vector<1x64x128xf32>,
    %c0_105 = arith.constant 0 : index
    %c0_106 = arith.constant 0 : index
    %c0_107 = arith.constant 0 : index
    %296 = vector.load %arg13[%c0_105, %c0_106, %c0_107] : memref<1x128x16xf32, #tpu.memory_space<vmem>>, vector<1x64x16xf32>
    %297 = vector.shape_cast %296 : vector<1x64x16xf32> to vector<64x16xf32>
    %298 = vector.shape_cast %18 : vector<64x16xf32> to vector<1x64x16xf32>
    tpu.vector_store %arg13[%c0_105, %c0_106, %c0_107], %298 {strides = array<i32>} : memref<1x128x16xf32, #tpu.memory_space<vmem>>, vector<1x64x16xf32>,
    %c0_108 = arith.constant 0 : index
    %c64_109 = arith.constant 64 : index
    %c0_110 = arith.constant 0 : index
    %299 = vector.load %arg13[%c0_108, %c64_109, %c0_110] : memref<1x128x16xf32, #tpu.memory_space<vmem>>, vector<1x64x16xf32>
    %300 = vector.shape_cast %299 : vector<1x64x16xf32> to vector<64x16xf32>
    %301 = vector.shape_cast %20 : vector<64x16xf32> to vector<1x64x16xf32>
    tpu.vector_store %arg13[%c0_108, %c64_109, %c0_110], %301 {strides = array<i32>} : memref<1x128x16xf32, #tpu.memory_space<vmem>>, vector<1x64x16xf32>,
    %302 = tpu.iota {dimensions = array<i32: 0>} : vector<8x1xi32>
    %c0_i32_111 = arith.constant 0 : i32
    %303 = vector.broadcast %c0_i32_111 : i32 to vector<8x1xi32>
    %304 = arith.cmpi eq, %302, %303 : vector<8x1xi32>
    %cst_112 = arith.constant 0.000000e+00 : f32
    %305 = vector.shape_cast %304 : vector<8x1xi1> to vector<8x1xi1>
    %306 = vector.broadcast %305 : vector<8x1xi1> to vector<8x16xi1>
    %307 = vector.shape_cast %283 : vector<1x16xf32> to vector<1x16xf32>
    %308 = vector.broadcast %307 : vector<1x16xf32> to vector<8x16xf32>
    %309 = vector.broadcast %cst_112 : f32 to vector<8x16xf32>
    %310 = arith.select %306, %308, %309 : vector<8x16xi1>, vector<8x16xf32>
    %c1_i32_113 = arith.constant 1 : i32
    %311 = vector.broadcast %c1_i32_113 : i32 to vector<8x1xi32>
    %312 = arith.cmpi eq, %302, %311 : vector<8x1xi32>
    %cst_114 = arith.constant 0.000000e+00 : f32
    %313 = vector.shape_cast %312 : vector<8x1xi1> to vector<8x1xi1>
    %314 = vector.broadcast %313 : vector<8x1xi1> to vector<8x16xi1>
    %315 = vector.shape_cast %231 : vector<1x16xf32> to vector<1x16xf32>
    %316 = vector.broadcast %315 : vector<1x16xf32> to vector<8x16xf32>
    %317 = vector.broadcast %cst_114 : f32 to vector<8x16xf32>
    %318 = arith.select %314, %316, %317 : vector<8x16xi1>, vector<8x16xf32>
    %319 = arith.addf %310, %318 : vector<8x16xf32>
    %c2_i32_115 = arith.constant 2 : i32
    %320 = vector.broadcast %c2_i32_115 : i32 to vector<8x1xi32>
    %321 = arith.cmpi eq, %302, %320 : vector<8x1xi32>
    %cst_116 = arith.constant 0.000000e+00 : f32
    %322 = vector.shape_cast %321 : vector<8x1xi1> to vector<8x1xi1>
    %323 = vector.broadcast %322 : vector<8x1xi1> to vector<8x16xi1>
    %324 = vector.shape_cast %257 : vector<1x16xf32> to vector<1x16xf32>
    %325 = vector.broadcast %324 : vector<1x16xf32> to vector<8x16xf32>
    %326 = vector.broadcast %cst_116 : f32 to vector<8x16xf32>
    %327 = arith.select %323, %325, %326 : vector<8x16xi1>, vector<8x16xf32>
    %328 = arith.addf %319, %327 : vector<8x16xf32>
    %c3_i32_117 = arith.constant 3 : i32
    %329 = vector.broadcast %c3_i32_117 : i32 to vector<8x1xi32>
    %330 = arith.cmpi eq, %302, %329 : vector<8x1xi32>
    %cst_118 = arith.constant 0.000000e+00 : f32
    %331 = vector.shape_cast %330 : vector<8x1xi1> to vector<8x1xi1>
    %332 = vector.broadcast %331 : vector<8x1xi1> to vector<8x16xi1>
    %333 = vector.shape_cast %21 : vector<1x16xf32> to vector<1x16xf32>
    %334 = vector.broadcast %333 : vector<1x16xf32> to vector<8x16xf32>
    %335 = vector.broadcast %cst_118 : f32 to vector<8x16xf32>
    %336 = arith.select %332, %334, %335 : vector<8x16xi1>, vector<8x16xf32>
    %337 = arith.addf %328, %336 : vector<8x16xf32>
    %c4_i32 = arith.constant 4 : i32
    %338 = vector.broadcast %c4_i32 : i32 to vector<8x1xi32>
    %339 = arith.cmpi eq, %302, %338 : vector<8x1xi32>
    %cst_119 = arith.constant 0.000000e+00 : f32
    %340 = vector.shape_cast %339 : vector<8x1xi1> to vector<8x1xi1>
    %341 = vector.broadcast %340 : vector<8x1xi1> to vector<8x16xi1>
    %342 = vector.shape_cast %30 : vector<1x16xf32> to vector<1x16xf32>
    %343 = vector.broadcast %342 : vector<1x16xf32> to vector<8x16xf32>
    %344 = vector.broadcast %cst_119 : f32 to vector<8x16xf32>
    %345 = arith.select %341, %343, %344 : vector<8x16xi1>, vector<8x16xf32>
    %346 = arith.addf %337, %345 : vector<8x16xf32>
    %c5_i32 = arith.constant 5 : i32
    %347 = vector.broadcast %c5_i32 : i32 to vector<8x1xi32>
    %348 = arith.cmpi eq, %302, %347 : vector<8x1xi32>
    %cst_120 = arith.constant 0.000000e+00 : f32
    %349 = vector.shape_cast %348 : vector<8x1xi1> to vector<8x1xi1>
    %350 = vector.broadcast %349 : vector<8x1xi1> to vector<8x16xi1>
    %351 = vector.shape_cast %205 : vector<1x16xf32> to vector<1x16xf32>
    %352 = vector.broadcast %351 : vector<1x16xf32> to vector<8x16xf32>
    %353 = vector.broadcast %cst_120 : f32 to vector<8x16xf32>
    %354 = arith.select %350, %352, %353 : vector<8x16xi1>, vector<8x16xf32>
    %355 = arith.addf %346, %354 : vector<8x16xf32>
    %c6_i32 = arith.constant 6 : i32
    %356 = vector.broadcast %c6_i32 : i32 to vector<8x1xi32>
    %357 = arith.cmpi eq, %302, %356 : vector<8x1xi32>
    %cst_121 = arith.constant 0.000000e+00 : f32
    %358 = vector.shape_cast %357 : vector<8x1xi1> to vector<8x1xi1>
    %359 = vector.broadcast %358 : vector<8x1xi1> to vector<8x16xi1>
    %360 = vector.shape_cast %217 : vector<1x16xf32> to vector<1x16xf32>
    %361 = vector.broadcast %360 : vector<1x16xf32> to vector<8x16xf32>
    %362 = vector.broadcast %cst_121 : f32 to vector<8x16xf32>
    %363 = arith.select %359, %361, %362 : vector<8x16xi1>, vector<8x16xf32>
    %364 = arith.addf %355, %363 : vector<8x16xf32>
    %c7_i32 = arith.constant 7 : i32
    %365 = vector.broadcast %c7_i32 : i32 to vector<8x1xi32>
    %366 = arith.cmpi eq, %302, %365 : vector<8x1xi32>
    %cst_122 = arith.constant 0.000000e+00 : f32
    %367 = vector.shape_cast %366 : vector<8x1xi1> to vector<8x1xi1>
    %368 = vector.broadcast %367 : vector<8x1xi1> to vector<8x16xi1>
    %369 = vector.shape_cast %229 : vector<1x16xf32> to vector<1x16xf32>
    %370 = vector.broadcast %369 : vector<1x16xf32> to vector<8x16xf32>
    %371 = vector.broadcast %cst_122 : f32 to vector<8x16xf32>
    %372 = arith.select %368, %370, %371 : vector<8x16xi1>, vector<8x16xf32>
    %373 = arith.addf %364, %372 : vector<8x16xf32>
    %c0_123 = arith.constant 0 : index
    %c0_124 = arith.constant 0 : index
    %c0_125 = arith.constant 0 : index
    %374 = vector.load %arg14[%c0_123, %c0_124, %c0_125] : memref<1x12x16xf32, #tpu.memory_space<vmem>>, vector<1x4x16xf32>
    %375 = vector.shape_cast %374 : vector<1x4x16xf32> to vector<4x16xf32>
    %376 = vector.shape_cast %163 : vector<4x16xf32> to vector<1x4x16xf32>
    tpu.vector_store %arg14[%c0_123, %c0_124, %c0_125], %376 {strides = array<i32>} : memref<1x12x16xf32, #tpu.memory_space<vmem>>, vector<1x4x16xf32>,
    %c0_126 = arith.constant 0 : index
    %c4 = arith.constant 4 : index
    %c0_127 = arith.constant 0 : index
    %377 = vector.load %arg14[%c0_126, %c4, %c0_127] : memref<1x12x16xf32, #tpu.memory_space<vmem>>, vector<1x8x16xf32>
    %378 = vector.shape_cast %377 : vector<1x8x16xf32> to vector<8x16xf32>
    %379 = vector.shape_cast %373 : vector<8x16xf32> to vector<1x8x16xf32>
    tpu.vector_store %arg14[%c0_126, %c4, %c0_127], %379 {strides = array<i32>} : memref<1x12x16xf32, #tpu.memory_space<vmem>>, vector<1x8x16xf32>,
    return
  }
  func.func @transform_0(%arg0: i32) -> (i32, i32) {
    %c0_i32 = arith.constant 0 : i32
    %c0_i32_0 = arith.constant 0 : i32
    %c0_i32_1 = arith.constant 0 : i32
    return %c0_i32, %c0_i32_0 : i32, i32
  }
  func.func @transform_1(%arg0: i32) -> (i32, i32) {
    %c0_i32 = arith.constant 0 : i32
    %c0_i32_0 = arith.constant 0 : i32
    %c0_i32_1 = arith.constant 0 : i32
    return %c0_i32, %c0_i32_0 : i32, i32
  }
  func.func @transform_2(%arg0: i32) -> (i32, i32) {
    %c0_i32 = arith.constant 0 : i32
    %c0_i32_0 = arith.constant 0 : i32
    %c0_i32_1 = arith.constant 0 : i32
    return %c0_i32, %c0_i32_0 : i32, i32
  }
  func.func @transform_3(%arg0: i32) -> (i32, i32) {
    %c0_i32 = arith.constant 0 : i32
    %c0_i32_0 = arith.constant 0 : i32
    %c0_i32_1 = arith.constant 0 : i32
    return %c0_i32, %c0_i32_0 : i32, i32
  }
  func.func @transform_4(%arg0: i32) -> (i32, i32) {
    %c0_i32 = arith.constant 0 : i32
    %c0_i32_0 = arith.constant 0 : i32
    %c0_i32_1 = arith.constant 0 : i32
    return %c0_i32, %c0_i32_0 : i32, i32
  }
  func.func @transform_5(%arg0: i32) -> (i32, i32) {
    %c0_i32 = arith.constant 0 : i32
    %c0_i32_0 = arith.constant 0 : i32
    %c0_i32_1 = arith.constant 0 : i32
    return %c0_i32, %c0_i32_0 : i32, i32
  }
  func.func @transform_6(%arg0: i32) -> (i32, i32) {
    %c0_i32 = arith.constant 0 : i32
    %c0_i32_0 = arith.constant 0 : i32
    %c0_i32_1 = arith.constant 0 : i32
    return %c0_i32, %c0_i32_0 : i32, i32
  }
  func.func @transform_7(%arg0: i32) -> (i32, i32) {
    %c0_i32 = arith.constant 0 : i32
    %c0_i32_0 = arith.constant 0 : i32
    %c0_i32_1 = arith.constant 0 : i32
    return %c0_i32, %c0_i32_0 : i32, i32
  }
  func.func @transform_8(%arg0: i32) -> (i32, i32, i32) {
    %c0_i32 = arith.constant 0 : i32
    %c0_i32_0 = arith.constant 0 : i32
    %c0_i32_1 = arith.constant 0 : i32
    return %arg0, %c0_i32, %c0_i32_0 : i32, i32, i32
  }
  func.func @transform_9(%arg0: i32) -> (i32, i32, i32) {
    %c0_i32 = arith.constant 0 : i32
    %c0_i32_0 = arith.constant 0 : i32
    %c0_i32_1 = arith.constant 0 : i32
    return %arg0, %c0_i32, %c0_i32_0 : i32, i32, i32
  }
  func.func @transform_10(%arg0: i32) -> (i32, i32, i32) {
    %c0_i32 = arith.constant 0 : i32
    %c0_i32_0 = arith.constant 0 : i32
    %c0_i32_1 = arith.constant 0 : i32
    return %arg0, %c0_i32, %c0_i32_0 : i32, i32, i32
  }
  func.func @transform_11(%arg0: i32) -> (i32, i32, i32) {
    %c0_i32 = arith.constant 0 : i32
    %c0_i32_0 = arith.constant 0 : i32
    %c0_i32_1 = arith.constant 0 : i32
    return %arg0, %c0_i32, %c0_i32_0 : i32, i32, i32
  }
  func.func @transform_12(%arg0: i32) -> (i32, i32, i32) {
    %c0_i32 = arith.constant 0 : i32
    %c0_i32_0 = arith.constant 0 : i32
    %c0_i32_1 = arith.constant 0 : i32
    return %arg0, %c0_i32, %c0_i32_0 : i32, i32, i32
  }
  func.func @transform_13(%arg0: i32) -> (i32, i32, i32) {
    %c0_i32 = arith.constant 0 : i32
    %c0_i32_0 = arith.constant 0 : i32
    %c0_i32_1 = arith.constant 0 : i32
    return %arg0, %c0_i32, %c0_i32_0 : i32, i32, i32
  }
}

</mosaic_0001>

<bundles_post_ra>
// kernel: tpu_custom_call.1
= control target key start
LH: loop header
LB: loop body
LE: loop exit
PB: predicated region body
PF: predicated region fallthrough
CT: control target
= control target key end

     0   :  { %vm78_vm0 = vcmask 64512   ;;  %s5374_s0 = inlined_call_operand.vmem [shape: f32[256,8], index: 0, kind: input, shape index: {}]   ;;  %s5375_s1 = inlined_call_operand.vmem [shape: f32[192,8], index: 1, kind: input, shape index: {}]   ;;  %s5376_s2 = inlined_call_operand.vmem [shape: f32[64,64], index: 2, kind: input, shape index: {}]   ;;  %s5377_s3 = inlined_call_operand.vmem [shape: f32[16,128], index: 3, kind: input, shape index: {}]   ;;  %s5378_s4 = inlined_call_operand.vmem [shape: f32[128,16], index: 4, kind: input, shape index: {}]   ;;  %s5379_s5 = inlined_call_operand.vmem [shape: f32[4,128], index: 5, kind: input, shape index: {}]   ;;  %s5380_s6 = inlined_call_operand.vmem [shape: f32[128,48], index: 6, kind: input, shape index: {}]   ;;  %s5381_s7 = inlined_call_operand.vmem [shape: f32[1,48], index: 7, kind: input, shape index: {}]   ;;  %s5382_s8 = inlined_call_operand.vmem [shape: f32[1,8,128], index: 8, kind: input, shape index: {}]   ;;  %s5383_s9 = inlined_call_operand.vmem [shape: f32[1,8,16], index: 9, kind: input, shape index: {}]   ;;  %s5384_s10 = inlined_call_operand.vmem [shape: f32[1,1,32], index: 10, kind: input, shape index: {}]   ;;  %s5385_s11 = inlined_call_operand.hbm [shape: f32[1,256,128], index: 11, kind: output, shape index: {0}]   ;;  %s5386_s12 = inlined_call_operand.vmem [shape: f32[1,128,16], index: 12, kind: output, shape index: {1}]   ;;  %s5387_s13 = inlined_call_operand.vmem [shape: f32[1,12,16], index: 13, kind: output, shape index: {2}]  }
   0x1   :  { %v43_v0 = vld [vmem:[%s5383_s9] sm:$0xff]  ;;  %v401_v2 = vld [vmem:[%s5375_s1 + $0x8] sm:$0xff]  ;;  %v402_v3 = vld [vmem:[%s5375_s1 + $0x10] sm:$0xff] }
   0x2   :  { %v400_v1 = vld [vmem:[%s5375_s1] sm:$0xff]  ;;  %3037 = vmatprep.subr.mxu1 %v43_v0  ;;  %v403_v4 = vld [vmem:[%s5375_s1 + $0x18] sm:$0xff]  ;;  %v405_v6 = vld [vmem:[%s5375_s1 + $0x28] sm:$0xff] }
   0x3   :  { %3039 = vmatprep.mubr.msk.f32.mxu1 %vm78_vm0, %v400_v1  ;;  %3038 = vmatpush3.msra.mxu1 %v43_v0  ;;  %v404_v5 = vld [vmem:[%s5375_s1 + $0x20] sm:$0xff]  ;;  %v406_v9 = vld [vmem:[%s5375_s1 + $0x30] sm:$0xff]  ;;  %v47_v10 = vld [vmem:[%s5374_s0 + $0x8] sm:$0xff] }
   0x4   :  { %3040 = vmatmul.mubr.msk.f32.vlgmr.msra.gmra.mxu1 %vm78_vm0, %v401_v2  ;;  %v42_v7 = vld [vmem:[%s5382_s8] sm:$0xff]  ;;  %v48_v11 = vld [vmem:[%s5374_s0 + $0x10] sm:$0xff]  ;;  %v842_v12 = vld [vmem:[%s5377_s3 + $0x8] sm:$0xff] }
   0x5   :  { %3042 = vmatprep.mubr.msk.f32.mxu1 %vm78_vm0, %v402_v3  ;;  %v46_v8 = vld [vmem:[%s5374_s0] sm:$0xff]  ;;  %2987 = vmatprep.subr.mxu0 %v42_v7  ;;  %v407_v13 = vld [vmem:[%s5375_s1 + $0x38] sm:$0xff]  ;;  %v409_v18 = vld [vmem:[%s5375_s1 + $0x48] sm:$0xff] }
   0x6   :  { %2989 = vmatprep.mubr.msk.f32.mxu0 %vm78_vm0, %v46_v8  ;;  %2988 = vmatpush3.msra.mxu0 %v42_v7  ;;  %v49_v14 = vld [vmem:[%s5374_s0 + $0x18] sm:$0xff]  ;;  %v408_v15 = vld [vmem:[%s5375_s1 + $0x40] sm:$0xff]  ;;  %v51_v19 = vld [vmem:[%s5374_s0 + $0x28] sm:$0xff] }
   0x7   :  { %2990 = vmatmul.mubr.msk.f32.vlgmr.msra.gmra.mxu0 %vm78_vm0, %v47_v10  ;;  %3103 = vmatprep.subr.mxu0 %v842_v12  ;;  %v50_v16 = vld [vmem:[%s5374_s0 + $0x20] sm:$0xff]  ;;  %v410_v20 = vld [vmem:[%s5375_s1 + $0x50] sm:$0xff]  ;;  %v411_v22 = vld [vmem:[%s5375_s1 + $0x58] sm:$0xff] }
   0x8   :  { %3043 = vmatmul.mubr.msk.f32.gmra.mxu1 %vm78_vm0, %v403_v4  ;;  %2992 = vmatprep.mubr.msk.f32.mxu0 %vm78_vm0, %v48_v11  ;;  %v841_v17 = vld [vmem:[%s5377_s3] sm:$0xff]  ;;  %v52_v21 = vld [vmem:[%s5374_s0 + $0x30] sm:$0xff]  ;;  %v53_v23 = vld [vmem:[%s5374_s0 + $0x38] sm:$0xff] }
   0x9   :  { %3045 = vmatprep.mubr.msk.f32.mxu1 %vm78_vm0, %v404_v5  ;;  %3104 = vmatpush3.msra.mxu0 %v842_v12 }
   0xa   :  { %3105 = vmatprep.subr.mxu0 %v841_v17 }
   0xb   :  { %2993 = vmatmul.mubr.msk.f32.gmra.mxu0 %vm78_vm0, %v49_v14 }
   0xc   :  { %3046 = vmatmul.mubr.msk.f32.gmra.mxu1 %vm78_vm0, %v405_v6  ;;  %2995 = vmatprep.mubr.msk.f32.mxu0 %vm78_vm0, %v50_v16 }
   0xd   :  { %3048 = vmatprep.mubr.msk.f32.mxu1 %vm78_vm0, %v406_v9  ;;  %3106 = vmatpush3.msra.mxu0 %v841_v17 }
   0xf   :  { %2996 = vmatmul.mubr.msk.f32.gmra.mxu0 %vm78_vm0, %v51_v19 }
  0x10   :  { %3049 = vmatmul.mubr.msk.f32.gmra.mxu1 %vm78_vm0, %v407_v13  ;;  %2998 = vmatprep.mubr.msk.f32.mxu0 %vm78_vm0, %v52_v21 }
  0x11   :  { %3051 = vmatprep.mubr.msk.f32.mxu1 %vm78_vm0, %v408_v15 }
  0x14   :  { %3052 = vmatmul.mubr.msk.f32.gmra.mxu1 %vm78_vm0, %v409_v18 }
  0x15   :  { %3054 = vmatprep.mubr.msk.f32.mxu1 %vm78_vm0, %v410_v20 }
  0x16   :  { %19 = vsyncpa [#allocation3], 0  ;;  %v412_v24 = vld [vmem:[%s5375_s1 + $0x60] sm:$0xff]  ;;  %2999 = vmatmul.mubr.msk.f32.gmra.mxu0 %vm78_vm0, %v53_v23  ;;  %v413_v26 = vld [vmem:[%s5375_s1 + $0x68] sm:$0xff]  ;;  %vm843_vm1 = vcmask 130048   ;;  %s3323_s30 = smov 32  }
  0x17   :  { %v54_v25 = vld [vmem:[%s5374_s0 + $0x40] sm:$0xff]  ;;  %v55_v27 = vld [vmem:[%s5374_s0 + $0x48] sm:$0xff]  ;;  %v414_v28 = vld [vmem:[%s5375_s1 + $0x70] sm:$0xff]  ;;  %vm705_vm2 = vcmask 523264   ;;  %vm3325_vm8 = vmmov 0  }
  0x18   :  { %3055 = vmatmul.mubr.msk.f32.gmra.mxu1 %vm78_vm0, %v411_v22  ;;  %3001 = vmatprep.mubr.msk.f32.mxu0 %vm78_vm0, %v54_v25  ;;  %v56_v29 = vld [vmem:[%s5374_s0 + $0x50] sm:$0xff]  ;;  %v415_v30 = vld [vmem:[%s5375_s1 + $0x78] sm:$0xff]  ;;  %v416_v32 = vld [vmem:[%s5375_s1 + $0x80] sm:$0xff] }
  0x19   :  { %3057 = vmatprep.mubr.msk.f32.mxu1 %vm78_vm0, %v412_v24  ;;  %v57_v31 = vld [vmem:[%s5374_s0 + $0x58] sm:$0xff]  ;;  %v58_v33 = vld [vmem:[%s5374_s0 + $0x60] sm:$0xff]  ;;  %v417_v34 = vld [vmem:[%s5375_s1 + $0x88] sm:$0xff] }
  0x1a   :  { %3002 = vmatmul.mubr.msk.f32.gmra.mxu0 %vm78_vm0, %v55_v27  ;;  %v59_v35 = vld [vmem:[%s5374_s0 + $0x68] sm:$0xff]  ;;  %v418_v36 = vld [vmem:[%s5375_s1 + $0x90] sm:$0xff]  ;;  %v419_v38 = vld [vmem:[%s5375_s1 + $0x98] sm:$0xff] }
  0x1b   :  { %3004 = vmatprep.mubr.msk.f32.mxu0 %vm78_vm0, %v56_v29  ;;  %v60_v37 = vld [vmem:[%s5374_s0 + $0x70] sm:$0xff]  ;;  %v61_v39 = vld [vmem:[%s5374_s0 + $0x78] sm:$0xff]  ;;  %v420_v40 = vld [vmem:[%s5375_s1 + $0xa0] sm:$0xff] }
  0x1c   :  { %3058 = vmatmul.mubr.msk.f32.gmra.mxu1 %vm78_vm0, %v413_v26  ;;  %v62_v41 = vld [vmem:[%s5374_s0 + $0x80] sm:$0xff]  ;;  %v421_v42 = vld [vmem:[%s5375_s1 + $0xa8] sm:$0xff]  ;;  %v422_v44 = vld [vmem:[%s5375_s1 + $0xb0] sm:$0xff] }
  0x1d   :  { %3060 = vmatprep.mubr.msk.f32.mxu1 %vm78_vm0, %v414_v28  ;;  %v63_v43 = vld [vmem:[%s5374_s0 + $0x88] sm:$0xff]  ;;  %v64_v45 = vld [vmem:[%s5374_s0 + $0x90] sm:$0xff]  ;;  %v423_v46 = vld [vmem:[%s5375_s1 + $0xb8] sm:$0xff]  ;;  %s3322_s1 = smov 16  }
  0x1e   :  { %3005 = vmatmul.mubr.msk.f32.gmra.mxu0 %vm78_vm0, %v57_v31  ;;  %v65_v47 = vld [vmem:[%s5374_s0 + $0x98] sm:$0xff]  ;;  %v66_v48 = vld [vmem:[%s5374_s0 + $0xa0] sm:$0xff]  ;;  %v67_v49 = vld [vmem:[%s5374_s0 + $0xa8] sm:$0xff] }
  0x1f   :  { %3007 = vmatprep.mubr.msk.f32.mxu0 %vm78_vm0, %v58_v33  ;;  %v68_v50 = vld [vmem:[%s5374_s0 + $0xb0] sm:$0xff]  ;;  %v69_v51 = vld [vmem:[%s5374_s0 + $0xb8] sm:$0xff]  ;;  %v70_v52 = vld [vmem:[%s5374_s0 + $0xc0] sm:$0xff] }
  0x20   :  { %3061 = vmatmul.mubr.msk.f32.gmra.mxu1 %vm78_vm0, %v415_v30  ;;  %v71_v53 = vld [vmem:[%s5374_s0 + $0xc8] sm:$0xff]  ;;  %v72_v54 = vld [vmem:[%s5374_s0 + $0xd0] sm:$0xff]  ;;  %v73_v55 = vld [vmem:[%s5374_s0 + $0xd8] sm:$0xff] }
  0x21   :  { %3063 = vmatprep.mubr.msk.f32.mxu1 %vm78_vm0, %v416_v32  ;;  %v74_v56 = vld [vmem:[%s5374_s0 + $0xe0] sm:$0xff]  ;;  %v75_v57 = vld [vmem:[%s5374_s0 + $0xe8] sm:$0xff]  ;;  %v76_v58 = vld [vmem:[%s5374_s0 + $0xf0] sm:$0xff] }
  0x22   :  { %3008 = vmatmul.mubr.msk.f32.gmra.mxu0 %vm78_vm0, %v59_v35  ;;  %v77_v59 = vld [vmem:[%s5374_s0 + $0xf8] sm:$0xff] }
  0x23   :  { %3010 = vmatprep.mubr.msk.f32.mxu0 %vm78_vm0, %v60_v37 }
  0x24   :  { %3064 = vmatmul.mubr.msk.f32.gmra.mxu1 %vm78_vm0, %v417_v34 }
  0x25   :  { %3066 = vmatprep.mubr.msk.f32.mxu1 %vm78_vm0, %v418_v36 }
  0x26   :  { %3011 = vmatmul.mubr.msk.f32.gmra.mxu0 %vm78_vm0, %v61_v39 }
  0x27   :  { %3013 = vmatprep.mubr.msk.f32.mxu0 %vm78_vm0, %v62_v41 }
  0x28   :  { %3067 = vmatmul.mubr.msk.f32.gmra.mxu1 %vm78_vm0, %v419_v38 }
  0x29   :  { %3069 = vmatprep.mubr.msk.f32.mxu1 %vm78_vm0, %v420_v40 }
  0x2a   :  { %3014 = vmatmul.mubr.msk.f32.gmra.mxu0 %vm78_vm0, %v63_v43 }
  0x2b   :  { %3016 = vmatprep.mubr.msk.f32.mxu0 %vm78_vm0, %v64_v45 }
  0x2c   :  { %3070 = vmatmul.mubr.msk.f32.gmra.mxu1 %vm78_vm0, %v421_v42 }
  0x2d   :  { %3072 = vmatprep.mubr.msk.f32.mxu1 %vm78_vm0, %v422_v44 }
  0x2e   :  { %3017 = vmatmul.mubr.msk.f32.gmra.mxu0 %vm78_vm0, %v65_v47 }
  0x2f   :  { %3019 = vmatprep.mubr.msk.f32.mxu0 %vm78_vm0, %v66_v48 }
  0x30   :  { %3073 = vmatmul.mubr.msk.f32.gmra.mxu1 %vm78_vm0, %v423_v46 }
  0x32   :  { %3020 = vmatmul.mubr.msk.f32.gmra.mxu0 %vm78_vm0, %v67_v49 }
  0x33   :  { %3022 = vmatprep.mubr.msk.f32.mxu0 %vm78_vm0, %v68_v50 }
  0x36   :  { %3023 = vmatmul.mubr.msk.f32.gmra.mxu0 %vm78_vm0, %v69_v51 }
  0x37   :  { %3025 = vmatprep.mubr.msk.f32.mxu0 %vm78_vm0, %v70_v52 }
  0x3a   :  { %3026 = vmatmul.mubr.msk.f32.gmra.mxu0 %vm78_vm0, %v71_v53  ;;  %v697_v53 = vld [vmem:[%s5376_s2] sm:$0xff] }
  0x3b   :  { %3028 = vmatprep.mubr.msk.f32.mxu0 %vm78_vm0, %v72_v54  ;;  %v698_v54 = vld [vmem:[%s5376_s2 + $0x8] sm:$0xff]  ;;  %3091 = vmatprep.mubr.msk.f32.mxu1 %vm705_vm2, %v697_v53  ;;  %v1698_v53 = vld [vmem:[%s5378_s4 + $0x60] sm:$0xff] }
  0x3e   :  { %3029 = vmatmul.mubr.msk.f32.gmra.mxu0 %vm78_vm0, %v73_v55 }
  0x3f   :  { %3031 = vmatprep.mubr.msk.f32.mxu0 %vm78_vm0, %v74_v56 }
  0x42   :  { %3032 = vmatmul.mubr.msk.f32.gmra.mxu0 %vm78_vm0, %v75_v57  ;;  %v5390_v57 = vmov 0.0  }
  0x43   :  { %3034 = vmatprep.mubr.msk.f32.mxu0 %vm78_vm0, %v76_v58 }
  0x46   :  { %3035 = vmatmul.mubr.msk.f32.gmra.mxu0 %vm78_vm0, %v77_v59  ;;  %v1701_v59 = vld [vmem:[%s5378_s4 + $0x78] sm:$0xff] }
  0xc4   :  { %v3041_v60 = vpop.f32.mrf.mxu1 }
  0xc5   :  { %3244 = vrcp.f32 %v3041_v60 }
  0xc6   :  { %v562_v61 = vpop.f32.mrf.mxu1 }
  0xc7   :  { %3246 = vrcp.f32 %v562_v61  ;;  %3107 = vmatprep.mubr.msk.f32.mxu0 %vm843_vm1, %v562_v61  ;;  %v3642_v1 = vpop.f32.mrf.mxu0 }
  0xc8   :  { %v3044_v62 = vpop.f32.mrf.mxu1  ;;  %3108 = vmatmul.mubr.msk.f32.vlgmr.msra.gmra.mxu0 %vm843_vm1, %v3041_v60  ;;  %2527 = vst [vmem:[#allocation2 + $0x8] sm:$0xff] %v3642_v1 }
  0xc9   :  { %3248 = vrcp.f32 %v3044_v62  ;;  %v3645_v3 = vpop.f32.mrf.mxu0 }
  0xca   :  { %v572_v63 = vpop.f32.mrf.mxu1  ;;  %2526 = vst [vmem:[#allocation2] sm:$0xff] %v3645_v3 }
  0xcb   :  { %3250 = vrcp.f32 %v572_v63  ;;  %3110 = vmatprep.mubr.msk.f32.mxu0 %vm843_vm1, %v572_v63  ;;  %v3650_v5 = vpop.f32.mrf.mxu0 }
  0xcc   :  { %v3047_v0 = vpop.f32.mrf.mxu1  ;;  %3111 = vmatmul.mubr.msk.f32.gmra.mxu0 %vm843_vm1, %v3044_v62  ;;  %2529 = vst [vmem:[#allocation2 + $0x18] sm:$0xff] %v3650_v5  ;;  %v1700_v62 = vld [vmem:[%s5378_s4 + $0x70] sm:$0xff] }
  0xcd   :  { %3252 = vrcp.f32 %v3047_v0  ;;  %v3653_v8 = vpop.f32.mrf.mxu0 }
  0xce   :  { %v582_v2 = vpop.f32.mrf.mxu1  ;;  %2528 = vst [vmem:[#allocation2 + $0x10] sm:$0xff] %v3653_v8 }
  0xcf   :  { %3254 = vrcp.f32 %v582_v2  ;;  %3113 = vmatprep.mubr.msk.f32.mxu0 %vm843_vm1, %v582_v2  ;;  %v3660_v12 = vpop.f32.mrf.mxu0  ;;  %v1699_v2 = vld [vmem:[%s5378_s4 + $0x68] sm:$0xff] }
  0xd0   :  { %v3050_v4 = vpop.f32.mrf.mxu1  ;;  %3114 = vmatmul.mubr.msk.f32.gmra.mxu0 %vm843_vm1, %v3047_v0  ;;  %2531 = vst [vmem:[#allocation2 + $0x28] sm:$0xff] %v3660_v12  ;;  %v1285_v0 = vlaneseq }
  0xd1   :  { %3256 = vrcp.f32 %v3050_v4  ;;  %v3672_v16 = vpop.f32.mrf.mxu0 }
  0xd2   :  { %v3245_v6 = vpop.eup %3244  ;;  %v592_v7 = vpop.f32.mrf.mxu1  ;;  %2530 = vst [vmem:[#allocation2 + $0x20] sm:$0xff] %v3672_v16 }
  0xd3   :  { %v3655_v9 = vmul.f32 0.015625, %v3245_v6  ;;  %3258 = vrcp.f32 %v592_v7  ;;  %3116 = vmatprep.mubr.msk.f32.mxu0 %vm843_vm1, %v592_v7  ;;  %v3859_v6 = vshrl.u32 %v1285_v0, 7 }
  0xd4   :  { %v3247_v10 = vpop.eup %3246  ;;  %v3053_v11 = vpop.f32.mrf.mxu1  ;;  %3117 = vmatmul.mubr.msk.f32.gmra.mxu0 %vm843_vm1, %v3050_v4 }
  0xd5   :  { %5465 = vst [vmem:[#allocation5_spill] sm:$0xff] %v3655_v9  ;;  %2559 = vst.msk [vmem:[%s5386_s12 + $0x8] sm:$0xff] %vm843_vm1, %v3655_v9  ;;  %v3667_v13 = vmul.f32 0.015625, %v3247_v10  ;;  %2131 = vrot.lane.b32.xlu0 %v3655_v9, %s3322_s1  ;;  %v3864_v10 = vsub.s32 0, %v3859_v6 }
  0xd6   :  { %v3249_v14 = vpop.eup %3248  ;;  %v602_v15 = vpop.f32.mrf.mxu1  ;;  %5478 = vst [vmem:[#allocation18_spill] sm:$0xff] %v3859_v6 }
  0xd7   :  { %5466 = vst [vmem:[#allocation6_spill] sm:$0xff] %v3667_v13  ;;  %2558 = vst.msk [vmem:[%s5386_s12] sm:$0xff] %vm843_vm1, %v3667_v13  ;;  %v3679_v17 = vmul.f32 0.015625, %v3249_v14  ;;  %2231 = vrot.lane.b32.xlu1 %v3667_v13, %s3323_s30  ;;  %3119 = vmatprep.mubr.msk.f32.mxu0 %vm843_vm1, %v602_v15  ;;  %v3686_v20 = vpop.f32.mrf.mxu0  ;;  %v1278_v15 = vand.u32 2147483647, %v3642_v1 }
  0xd8   :  { %v3251_v18 = vpop.eup %3250  ;;  %v3056_v19 = vpop.f32.mrf.mxu1  ;;  %3120 = vmatmul.mubr.msk.f32.gmra.mxu0 %vm843_vm1, %v3053_v11  ;;  %2533 = vst [vmem:[#allocation2 + $0x38] sm:$0xff] %v3686_v20  ;;  %5479 = vst [vmem:[#allocation19_spill] sm:$0xff] %v3864_v10  ;;  %v3869_v11 = vld [vmem:[%s5379_s5] sm:$0xf] }
  0xd9   :  { %5467 = vst [vmem:[#allocation7_spill] sm:$0xff] %v3679_v17  ;;  %2561 = vst.msk [vmem:[%s5386_s12 + $0x18] sm:$0xff] %vm843_vm1, %v3679_v17  ;;  %v3693_v21 = vmul.f32 0.015625, %v3251_v18  ;;  %2233 = vrot.lane.b32.xlu0 %v3655_v9, %s3323_s30  ;;  %v3698_v24 = vpop.f32.mrf.mxu0  ;;  %v1288_v18 = vrot.slane %v3869_v11, %v3864_v10 }
  0xda   :  { %v3253_v22 = vpop.eup %3252  ;;  %v612_v23 = vpop.f32.mrf.mxu1  ;;  %2532 = vst [vmem:[#allocation2 + $0x30] sm:$0xff] %v3698_v24 }
  0xdb   :  { %5468 = vst [vmem:[#allocation8_spill] sm:$0xff] %v3693_v21  ;;  %2560 = vst.msk [vmem:[%s5386_s12 + $0x10] sm:$0xff] %vm843_vm1, %v3693_v21  ;;  %v3705_v25 = vmul.f32 0.015625, %v3253_v22  ;;  %2135 = vrot.lane.b32.xlu1 %v3679_v17, %s3322_s1  ;;  %3122 = vmatprep.mubr.msk.f32.mxu0 %vm843_vm1, %v612_v23  ;;  %v3806_v44 = vpop.f32.mrf.mxu0  ;;  %v1280_v22 = vand.u32 2147483647, %v3650_v5 }
  0xdc   :  { %v3255_v26 = vpop.eup %3254  ;;  %v3059_v27 = vpop.f32.mrf.mxu1  ;;  %3123 = vmatmul.mubr.msk.f32.gmra.mxu0 %vm843_vm1, %v3056_v19  ;;  %5473 = vst [vmem:[#allocation13_spill] sm:$0xff] %v3806_v44  ;;  %v1277_v19 = vand.u32 2147483647, %v3645_v3  ;;  %v1279_v23 = vand.u32 2147483647, %v3653_v8 }
  0xdd   :  { %5469 = vst [vmem:[#allocation9_spill] sm:$0xff] %v3705_v25  ;;  %2563 = vst.msk [vmem:[%s5386_s12 + $0x28] sm:$0xff] %vm843_vm1, %v3705_v25  ;;  %v3717_v28 = vmul.f32 0.015625, %v3255_v26  ;;  %2129 = vrot.lane.b32.xlu0 %v3667_v13, %s3322_s1  ;;  %v3808_v45 = vpop.f32.mrf.mxu0  ;;  %v1292_v1 = vsub.f32 %v1280_v22, %v1288_v18  ;;  %v1283_v8 = vand.u32 2147483647, %v3698_v24  ;;  %v699_v22 = vld [vmem:[%s5376_s2 + $0x10] sm:$0xff] }
  0xde   :  { %v3257_v29 = vpop.eup %3256  ;;  %v622_v30 = vpop.f32.mrf.mxu1  ;;  %5474 = vst [vmem:[#allocation14_spill] sm:$0xff] %v3808_v45 }
  0xdf   :  { %5470 = vst [vmem:[#allocation10_spill] sm:$0xff] %v3717_v28  ;;  %2562 = vst.msk [vmem:[%s5386_s12 + $0x20] sm:$0xff] %vm843_vm1, %v3717_v28  ;;  %v3726_v31 = vmul.f32 0.015625, %v3257_v29  ;;  %2133 = vrot.lane.b32.xlu1 %v3693_v21, %s3322_s1  ;;  %3125 = vmatprep.mubr.msk.f32.mxu0 %vm843_vm1, %v622_v30  ;;  %v3810_v46 = vpop.f32.mrf.mxu0  ;;  %v1289_v29 = vsub.f32 %v1277_v19, %v1288_v18  ;;  %v1282_v30 = vand.u32 2147483647, %v3660_v12  ;;  %v1696_v19 = vld [vmem:[%s5378_s4 + $0x50] sm:$0xff] }
  0xe0   :  { %v3259_v32 = vpop.eup %3258  ;;  %v3062_v33 = vpop.f32.mrf.mxu1  ;;  %3126 = vmatmul.mubr.msk.f32.gmra.mxu0 %vm843_vm1, %v3059_v27  ;;  %v1290_v27 = vsub.f32 %v1278_v15, %v1288_v18  ;;  %v1295_v0 = vsub.f32 %v1283_v8, %v1288_v18 }
  0xe1   :  { %5471 = vst [vmem:[#allocation11_spill] sm:$0xff] %v3726_v31  ;;  %2565 = vst.msk [vmem:[%s5386_s12 + $0x38] sm:$0xff] %vm843_vm1, %v3726_v31  ;;  %v3737_v34 = vmul.f32 0.015625, %v3259_v32  ;;  %2237 = vrot.lane.b32.xlu0 %v3679_v17, %s3323_s30  ;;  %3075 = vmatprep.subr.mxu1 %v3726_v31  ;;  %v3812_v47 = vpop.f32.mrf.mxu0  ;;  %v1281_v32 = vand.u32 2147483647, %v3672_v16  ;;  %v1297_v3 = vmax.f32 %v1289_v29, 0.0 }
  0xe2   :  { %v632_v35 = vpop.f32.mrf.mxu1  ;;  %3076 = vmatpush3.msra.mxu1 %v3726_v31  ;;  %v701_v29 = vld [vmem:[%s5376_s2 + $0x20] sm:$0xff] }
  0xe3   :  { %5472 = vst [vmem:[#allocation12_spill] sm:$0xff] %v3737_v34  ;;  %2564 = vst.msk [vmem:[%s5386_s12 + $0x30] sm:$0xff] %vm843_vm1, %v3737_v34  ;;  %2139 = vrot.lane.b32.xlu1 %v3705_v25, %s3322_s1  ;;  %3077 = vmatprep.subr.mxu1 %v3737_v34  ;;  %v3814_v48 = vpop.f32.mrf.mxu0  ;;  %v1293_v5 = vsub.f32 %v1281_v32, %v1288_v18  ;;  %v1321_v16 = vmul.f32 0.5, %v1297_v3 }
  0xe4   :  { %3128 = vmatprep.mubr.msk.f32.mxu0 %vm843_vm1, %v632_v35  ;;  %v3065_v36 = vpop.f32.mrf.mxu1  ;;  %3078 = vmatpush3.msra.mxu1 %v3737_v34  ;;  %v1291_v35 = vsub.f32 %v1279_v23, %v1288_v18  ;;  %v700_v23 = vld [vmem:[%s5376_s2 + $0x18] sm:$0xff] }
  0xe5   :  { %3129 = vmatmul.mubr.msk.f32.gmra.mxu0 %vm843_vm1, %v3062_v33  ;;  %2235 = vrot.lane.b32.xlu0 %v3693_v21, %s3323_s30  ;;  %v3816_v49 = vpop.f32.mrf.mxu0  ;;  %v1284_v33 = vand.u32 2147483647, %v3686_v20  ;;  %v3893_v20 = vmax.f32 %v1293_v5, 0.0  ;;  %v3922_v32 = vmul.f32 %v1321_v16, %v1297_v3  ;;  %v3932_v5 = vmax.f32 %v1295_v0, 0.0 }
  0xe6   :  { %3079 = vmatprep.subr.mxu1 %v3705_v25  ;;  %v642_v37 = vpop.f32.mrf.mxu1  ;;  %5475 = vst [vmem:[#allocation15_spill] sm:$0xff] %v3816_v49  ;;  %v5488_v16 = vmov 0 }
  0xe7   :  { %3080 = vmatpush3.msra.mxu1 %v3705_v25  ;;  %2137 = vrot.lane.b32.xlu1 %v3717_v28, %s3322_s1  ;;  %v3818_v50 = vpop.f32.mrf.mxu0  ;;  %5481 = vst [vmem:[#allocation21_spill] sm:$0xff] %v3922_v32  ;;  %v1311_v10 = vand.u32 2147483647, %v3932_v5 }
  0xe8   :  { %3081 = vmatprep.subr.mxu1 %v3717_v28  ;;  %3131 = vmatprep.mubr.msk.f32.mxu0 %vm843_vm1, %v642_v37  ;;  %v3068_v38 = vpop.f32.mrf.mxu1  ;;  %5476 = vst [vmem:[#allocation16_spill] sm:$0xff] %v3818_v50  ;;  %v1298_v37 = vmax.f32 %v1290_v27, 0.0 }
  0xe9   :  { %3082 = vmatpush3.msra.mxu1 %v3717_v28  ;;  %3132 = vmatmul.mubr.msk.f32.gmra.mxu0 %vm843_vm1, %v3065_v36  ;;  %v3820_v51 = vpop.f32.mrf.mxu0  ;;  %vm4086_vm11 = vcmp.lt.f32.partialorder %v1311_v10, 1.0 }
  0xea   :  { %2241 = vrot.lane.b32.xlu0 %v3705_v25, %s3323_s30  ;;  %3083 = vmatprep.subr.mxu1 %v3679_v17  ;;  %v652_v39 = vpop.f32.mrf.mxu1  ;;  %5477 = vst [vmem:[#allocation17_spill] sm:$0xff] %v3820_v51  ;;  %v1322_v12 = vmul.f32 0.5, %v1298_v37  ;;  %v1306_v24 = vand.u32 2147483647, %v1298_v37 }
  0xeb   :  { %3084 = vmatpush3.msra.mxu1 %v3679_v17  ;;  %2143 = vrot.lane.b32.xlu1 %v3726_v31, %s3322_s1  ;;  %v3822_v52 = vpop.f32.mrf.mxu0 }
  0xec   :  { %3085 = vmatprep.subr.mxu1 %v3693_v21  ;;  %3134 = vmatprep.mubr.msk.f32.mxu0 %vm843_vm1, %v652_v39  ;;  %v3071_v40 = vpop.f32.mrf.mxu1  ;;  %v1296_v39 = vsub.f32 %v1284_v33, %v1288_v18  ;;  %vm3944_vm3 = vcmp.lt.f32.partialorder %v1306_v24, 1.0 }
  0xed   :  { %3086 = vmatpush3.msra.mxu1 %v3693_v21  ;;  %3135 = vmatmul.mubr.msk.f32.gmra.mxu0 %vm843_vm1, %v3068_v38  ;;  %v3832_v55 = vpop.f32.mrf.mxu0  ;;  %v1294_v38 = vsub.f32 %v1282_v30, %v1288_v18  ;;  %v3920_v30 = vmul.f32 %v1322_v12, %v1298_v37  ;;  %v3934_v37 = vadd.f32 -0.5, %v1306_v24  ;;  %v5485_v12 = vmov 0 }
  0xee   :  { %2239 = vrot.lane.b32.xlu0 %v3717_v28, %s3323_s30  ;;  %3087 = vmatprep.subr.mxu1 %v3655_v9  ;;  %v662_v41 = vpop.f32.mrf.mxu1  ;;  %v5486_v12 = vsel %vm3944_vm3, 4294967295, %v5485_v12 }
  0xef   :  { %3088 = vmatpush3.msra.mxu1 %v3655_v9  ;;  %2141 = vrot.lane.b32.xlu1 %v3737_v34, %s3322_s1  ;;  %v3834_v56 = vpop.f32.mrf.mxu0  ;;  %5480 = vst [vmem:[#allocation20_spill] sm:$0xff] %v3920_v30  ;;  %5482 = vst [vmem:[#allocation22_spill] sm:$0xff] %v3934_v37  ;;  %v1578_v37 = vsub.s32 3, %v3859_v6 }
  0xf0   :  { %3089 = vmatprep.subr.mxu1 %v3667_v13  ;;  %3137 = vmatprep.mubr.msk.f32.mxu0 %vm843_vm1, %v662_v41  ;;  %v3074_v42 = vpop.f32.mrf.mxu1  ;;  %v3887_v41 = vmax.f32 %v1291_v35, 0.0  ;;  %v1695_v35 = vld [vmem:[%s5378_s4 + $0x48] sm:$0xff]  ;;  %5487 = vst [vmem:[#allocation25_spill] sm:$0xff] %v5486_v12 }
  0xf1   :  { %3090 = vmatpush3.msra.mxu1 %v3667_v13  ;;  %3138 = vmatmul.mubr.msk.f32.gmra.mxu0 %vm843_vm1, %v3071_v40  ;;  %v3837_v58 = vpop.f32.mrf.mxu0  ;;  %v1300_v40 = vmax.f32 %v1292_v1, 0.0  ;;  %v1325_v1 = vmul.f32 0.5, %v3893_v20 }
  0xf2   :  { %2243 = vrot.lane.b32.xlu0 %v3737_v34, %s3323_s30  ;;  %v672_v43 = vpop.f32.mrf.mxu1  ;;  %3092 = vmatmul.mubr.msk.f32.vlgmr.msra.gmra.mxu1 %vm705_vm2, %v698_v54  ;;  %v1697_v54 = vld [vmem:[%s5378_s4 + $0x58] sm:$0xff]  ;;  %v1323_v27 = vmul.f32 0.5, %v3887_v41  ;;  %v1307_v24 = vand.u32 2147483647, %v3887_v41 }
  0xf3   :  { %2245 = vrot.lane.b32.xlu1 %v3726_v31, %s3323_s30  ;;  %3140 = vmatprep.mubr.msk.f32.mxu0 %vm843_vm1, %v672_v43  ;;  %v3843_v60 = vpop.f32.mrf.mxu0  ;;  %v3891_v43 = vmax.f32 %v1294_v38, 0.0  ;;  %v1324_v15 = vmul.f32 0.5, %v1300_v40 }
  0xf4   :  { %3155 = vmatprep.subr.mxu1 %v5390_v57  ;;  %3094 = vmatprep.mubr.msk.f32.mxu1 %vm705_vm2, %v699_v22  ;;  %v3963_v0 = vmul.f32 %v1323_v27, %v3887_v41  ;;  %vm4041_vm6 = vcmp.lt.f32.partialorder %v1307_v24, 1.0 }
  0xf5   :  { %3141 = vmatmul.mubr.msk.f32.gmra.mxu0 %vm843_vm1, %v3074_v42  ;;  %3156 = vmatpush3.msra.mxu1 %v1701_v59  ;;  %v3845_v61 = vpop.f32.mrf.mxu0  ;;  %v1305_v59 = vand.u32 2147483647, %v1297_v3  ;;  %v1326_v33 = vmul.f32 0.5, %v3891_v43  ;;  %v3942_v8 = vmul.f32 %v1324_v15, %v1300_v40 }
  0xf6   :  { %3143 = vmatprep.mubr.msk.f32.mxu0 %vm843_vm1, %v3667_v13  ;;  %3157 = vmatprep.subr.mxu1 %v5390_v57  ;;  %5492 = vst [vmem:[#allocation28_spill] sm:$0xff] %v3963_v0  ;;  %v5504_v13 = vmov 0 }
  0xf7   :  { %3158 = vmatpush3.msra.mxu1 %v1700_v62  ;;  %v3850_v63 = vpop.f32.mrf.mxu0  ;;  %v3901_v62 = vmax.f32 %v1296_v39, 0.0  ;;  %v3936_v3 = vadd.f32 -0.5, %v1305_v59  ;;  %v702_v39 = vld [vmem:[%s5376_s2 + $0x28] sm:$0xff]  ;;  %5484 = vst [vmem:[#allocation24_spill] sm:$0xff] %v3942_v8  ;;  %vm3948_vm4 = vcmp.lt.f32.partialorder %v1305_v59, 1.0  ;;  %v3973_v22 = vmul.f32 %v1326_v33, %v3891_v43 }
  0xf8   :  { %3159 = vmatprep.subr.mxu1 %v5390_v57  ;;  %3095 = vmatmul.mubr.msk.f32.gmra.mxu1 %vm705_vm2, %v700_v23  ;;  %v5489_v16 = vsel %vm3948_vm4, 4294967295, %v5488_v16  ;;  %v1310_v59 = vand.u32 2147483647, %v3891_v43  ;;  %v1309_v23 = vand.u32 2147483647, %v3893_v20  ;;  %v1327_v43 = vmul.f32 0.5, %v3932_v5 }
  0xf9   :  { %3144 = vmatmul.mubr.msk.f32.gmra.mxu0 %vm843_vm1, %v3655_v9  ;;  %3160 = vmatpush3.msra.mxu1 %v1699_v2  ;;  %v3856_v4 = vpop.f32.mrf.mxu0  ;;  %v1308_v2 = vand.u32 2147483647, %v1300_v40  ;;  %v1328_v38 = vmul.f32 0.5, %v3901_v62  ;;  %5483 = vst [vmem:[#allocation23_spill] sm:$0xff] %v3936_v3  ;;  %5490 = vst [vmem:[#allocation26_spill] sm:$0xff] %v5489_v16  ;;  %v703_v40 = vld [vmem:[%s5376_s2 + $0x30] sm:$0xff] }
  0xfa   :  { %3146 = vmatprep.mubr.msk.f32.mxu0 %vm843_vm1, %v3693_v21  ;;  %3161 = vmatprep.subr.mxu1 %v5390_v57  ;;  %5496 = vst [vmem:[#allocation30_spill] sm:$0xff] %v3973_v22  ;;  %v1312_v41 = vand.u32 2147483647, %v3901_v62  ;;  %v4020_v33 = vmul.f32 3.0, %v3837_v58  ;;  %vm4045_vm7 = vcmp.lt.f32.partialorder %v1310_v59, 1.0  ;;  %v4049_v21 = vadd.f32 -0.5, %v1310_v59 }
  0xfb   :  { %v3861_v7 = vpop.f32.mrf.mxu0  ;;  %3162 = vmatpush3.msra.mxu1 %v1698_v53  ;;  %3097 = vmatprep.mubr.msk.f32.mxu1 %vm705_vm2, %v701_v29  ;;  %v3952_v53 = vadd.f32 -0.5, %v1308_v2  ;;  %vm3968_vm5 = vcmp.lt.f32.partialorder %v1308_v2, 1.0  ;;  %v3977_v29 = vmul.f32 %v1325_v1, %v3893_v20  ;;  %v1693_v2 = vld [vmem:[%s5378_s4 + $0x38] sm:$0xff]  ;;  %v3986_v27 = vmul.f32 %v1328_v38, %v3901_v62  ;;  %v1690_v59 = vld [vmem:[%s5378_s4 + $0x20] sm:$0xff] }
  0xfc   :  { %3163 = vmatprep.subr.mxu1 %v5390_v57  ;;  %3098 = vmatmul.mubr.msk.f32.gmra.mxu1 %vm705_vm2, %v702_v39  ;;  %v704_v62 = vld [vmem:[%s5376_s2 + $0x38] sm:$0xff]  ;;  %v4002_v1 = vmul.f32 3.0, %v3822_v52  ;;  %v1692_v39 = vld [vmem:[%s5378_s4 + $0x30] sm:$0xff]  ;;  %v4026_v38 = vmul.f32 3.0, %v3843_v60  ;;  %v5505_v13 = vsel %vm4045_vm7, 4294967295, %v5504_v13  ;;  %5507 = vst [vmem:[#allocation36_spill] sm:$0xff] %v4049_v21 }
  0xfd   :  { %3147 = vmatmul.mubr.msk.f32.gmra.mxu0 %vm843_vm1, %v3679_v17  ;;  %v3871_v14 = vpop.f32.mrf.mxu0  ;;  %3164 = vmatpush3.msra.mxu1 %v1697_v54  ;;  %5491 = vst [vmem:[#allocation27_spill] sm:$0xff] %v3952_v53  ;;  %v1694_v54 = vld [vmem:[%s5378_s4 + $0x40] sm:$0xff]  ;;  %5497 = vst [vmem:[#allocation31_spill] sm:$0xff] %v3977_v29  ;;  %v5501_v17 = vmov 0  ;;  %v4051_v9 = vadd.f32 -0.5, %v1309_v23  ;;  %vm4060_vm9 = vcmp.lt.f32.partialorder %v1309_v23, 1.0  ;;  %v4076_v23 = vmul.f32 %v1327_v43, %v3932_v5 }
  0xfe   :  { %3149 = vmatprep.mubr.msk.f32.mxu0 %vm843_vm1, %v3717_v28  ;;  %3165 = vmatprep.subr.mxu1 %v5390_v57  ;;  %5498 = vst [vmem:[#allocation32_spill] sm:$0xff] %v3986_v27  ;;  %v1691_v28 = vld [vmem:[%s5378_s4 + $0x28] sm:$0xff]  ;;  %v5502_v17 = vsel %vm4041_vm6, 4294967295, %v5501_v17  ;;  %5506 = vst [vmem:[#allocation35_spill] sm:$0xff] %v5505_v13  ;;  %v4064_v8 = vadd.f32 -0.5, %v1312_v41  ;;  %vm4071_vm10 = vcmp.lt.f32.partialorder %v1312_v41, 1.0 }
  0xff   :  { %v3879_v26 = vpop.f32.mrf.mxu0  ;;  %3166 = vmatpush3.msra.mxu1 %v1696_v19  ;;  %v5493_v19 = vmov 0  ;;  %3100 = vmatprep.mubr.msk.f32.mxu1 %vm705_vm2, %v703_v40  ;;  %v4017_v40 = vmul.f32 3.0, %v3834_v56  ;;  %5503 = vst [vmem:[#allocation34_spill] sm:$0xff] %v5502_v17  ;;  %5508 = vst [vmem:[#allocation37_spill] sm:$0xff] %v4051_v9  ;;  %v5513_v3 = vmov 0  ;;  %v5518_v41 = vmov 0 }
 0x100   :  { %3167 = vmatprep.subr.mxu1 %v5390_v57  ;;  %v5494_v19 = vsel %vm3968_vm5, 4294967295, %v5493_v19  ;;  %3101 = vmatmul.mubr.msk.f32.gmra.mxu1 %vm705_vm2, %v704_v62  ;;  %v5509_v62 = vmov 0  ;;  %5512 = vst [vmem:[#allocation39_spill] sm:$0xff] %v4064_v8  ;;  %v5514_v3 = vsel %vm4071_vm10, 4294967295, %v5513_v3  ;;  %5516 = vst [vmem:[#allocation41_spill] sm:$0xff] %v4076_v23  ;;  %v5519_v41 = vsel %vm4086_vm11, 4294967295, %v5518_v41 }
 0x101   :  { %3150 = vmatmul.mubr.msk.f32.gmra.mxu0 %vm843_vm1, %v3705_v25  ;;  %v3884_v36 = vpop.f32.mrf.mxu0  ;;  %5495 = vst [vmem:[#allocation29_spill] sm:$0xff] %v5494_v19  ;;  %3168 = vmatpush3.msra.mxu1 %v1695_v35  ;;  %v1384_v35 = vsub.s32 1, %v3859_v6  ;;  %v5500_v25 = vmov 0.0   ;;  %v5510_v62 = vsel %vm4060_vm9, 4294967295, %v5509_v62  ;;  %v1481_v19 = vsub.s32 2, %v3859_v6  ;;  %5515 = vst [vmem:[#allocation40_spill] sm:$0xff] %v5514_v3 }
 0x102   :  { %3152 = vmatprep.mubr.msk.f32.mxu0 %vm843_vm1, %v3737_v34  ;;  %3169 = vmatprep.subr.mxu1 %v5390_v57  ;;  %v4034_v34 = vadd.f32 -0.5, %v1307_v24  ;;  %5511 = vst [vmem:[#allocation38_spill] sm:$0xff] %v5510_v62  ;;  %5520 = vst [vmem:[#allocation43_spill] sm:$0xff] %v5519_v41  ;;  %v1689_v5 = vld [vmem:[%s5378_s4 + $0x18] sm:$0xff]  ;;  %v1686_v27 = vld [vmem:[%s5378_s4] sm:$0xff] }
 0x103   :  { %v3889_v42 = vpop.f32.mrf.mxu0  ;;  %3170 = vmatpush3.msra.mxu1 %v1694_v54  ;;  %v4014_v54 = vmul.f32 3.0, %v3832_v55  ;;  %3187 = vmatprep.mubr.msk.f32.mxu1 %vm3325_vm8, %v5500_v25  ;;  %v4058_v24 = vrot.slane %v3869_v11, %v1384_v35  ;;  %v4078_v35 = vadd.f32 -0.5, %v1311_v10  ;;  %v1688_v10 = vld [vmem:[%s5378_s4 + $0x10] sm:$0xff]  ;;  %v4124_v6 = vrot.slane %v3869_v11, %v1481_v19  ;;  %v4183_v3 = vld [vmem:[%s5380_s6 + $0x78] sm:$0xff] }
 0x104   :  { %3171 = vmatprep.subr.mxu1 %v5390_v57  ;;  %v4029_v57 = vmul.f32 3.0, %v3845_v61  ;;  %5499 = vst [vmem:[#allocation33_spill] sm:$0xff] %v4034_v34  ;;  %v4142_v19 = vrot.slane %v3869_v11, %v1578_v37  ;;  %5522 = vst [vmem:[#allocation45_spill] sm:$0xff] %v4183_v3 }
 0x105   :  { %3153 = vmatmul.mubr.msk.f32.gmra.mxu0 %vm843_vm1, %v3726_v31  ;;  %v3914_v18 = vpop.f32.mrf.mxu0  ;;  %3172 = vmatpush3.msra.mxu1 %v1693_v2  ;;  %v4032_v31 = vmul.f32 3.0, %v3850_v63  ;;  %5517 = vst [vmem:[#allocation42_spill] sm:$0xff] %v4078_v35 }
 0x106   :  { %3173 = vmatprep.subr.mxu1 %v5500_v25 }
 0x107   :  { %v3966_v15 = vpop.f32.mrf.mxu0  ;;  %3174 = vmatpush3.msra.mxu1 %v1692_v39 }
 0x108   :  { %3175 = vmatprep.subr.mxu1 %v5500_v25 }
 0x109   :  { %v4022_v20 = vpop.f32.mrf.mxu0  ;;  %3176 = vmatpush3.msra.mxu1 %v1691_v28  ;;  %v4095_v28 = vmul.f32 3.0, %v3856_v4 }
 0x10a   :  { %3177 = vmatprep.subr.mxu1 %v5500_v25 }
 0x10b   :  { %3178 = vmatpush3.msra.mxu1 %v1690_v59 }
 0x10c   :  { %3179 = vmatprep.subr.mxu1 %v5500_v25 }
 0x10d   :  { %3180 = vmatpush3.msra.mxu1 %v1689_v5 }
 0x10e   :  { %3181 = vmatprep.subr.mxu1 %v5500_v25 }
 0x10f   :  { %3182 = vmatpush3.msra.mxu1 %v1688_v10 }
 0x110   :  { %3183 = vmatprep.subr.mxu1 %v5500_v25 }
 0x188   :  { %v3109_v2 = vpop.f32.mrf.mxu0 }
 0x189   :  { %v4055_v53 = vmul.f32 %v3109_v2, %v3806_v44  ;;  %v4109_v12 = vmul.f32 %v3109_v2, %v3109_v2  ;;  %v4135_v29 = vmul.f32 %v3109_v2, %v3861_v7 }
 0x18a   :  { %v1006_v39 = vpop.f32.mrf.mxu0 }
 0x18b   :  { %v1375_v32 = vand.u32 2147483647, %v4055_v53  ;;  %2535 = vst [vmem:[#allocation2 + $0x48] sm:$0xff] %v4055_v53  ;;  %v4083_v16 = vmul.f32 %v1006_v39, %v3808_v45  ;;  %v4112_v44 = vmul.f32 %v1006_v39, %v1006_v39  ;;  %v1182_v11 = vmul.f32 %v3822_v52, %v4109_v12 }
 0x18c   :  { %v3112_v43 = vpop.f32.mrf.mxu0 }
 0x18d   :  { %v1387_v45 = vsub.f32 %v1375_v32, %v4058_v24  ;;  %v1374_v17 = vand.u32 2147483647, %v4083_v16  ;;  %2534 = vst [vmem:[#allocation2 + $0x40] sm:$0xff] %v4083_v16  ;;  %v4121_v30 = vmul.f32 %v3112_v43, %v3810_v46  ;;  %v4139_v21 = vmul.f32 %v3112_v43, %v3112_v43  ;;  %v1687_v32 = vld [vmem:[%s5378_s4 + $0x8] sm:$0xff]  ;;  %s3329_s4 = smov [#allocation2]  }
 0x18e   :  { %v1016_v59 = vpop.f32.mrf.mxu0  ;;  %v4160_v37 = vmul.f32 %v4112_v44, %v3832_v55  ;;  %v4173_v10 = vmul.f32 %v3112_v43, %v3879_v26  ;;  %3184 = vmatpush3.msra.mxu1 %v1687_v32  ;;  %s2632_s27 = sshll.u32 %s3329_s4, 4  ;;  %s2633_s27 = int_to_ptr.vmem [resolvable:$true] %s2632_s27 }
 0x18f   :  { %v4137_v62 = vmax.f32 %v1387_v45, 0.0  ;;  %v1386_v8 = vsub.f32 %v1374_v17, %v4058_v24  ;;  %v1377_v5 = vand.u32 2147483647, %v4121_v30  ;;  %2537 = vst [vmem:[#allocation2 + $0x58] sm:$0xff] %v4121_v30  ;;  %v4151_v7 = vmul.f32 %v1016_v59, %v1016_v59  ;;  %3185 = vmatprep.subr.mxu1 %v5500_v25  ;;  %s3300_s1 = scalar_lea.vmem %s2633_s27, 4096  ;;  %p3305_p1 = scmp.lt.s32.totalorder %s2633_s27, %s2633_s27 }
 0x190   :  { %v4154_v45 = vmul.f32 %v1016_v59, %v3812_v47  ;;  %v3115_v2 = vpop.f32.mrf.mxu0  ;;  %v4163_v17 = vmul.f32 %v1006_v39, %v3871_v14  ;;  %v1184_v32 = vmul.f32 %v3834_v56, %v4139_v21  ;;  %v4203_v22 = vmul.f32 %v1016_v59, %v3884_v36  ;;  %3186 = vmatpush3.msra.mxu1 %v1686_v27  ;;  %p3301_p0 = scmp.ne.s32.totalorder %s2633_s27, %s3300_s1  ;;  %p3306_p2 = scmp.lt.s32.totalorder %s3300_s1, %s3300_s1 }
 0x191   :  { %v4166_v9 = vmul.f32 %v3115_v2, %v3814_v48  ;;  %v1389_v52 = vsub.f32 %v1377_v5, %v4058_v24  ;;  %v4178_v14 = vmul.f32 %v3115_v2, %v3115_v2  ;;  %v1403_v5 = vand.u32 2147483647, %v4137_v62  ;;  %3190 = vmatprep.subr.mxu1 %v4183_v3 }
 0x192   :  { %v1376_v55 = vand.u32 2147483647, %v4154_v45  ;;  %2536 = vst [vmem:[#allocation2 + $0x50] sm:$0xff] %v4154_v45  ;;  %v1026_v39 = vpop.f32.mrf.mxu0  ;;  %v4194_v23 = vmax.f32 %v1386_v8, 0.0  ;;  %v4200_v41 = vmul.f32 %v4151_v7, %v3837_v58  ;;  %v4207_v0 = vmul.f32 %v3115_v2, %v3889_v42  ;;  %v5556_v2 = vld [vmem:[#allocation23_spill] sm:$0xff]  ;;  %p3307_p3 = por %p3306_p2, %p3305_p1 }
 0x193   :  { %5521 = vst [vmem:[#allocation44_spill] sm:$0xff] %v4178_v14  ;;  %v1379_v35 = vand.u32 2147483647, %v4166_v9  ;;  %2539 = vst [vmem:[#allocation2 + $0x68] sm:$0xff] %v4166_v9  ;;  %v4187_v26 = vmul.f32 %v1026_v39, %v1026_v39  ;;  %v4190_v43 = vmul.f32 %v1026_v39, %v3816_v49  ;;  %v4213_v56 = vmax.f32 %v1389_v52, 0.0 }
 0x194   :  { %v3118_v13 = vpop.f32.mrf.mxu0  ;;  %v1388_v34 = vsub.f32 %v1376_v55, %v4058_v24  ;;  %v4217_v58 = vmul.f32 %v3843_v60, %v4178_v14  ;;  %v4229_v59 = vmul.f32 %v1026_v39, %v3914_v18  ;;  %vm4231_vm12 = vcmp.lt.f32.partialorder %v1403_v5, 1.0  ;;  %p3308_p4 = pnand %p3307_p3, %p3301_p0 }
 0x195   :  { %5523 = vst [vmem:[#allocation46_spill] sm:$0xff] %v4187_v26  ;;  %v1391_v25 = vsub.f32 %v1379_v35, %v4058_v24  ;;  %v1378_v8 = vand.u32 2147483647, %v4190_v43  ;;  %2538 = vst [vmem:[#allocation2 + $0x60] sm:$0xff] %v4190_v43  ;;  %v4219_v36 = vmul.f32 %v3118_v13, %v3118_v13  ;;  %v4222_v27 = vmul.f32 %v3118_v13, %v3818_v50 }
 0x196   :  { %5524 = vst [vmem:[#allocation47_spill] sm:$0xff] %v4213_v56  ;;  %v1036_v42 = vpop.f32.mrf.mxu0  ;;  %v4226_v35 = vmul.f32 %v4187_v26, %v3845_v61  ;;  %v1419_v60 = vmul.f32 0.5, %v4137_v62  ;;  %v4244_v18 = vmax.f32 %v1388_v34, 0.0  ;;  %v4249_v50 = vmul.f32 %v3118_v13, %v3966_v15 }
 0x197   :  { %5525 = vst [vmem:[#allocation48_spill] sm:$0xff] %v4219_v36  ;;  %v1390_v52 = vsub.f32 %v1378_v8, %v4058_v24  ;;  %v1381_v55 = vand.u32 2147483647, %v4222_v27  ;;  %2541 = vst [vmem:[#allocation2 + $0x78] sm:$0xff] %v4222_v27  ;;  %v4239_v3 = vmul.f32 %v1036_v42, %v1036_v42  ;;  %v4242_v61 = vmul.f32 %v1036_v42, %v3820_v51 }
 0x198   :  { %v3121_v26 = vpop.f32.mrf.mxu0  ;;  %5528 = vst [vmem:[#allocation49_spill] sm:$0xff] %v4244_v18  ;;  %v4246_v39 = vmax.f32 %v1391_v25, 0.0  ;;  %v4254_v8 = vmul.f32 %v3850_v63, %v4219_v36  ;;  %v4261_v25 = vmul.f32 %v1036_v42, %v4022_v20 }
 0x199   :  { %v1190_v14 = vmul.f32 %v3121_v26, %v4055_v53  ;;  %v1393_v56 = vsub.f32 %v1381_v55, %v4058_v24  ;;  %v1380_v49 = vand.u32 2147483647, %v4242_v61  ;;  %2540 = vst [vmem:[#allocation2 + $0x70] sm:$0xff] %v4242_v61  ;;  %v1222_v34 = vmul.f32 %v3121_v26, %v4002_v1 }
 0x19a   :  { %5529 = vst [vmem:[#allocation50_spill] sm:$0xff] %v4246_v39  ;;  %v1046_v18 = vpop.f32.mrf.mxu0  ;;  %v4265_v53 = vmul.f32 %v1419_v60, %v4137_v62  ;;  %v4267_v63 = vmax.f32 %v1390_v52, 0.0  ;;  %v4271_v55 = vmul.f32 %v4239_v3, %v3856_v4  ;;  %v4274_v1 = vadd.f32 -0.5, %v1403_v5 }
 0x19b   :  { %v1198_v13 = vadd.f32 %v1190_v14, %v1182_v11  ;;  %v1189_v15 = vmul.f32 %v4083_v16, %v1046_v18  ;;  %v1392_v39 = vsub.f32 %v1380_v49, %v4058_v24  ;;  %v1402_v62 = vand.u32 2147483647, %v4194_v23 }
 0x19c   :  { %v3124_v36 = vpop.f32.mrf.mxu0  ;;  %v4279_v11 = vmax.f32 %v1393_v56, 0.0  ;;  %v4281_v42 = vmul.f32 %v3121_v26, %v1190_v14  ;;  %v1221_v4 = vmul.f32 %v4014_v54, %v1046_v18  ;;  %v4285_v49 = vadd.f32 %v1222_v34, %v4135_v29  ;;  %v5535_v29 = vld [vmem:[#allocation14_spill] sm:$0xff] }
 0x19d   :  { %v1472_v51 = vand.u32 2147483647, %v1198_v13  ;;  %2543 = vst [vmem:[#allocation2 + $0x88] sm:$0xff] %v1198_v13  ;;  %v1197_v20 = vadd.f32 %v1189_v15, %v4160_v37  ;;  %v1192_v16 = vmul.f32 %v3124_v36, %v4121_v30  ;;  %v1224_v37 = vmul.f32 %v3124_v36, %v4017_v40 }
 0x19e   :  { %v1056_v60 = vpop.f32.mrf.mxu0  ;;  %v4289_v30 = vmax.f32 %v1392_v39, 0.0  ;;  %v4291_v13 = vmul.f32 %v1189_v15, %v1046_v18  ;;  %v1229_v34 = vadd.f32 %v1221_v4, %v4163_v17  ;;  %vm4340_vm13 = vcmp.lt.f32.partialorder %v1402_v62, 1.0 }
 0x19f   :  { %v1484_v24 = vsub.f32 %v1472_v51, %v4124_v6  ;;  %v1471_v5 = vand.u32 2147483647, %v1197_v20  ;;  %2542 = vst [vmem:[#allocation2 + $0x80] sm:$0xff] %v1197_v20  ;;  %v1200_v52 = vadd.f32 %v1192_v16, %v1184_v32  ;;  %v1191_v14 = vmul.f32 %v4154_v45, %v1056_v60 }
 0x1a0   :  { %v3127_v26 = vpop.f32.mrf.mxu0  ;;  %v1223_v32 = vmul.f32 %v4020_v33, %v1056_v60  ;;  %v4303_v18 = vmul.f32 %v3124_v36, %v1192_v16  ;;  %v1418_v33 = vmul.f32 0.5, %v4194_v23 }
 0x1a1   :  { %v4298_v54 = vmax.f32 %v1484_v24, 0.0  ;;  %v1474_v51 = vand.u32 2147483647, %v1200_v52  ;;  %2545 = vst [vmem:[#allocation2 + $0x98] sm:$0xff] %v1200_v52  ;;  %v1194_v40 = vmul.f32 %v3127_v26, %v4166_v9  ;;  %v1483_v56 = vsub.f32 %v1471_v5, %v4124_v6 }
 0x1a2   :  { %v1199_v45 = vadd.f32 %v1191_v14, %v4200_v41  ;;  %v1066_v39 = vpop.f32.mrf.mxu0  ;;  %v1226_v20 = vmul.f32 %v3127_v26, %v4026_v38  ;;  %v4310_v24 = vadd.f32 %v1224_v37, %v4173_v10  ;;  %v4314_v52 = vmul.f32 %v1191_v14, %v1056_v60 }
 0x1a3   :  { %v1202_v15 = vadd.f32 %v1194_v40, %v4217_v58  ;;  %v1486_v9 = vsub.f32 %v1474_v51, %v4124_v6  ;;  %v1193_v41 = vmul.f32 %v4190_v43, %v1066_v39  ;;  %v1225_v17 = vmul.f32 %v4029_v57, %v1066_v39 }
 0x1a4   :  { %v1473_v36 = vand.u32 2147483647, %v1199_v45  ;;  %2544 = vst [vmem:[#allocation2 + $0x90] sm:$0xff] %v1199_v45  ;;  %v4319_v38 = vadd.f32 %v1223_v32, %v4203_v22  ;;  %v1500_v10 = vand.u32 2147483647, %v4298_v54  ;;  %v4322_v4 = vmax.f32 %v1483_v56, 0.0 }
 0x1a5   :  { %v1476_v16 = vand.u32 2147483647, %v1202_v15  ;;  %2547 = vst [vmem:[#allocation2 + $0xa8] sm:$0xff] %v1202_v15  ;;  %v3130_v58 = vpop.f32.mrf.mxu0  ;;  %v1201_v60 = vadd.f32 %v1193_v41, %v4226_v35  ;;  %v4327_v14 = vmul.f32 %v3127_v26, %v1194_v40  ;;  %v4332_v22 = vadd.f32 %v1226_v20, %v4207_v0 }
 0x1a6   :  { %v1485_v5 = vsub.f32 %v1473_v36, %v4124_v6  ;;  %v1196_v37 = vmul.f32 %v3130_v58, %v4222_v27  ;;  %v1228_v57 = vmul.f32 %v3130_v58, %v4032_v31  ;;  %v4334_v32 = vmax.f32 %v1486_v9, 0.0  ;;  %v5534_v36 = vld [vmem:[#allocation13_spill] sm:$0xff] }
 0x1a7   :  { %v1488_v43 = vsub.f32 %v1476_v16, %v4124_v6  ;;  %v1076_v51 = vpop.f32.mrf.mxu0  ;;  %v1475_v56 = vand.u32 2147483647, %v1201_v60  ;;  %2546 = vst [vmem:[#allocation2 + $0xa0] sm:$0xff] %v1201_v60  ;;  %v1516_v35 = vmul.f32 0.5, %v4298_v54  ;;  %v4344_v26 = vmul.f32 %v1193_v41, %v1066_v39 }
 0x1a8   :  { %v1204_v45 = vadd.f32 %v1196_v37, %v4254_v8  ;;  %v1195_v31 = vmul.f32 %v4242_v61, %v1076_v51  ;;  %v4348_v40 = vadd.f32 %v1225_v17, %v4229_v59  ;;  %vm4350_vm14 = vcmp.lt.f32.partialorder %v1500_v10, 1.0 }
 0x1a9   :  { %v3133_v0 = vpop.f32.mrf.mxu0  ;;  %v4354_v8 = vmax.f32 %v1485_v5, 0.0  ;;  %v1227_v9 = vmul.f32 %v4095_v28, %v1076_v51  ;;  %v4358_v39 = vmax.f32 %v1488_v43, 0.0  ;;  %v4360_v41 = vmul.f32 %v3130_v58, %v1196_v37 }
 0x1aa   :  { %v1478_v20 = vand.u32 2147483647, %v1204_v45  ;;  %2549 = vst [vmem:[#allocation2 + $0xb8] sm:$0xff] %v1204_v45  ;;  %v1238_v16 = vmul.f32 %v3133_v0, %v5534_v36  ;;  %v1203_v61 = vadd.f32 %v1195_v31, %v4271_v55  ;;  %v4364_v17 = vadd.f32 %v1228_v57, %v4249_v50 }
 0x1ab   :  { %v1086_v59 = vpop.f32.mrf.mxu0  ;;  %v1487_v60 = vsub.f32 %v1475_v56, %v4124_v6  ;;  %v4370_v28 = vmul.f32 %v1516_v35, %v4298_v54  ;;  %v4373_v0 = vmul.f32 %v1195_v31, %v1076_v51  ;;  %v4375_v37 = vadd.f32 -0.5, %v1500_v10 }
 0x1ac   :  { %v1246_v5 = vadd.f32 %v1238_v16, %v4285_v49  ;;  %v1237_v45 = vmul.f32 %v1086_v59, %v5535_v29  ;;  %v1490_v43 = vsub.f32 %v1478_v20, %v4124_v6  ;;  %v1477_v58 = vand.u32 2147483647, %v1203_v61  ;;  %2548 = vst [vmem:[#allocation2 + $0xb0] sm:$0xff] %v1203_v61 }
 0x1ad   :  { %v3136_v55 = vpop.f32.mrf.mxu0  ;;  %v1235_v49 = vadd.f32 %v1227_v9, %v4261_v25  ;;  %v4381_v54 = vmul.f32 %v1418_v33, %v4194_v23  ;;  %v4385_v51 = vadd.f32 -0.5, %v1402_v62  ;;  %v1499_v35 = vand.u32 2147483647, %v4322_v4 }
 0x1ae   :  { %v1254_v50 = vmul.f32 %v1246_v5, %v4109_v12  ;;  %v1245_v57 = vadd.f32 %v1237_v45, %v1229_v34  ;;  %v1240_v56 = vmul.f32 %v3136_v55, %v3810_v46  ;;  %v1515_v10 = vmul.f32 0.5, %v4322_v4 }
 0x1af   :  { %v1096_v29 = vpop.f32.mrf.mxu0  ;;  %v4393_v34 = vmax.f32 %v1487_v60, 0.0  ;;  %v4395_v33 = vmax.f32 %v1490_v43, 0.0  ;;  %v1489_v23 = vsub.f32 %v1477_v58, %v4124_v6  ;;  %v1540_v20 = vsel %vm4350_vm14, %v4370_v28, %v4375_v37  ;;  %v5536_v60 = vld [vmem:[#allocation15_spill] sm:$0xff] }
 0x1b0   :  { %v1270_v31 = vadd.f32 %v4281_v42, %v1254_v50  ;;  %v1253_v12 = vmul.f32 %v1245_v57, %v4112_v44  ;;  %v1248_v46 = vadd.f32 %v1240_v56, %v4310_v24  ;;  %v1239_v25 = vmul.f32 %v1096_v29, %v3812_v47  ;;  %v5540_v57 = vld [vmem:[#allocation44_spill] sm:$0xff] }
 0x1b1   :  { %v3139_v62 = vpop.f32.mrf.mxu0  ;;  %v1442_v6 = vsel %vm4340_vm13, %v4381_v54, %v4385_v51  ;;  %v4411_v16 = vmul.f32 %v1515_v10, %v4322_v4  ;;  %v4413_v61 = vadd.f32 -0.5, %v1499_v35  ;;  %vm4420_vm15 = vcmp.lt.f32.partialorder %v1499_v35, 1.0  ;;  %v5539_v4 = vld [vmem:[#allocation47_spill] sm:$0xff]  ;;  %v5541_v29 = vld [vmem:[#allocation16_spill] sm:$0xff] }
 0x1b2   :  { %v1569_v9 = vand.u32 2147483647, %v1270_v31  ;;  %2551 = vst [vmem:[#allocation2 + $0xc8] sm:$0xff] %v1270_v31  ;;  %v1269_v44 = vadd.f32 %v4291_v13, %v1253_v12  ;;  %v1256_v42 = vmul.f32 %v1248_v46, %v4139_v21  ;;  %v1247_v47 = vadd.f32 %v1239_v25, %v4319_v38  ;;  %v5542_v31 = vld [vmem:[#allocation17_spill] sm:$0xff]  ;;  %v5543_v25 = vld [vmem:[#allocation46_spill] sm:$0xff] }
 0x1b3   :  { %v1242_v24 = vmul.f32 %v3139_v62, %v3814_v48  ;;  %v1106_v36 = vpop.f32.mrf.mxu0  ;;  %v1405_v43 = vand.u32 2147483647, %v5539_v4  ;;  %v4431_v35 = vmax.f32 %v1489_v23, 0.0 }
 0x1b4   :  { %v1581_v59 = vsub.f32 %v1569_v9, %v4142_v19  ;;  %v1568_v13 = vand.u32 2147483647, %v1269_v44  ;;  %2550 = vst [vmem:[#allocation2 + $0xc0] sm:$0xff] %v1269_v44  ;;  %v1272_v21 = vadd.f32 %v4303_v18, %v1256_v42  ;;  %v1255_v38 = vmul.f32 %v1247_v47, %v4151_v7  ;;  %v5565_v47 = vld [vmem:[#allocation24_spill] sm:$0xff] }
 0x1b5   :  { %v1250_v48 = vadd.f32 %v1242_v24, %v4332_v22  ;;  %v1241_v5 = vmul.f32 %v1106_v36, %v5536_v60  ;;  %v3142_v45 = vpop.f32.mrf.mxu0  ;;  %v1421_v18 = vmul.f32 0.5, %v5539_v4  ;;  %vm4441_vm0 = vcmp.lt.f32.partialorder %v1405_v43, 1.0 }
 0x1b6   :  { %v1589_v58 = vmax.f32 %v1581_v59, 0.0  ;;  %v1580_v55 = vsub.f32 %v1568_v13, %v4142_v19  ;;  %2553 = vst [vmem:[#allocation2 + $0xd8] sm:$0xff] %v1272_v21  ;;  %v1271_v50 = vadd.f32 %v4314_v52, %v1255_v38  ;;  %v1571_v7 = vand.u32 2147483647, %v1272_v21  ;;  %v5548_v38 = vld [vmem:[#allocation20_spill] sm:$0xff] }
 0x1b7   :  { %v1258_v22 = vmul.f32 %v1250_v48, %v5540_v57  ;;  %v1249_v56 = vadd.f32 %v1241_v5, %v4348_v40  ;;  %v1244_v54 = vmul.f32 %v3142_v45, %v5541_v29  ;;  %v1116_v51 = vpop.f32.mrf.mxu0  ;;  %v1539_v52 = vsel %vm4420_vm15, %v4411_v16, %v4413_v61  ;;  %v5546_v16 = vld [vmem:[#allocation48_spill] sm:$0xff]  ;;  %v5549_v48 = vld [vmem:[#allocation22_spill] sm:$0xff]  ;;  %v5555_v57 = vld [vmem:[#allocation21_spill] sm:$0xff] }
 0x1b8   :  { %v1570_v10 = vand.u32 2147483647, %v1271_v50  ;;  %2552 = vst [vmem:[#allocation2 + $0xd0] sm:$0xff] %v1271_v50  ;;  %v1243_v12 = vmul.f32 %v1116_v51, %v5542_v31  ;;  %v1597_v44 = vand.u32 2147483647, %v1589_v58  ;;  %v1588_v42 = vmax.f32 %v1580_v55, 0.0 }
 0x1b9   :  { %v1274_v46 = vadd.f32 %v4327_v14, %v1258_v22  ;;  %v1257_v62 = vmul.f32 %v1249_v56, %v5543_v25  ;;  %v1252_v40 = vadd.f32 %v1244_v54, %v4364_v17  ;;  %v3145_v9 = vpop.f32.mrf.mxu0  ;;  %v1429_v24 = vmul.f32 %v1421_v18, %v5539_v4 }
 0x1ba   :  { %v1251_v23 = vadd.f32 %v1243_v12, %v1235_v49  ;;  %v1583_v36 = vsub.f32 %v1571_v7, %v4142_v19  ;;  %v1582_v17 = vsub.f32 %v1570_v10, %v4142_v19  ;;  %v5550_v60 = vsel %vm3944_vm3, %v5548_v38, %v5549_v48  ;;  %v5568_v7 = vld [vmem:[#allocation49_spill] sm:$0xff] }
 0x1bb   :  { %v1573_v59 = vand.u32 2147483647, %v1274_v46  ;;  %2555 = vst [vmem:[#allocation2 + $0xe8] sm:$0xff] %v1274_v46  ;;  %v1273_v14 = vadd.f32 %v4344_v26, %v1257_v62  ;;  %v1260_v61 = vmul.f32 %v1252_v40, %v5546_v16  ;;  %v1126_v13 = vpop.f32.mrf.mxu0  ;;  %v1354_v5 = vmul.f32 %v3145_v9, %v5550_v60 }
 0x1bc   :  { %v1259_v21 = vmul.f32 %v1251_v23, %v4239_v3  ;;  %v5551_v45 = vsel %vm4231_vm12, %v4265_v53, %v4274_v1  ;;  %vm4462_vm2 = vcmp.lt.f32.partialorder %v1597_v44, 1.0  ;;  %v1613_v3 = vmul.f32 0.5, %v1589_v58 }
 0x1bd   :  { %v1451_v27 = vmul.f32 %v3145_v9, %v5551_v45  ;;  %v1572_v26 = vand.u32 2147483647, %v1273_v14  ;;  %2554 = vst [vmem:[#allocation2 + $0xe0] sm:$0xff] %v1273_v14  ;;  %v1276_v4 = vadd.f32 %v4360_v41, %v1260_v61  ;;  %v2773_v18 = vadd.f32 -0.5, %v1597_v44  ;;  %v4473_v54 = vpop.f32.mrf.mxu0 }
 0x1be   :  { %v1275_v50 = vadd.f32 %v4373_v0, %v1259_v21  ;;  %v5557_v22 = vsel %vm3948_vm4, %v5555_v57, %v5556_v2  ;;  %v1450_v53 = vmul.f32 %v1442_v6, %v1126_v13  ;;  %v1585_v1 = vsub.f32 %v1573_v59, %v4142_v19 }
 0x1bf   :  { %v1353_v56 = vmul.f32 %v5557_v22, %v1126_v13  ;;  %v1575_v29 = vand.u32 2147483647, %v1276_v4  ;;  %2557 = vst [vmem:[#allocation2 + $0xf8] sm:$0xff] %v1276_v4  ;;  %v1621_v41 = vmul.f32 %v1613_v3, %v1589_v58  ;;  %v2759_v51 = vadd.f32 -0.5, %v1405_v43 }
 0x1c0   :  { %v1584_v10 = vsub.f32 %v1572_v26, %v4142_v19  ;;  %v1574_v31 = vand.u32 2147483647, %v1275_v50  ;;  %2556 = vst [vmem:[#allocation2 + $0xf0] sm:$0xff] %v1275_v50  ;;  %v4476_v12 = vadd.f32 %v1451_v27, %v1450_v53  ;;  %v1547_v25 = vmul.f32 %v1539_v52, %v1126_v13  ;;  %v4493_v52 = vpop.f32.mrf.mxu0 }
 0x1c1   :  { %v1361_v0 = vadd.f32 %v1354_v5, %v1353_v56  ;;  %v1587_v46 = vsub.f32 %v1575_v29, %v4142_v19  ;;  %v1637_v6 = vsel %vm4462_vm2, %v1621_v41, %v2773_v18  ;;  %v1596_v62 = vand.u32 2147483647, %v1588_v42 }
 0x1c2   :  { %v1591_v40 = vmax.f32 %v1583_v36, 0.0  ;;  %v1590_v44 = vmax.f32 %v1582_v17, 0.0  ;;  %v1548_v43 = vmul.f32 %v3145_v9, %v1540_v20  ;;  %v1612_v58 = vmul.f32 0.5, %v1588_v42 }
 0x1c3   :  { %v4486_v23 = vmax.f32 %v1585_v1, 0.0  ;;  %v1586_v59 = vsub.f32 %v1574_v31, %v4142_v19  ;;  %vm4489_vm3 = vcmp.lt.f32.partialorder %v1596_v62, 1.0  ;;  %v2772_v16 = vadd.f32 -0.5, %v1596_v62  ;;  %v4541_v62 = vpop.f32.mrf.mxu0 }
 0x1c4   :  { %v4495_v36 = vmax.f32 %v1584_v10, 0.0  ;;  %v1645_v61 = vmul.f32 %v3145_v9, %v1637_v6  ;;  %v1620_v15 = vmul.f32 %v1612_v58, %v1588_v42  ;;  %v1502_v17 = vand.u32 2147483647, %v4334_v32  ;;  %v5561_v9 = vld [vmem:[#allocation28_spill] sm:$0xff]  ;;  %v5562_v42 = vld [vmem:[#allocation33_spill] sm:$0xff] }
 0x1c5   :  { %v4498_v28 = vmax.f32 %v1587_v46, 0.0  ;;  %v1555_v37 = vadd.f32 %v1548_v43, %v1547_v25  ;;  %v1445_v20 = vsel %vm4441_vm0, %v1429_v24, %v2759_v51  ;;  %v1518_v19 = vmul.f32 0.5, %v4334_v32  ;;  %v5566_v24 = vld [vmem:[#allocation27_spill] sm:$0xff]  ;;  %v5575_v43 = vld [vmem:[#allocation50_spill] sm:$0xff] }
 0x1c6   :  { %v1636_v21 = vsel %vm4489_vm3, %v1620_v15, %v2772_v16  ;;  %v1599_v49 = vand.u32 2147483647, %v1591_v40  ;;  %v1615_v38 = vmul.f32 0.5, %v1591_v40  ;;  %v5563_v60 = vsel %vm4041_vm6, %v5561_v9, %v5562_v42 }
 0x1c7   :  { %v1355_v5 = vmul.f32 %v5563_v60, %v4493_v52  ;;  %v4511_v45 = vmax.f32 %v1586_v59, 0.0  ;;  %v5567_v26 = vsel %vm3968_vm5, %v5565_v47, %v5566_v24  ;;  %v1453_v55 = vmul.f32 %v4473_v54, %v1445_v20  ;;  %v1146_v60 = vpop.f32.mrf.mxu0 }
 0x1c8   :  { %v1356_v4 = vmul.f32 %v4473_v54, %v5567_v26  ;;  %v2767_v3 = vadd.f32 -0.5, %v1502_v17  ;;  %v1526_v50 = vmul.f32 %v1518_v19, %v4334_v32  ;;  %v1404_v57 = vand.u32 2147483647, %v5568_v7 }
 0x1c9   :  { %v1362_v18 = vadd.f32 %v1361_v0, %v1355_v5  ;;  %v1420_v2 = vmul.f32 0.5, %v5568_v7  ;;  %v1644_v22 = vmul.f32 %v1636_v21, %v1126_v13  ;;  %vm4523_vm4 = vcmp.lt.f32.partialorder %v1502_v17, 1.0 }
 0x1ca   :  { %v1501_v53 = vand.u32 2147483647, %v4354_v8  ;;  %v1517_v1 = vmul.f32 0.5, %v4354_v8  ;;  %vm4529_vm5 = vcmp.lt.f32.partialorder %v1599_v49, 1.0  ;;  %v1623_v41 = vmul.f32 %v1615_v38, %v1591_v40 }
 0x1cb   :  { %vm1412_vm6 = vcmp.lt.f32.partialorder %v1404_v57, 1.0  ;;  %v1428_v32 = vmul.f32 %v1420_v2, %v5568_v7  ;;  %v2775_v51 = vadd.f32 -0.5, %v1599_v49  ;;  %v2758_v10 = vadd.f32 -0.5, %v1404_v57 }
 0x1cc   :  { %vm4534_vm8 = vcmp.lt.f32.partialorder %v1501_v53, 1.0  ;;  %v1525_v31 = vmul.f32 %v1517_v1, %v4354_v8  ;;  %v1542_v0 = vsel %vm4523_vm4, %v1526_v50, %v2767_v3  ;;  %v2766_v46 = vadd.f32 -0.5, %v1501_v53  ;;  %v5582_v3 = vld [vmem:[#allocation36_spill] sm:$0xff]  ;;  %v5587_v53 = vld [vmem:[#allocation31_spill] sm:$0xff]  ;;  %v5588_v1 = vld [vmem:[#allocation37_spill] sm:$0xff] }
 0x1cd   :  { %v1598_v6 = vand.u32 2147483647, %v1590_v44  ;;  %v1614_v25 = vmul.f32 0.5, %v1590_v44  ;;  %v1444_v40 = vsel %vm1412_vm6, %v1428_v32, %v2758_v10  ;;  %v1407_v58 = vand.u32 2147483647, %v5575_v43 }
 0x1ce   :  { %v1423_v59 = vmul.f32 0.5, %v5575_v43  ;;  %v1504_v14 = vand.u32 2147483647, %v4358_v39  ;;  %v1452_v16 = vmul.f32 %v1444_v40, %v4493_v52  ;;  %v1541_v8 = vsel %vm4534_vm8, %v1525_v31, %v2766_v46 }
 0x1cf   :  { %vm4549_vm12 = vcmp.lt.f32.partialorder %v1598_v6, 1.0  ;;  %v1622_v17 = vmul.f32 %v1614_v25, %v1590_v44  ;;  %v1639_v20 = vsel %vm4529_vm5, %v1623_v41, %v2775_v51  ;;  %v1549_v19 = vmul.f32 %v1541_v8, %v4493_v52 }
 0x1d0   :  { %v2774_v21 = vadd.f32 -0.5, %v1598_v6  ;;  %v1431_v49 = vmul.f32 %v1423_v59, %v5575_v43  ;;  %v1459_v38 = vadd.f32 %v4476_v12, %v1452_v16  ;;  %vm4558_vm13 = vcmp.lt.f32.partialorder %v1407_v58, 1.0  ;;  %v5581_v12 = vld [vmem:[#allocation30_spill] sm:$0xff]  ;;  %v4606_v59 = vpop.f32.mrf.mxu0 }
 0x1d1   :  { %v2761_v9 = vadd.f32 -0.5, %v1407_v58  ;;  %v1520_v42 = vmul.f32 0.5, %v4358_v39  ;;  %v1652_v5 = vadd.f32 %v1645_v61, %v1644_v22  ;;  %v1550_v44 = vmul.f32 %v4473_v54, %v1542_v0 }
 0x1d2   :  { %v1638_v27 = vsel %vm4549_vm12, %v1622_v17, %v2774_v21  ;;  %v1601_v47 = vand.u32 2147483647, %v4486_v23  ;;  %v1647_v24 = vmul.f32 %v4473_v54, %v1639_v20  ;;  %v5583_v50 = vsel %vm4045_vm7, %v5581_v12, %v5582_v3 }
 0x1d3   :  { %v4574_v7 = vmul.f32 %v4541_v62, %v5583_v50  ;;  %vm4576_vm14 = vcmp.lt.f32.partialorder %v1504_v14, 1.0  ;;  %v1617_v61 = vmul.f32 0.5, %v4486_v23  ;;  %v1556_v2 = vadd.f32 %v1555_v37, %v1549_v19 }
 0x1d4   :  { %v1447_v22 = vsel %vm4558_vm13, %v1431_v49, %v2761_v9  ;;  %v2769_v56 = vadd.f32 -0.5, %v1504_v14  ;;  %v5589_v29 = vsel %vm4060_vm9, %v5587_v53, %v5588_v1  ;;  %v1646_v32 = vmul.f32 %v1638_v27, %v4493_v52 }
 0x1d5   :  { %v1357_v41 = vmul.f32 %v5589_v29, %v1146_v60  ;;  %v1455_v51 = vmul.f32 %v4541_v62, %v1447_v22  ;;  %v1528_v10 = vmul.f32 %v1520_v42, %v4358_v39  ;;  %v1363_v13 = vadd.f32 %v1362_v18, %v1356_v4  ;;  %v5597_v22 = vld [vmem:[#allocation41_spill] sm:$0xff]  ;;  %v5601_v29 = vld [vmem:[#allocation32_spill] sm:$0xff] }
 0x1d6   :  { %v2777_v31 = vadd.f32 -0.5, %v1601_v47  ;;  %v1406_v37 = vand.u32 2147483647, %v4267_v63  ;;  %v1422_v0 = vmul.f32 0.5, %v4267_v63  ;;  %v1460_v46 = vadd.f32 %v1459_v38, %v1453_v55 }
 0x1d7   :  { %v1625_v6 = vmul.f32 %v1617_v61, %v4486_v23  ;;  %v1364_v25 = vadd.f32 %v1363_v13, %v1357_v41  ;;  %v1503_v40 = vand.u32 2147483647, %v4393_v34  ;;  %v1519_v43 = vmul.f32 0.5, %v4393_v34  ;;  %v5602_v41 = vld [vmem:[#allocation39_spill] sm:$0xff] }
 0x1d8   :  { %vm4596_vm7 = vcmp.lt.f32.partialorder %v1601_v47, 1.0  ;;  %vm1414_vm9 = vcmp.lt.f32.partialorder %v1406_v37, 1.0  ;;  %v1430_v39 = vmul.f32 %v1422_v0, %v4267_v63  ;;  %v2760_v4 = vadd.f32 -0.5, %v1406_v37 }
 0x1d9   :  { %v1653_v18 = vadd.f32 %v1652_v5, %v1646_v32  ;;  %vm4601_vm15 = vcmp.lt.f32.partialorder %v1503_v40, 1.0  ;;  %v1527_v23 = vmul.f32 %v1519_v43, %v4393_v34  ;;  %v2768_v55 = vadd.f32 -0.5, %v1503_v40  ;;  %v1156_v5 = vpop.f32.mrf.mxu0 }
 0x1da   :  { %v1544_v14 = vsel %vm4576_vm14, %v1528_v10, %v2769_v56  ;;  %v1446_v16 = vsel %vm1414_vm9, %v1430_v39, %v2760_v4  ;;  %v1600_v8 = vand.u32 2147483647, %v4495_v36  ;;  %v1616_v15 = vmul.f32 0.5, %v4495_v36  ;;  %v5598_v56 = vld [vmem:[#allocation42_spill] sm:$0xff] }
 0x1db   :  { %v1641_v63 = vsel %vm4596_vm7, %v1625_v6, %v2777_v31  ;;  %v1454_v17 = vmul.f32 %v1446_v16, %v1146_v60  ;;  %v1557_v20 = vadd.f32 %v1556_v2, %v1550_v44  ;;  %v1409_v19 = vand.u32 2147483647, %v4279_v11 }
 0x1dc   :  { %v1543_v34 = vsel %vm4601_vm15, %v1527_v23, %v2768_v55  ;;  %vm1608_vm0 = vcmp.lt.f32.partialorder %v1600_v8, 1.0  ;;  %v1624_v21 = vmul.f32 %v1616_v15, %v4495_v36  ;;  %v2776_v49 = vadd.f32 -0.5, %v1600_v8 }
 0x1dd   :  { %v1461_v38 = vadd.f32 %v1460_v46, %v1454_v17  ;;  %v1551_v48 = vmul.f32 %v1543_v34, %v1146_v60  ;;  %v1654_v9 = vadd.f32 %v1653_v18, %v1647_v24  ;;  %v1425_v42 = vmul.f32 0.5, %v4279_v11 }
 0x1de   :  { %v1640_v27 = vsel %vm1608_vm0, %v1624_v21, %v2776_v49  ;;  %v2763_v47 = vadd.f32 -0.5, %v1409_v19  ;;  %v1506_v26 = vand.u32 2147483647, %v4395_v33  ;;  %v1522_v44 = vmul.f32 0.5, %v4395_v33 }
 0x1df   :  { %v1648_v12 = vmul.f32 %v1640_v27, %v1146_v60  ;;  %vm4621_vm2 = vcmp.lt.f32.partialorder %v1409_v19, 1.0  ;;  %v1433_v36 = vmul.f32 %v1425_v42, %v4279_v11  ;;  %v1603_v50 = vand.u32 2147483647, %v4498_v28 }
 0x1e0   :  { %v1552_v24 = vmul.f32 %v4541_v62, %v1544_v14  ;;  %v1649_v57 = vmul.f32 %v4541_v62, %v1641_v63  ;;  %v1619_v61 = vmul.f32 0.5, %v4498_v28  ;;  %v5599_v54 = vsel %vm4086_vm11, %v5597_v22, %v5598_v56 }
 0x1e1   :  { %v1359_v60 = vmul.f32 %v5599_v54, %v1156_v5  ;;  %v1558_v53 = vadd.f32 %v1557_v20, %v1551_v48  ;;  %v5603_v11 = vsel %vm4071_vm10, %v5601_v29, %v5602_v41  ;;  %vm4641_vm3 = vcmp.lt.f32.partialorder %v1506_v26, 1.0  ;;  %v5608_v41 = vld [vmem:[#allocation18_spill] sm:$0xff] }
 0x1e2   :  { %v1360_v32 = vmul.f32 %v4606_v59, %v5603_v11  ;;  %v1530_v62 = vmul.f32 %v1522_v44, %v4395_v33  ;;  %v1655_v13 = vadd.f32 %v1654_v9, %v1648_v12  ;;  %v1449_v31 = vsel %vm4621_vm2, %v1433_v36, %v2763_v47 }
 0x1e3   :  { %v2771_v37 = vadd.f32 -0.5, %v1506_v26  ;;  %v1365_v0 = vadd.f32 %v1364_v25, %v4574_v7  ;;  %vm4649_vm11 = vcmp.lt.f32.partialorder %v1603_v50, 1.0  ;;  %v1408_v6 = vand.u32 2147483647, %v4289_v30 }
 0x1e4   :  { %v1424_v40 = vmul.f32 0.5, %v4289_v30  ;;  %v1462_v43 = vadd.f32 %v1461_v38, %v1455_v51  ;;  %v1627_v52 = vmul.f32 %v1619_v61, %v4498_v28  ;;  %v1505_v33 = vand.u32 2147483647, %v4431_v35 }
 0x1e5   :  { %v1366_v39 = vadd.f32 %v1365_v0, %v1359_v60  ;;  %v1521_v4 = vmul.f32 0.5, %v4431_v35  ;;  %v2779_v18 = vadd.f32 -0.5, %v1603_v50  ;;  %vm1416_vm10 = vcmp.lt.f32.partialorder %v1408_v6, 1.0  ;;  %v3292_v60 = vld [vmem:[#allocation2] sm:$0xff] }
 0x1e6   :  { %v1432_v7 = vmul.f32 %v1424_v40, %v4289_v30  ;;  %v2762_v25 = vadd.f32 -0.5, %v1408_v6  ;;  %vm1513_vm4 = vcmp.lt.f32.partialorder %v1505_v33, 1.0  ;;  %v2770_v55 = vadd.f32 -0.5, %v1505_v33  ;;  %v1794_v33 = vld [vmem:[%s5380_s6 + $0x70] sm:$0xff] }
 0x1e7   :  { %v1367_v58 = vadd.f32 %v1366_v39, %v1360_v32  ;;  %v1529_v23 = vmul.f32 %v1521_v4, %v4431_v35  ;;  %v1559_v16 = vadd.f32 %v1558_v53, %v1552_v24  ;;  %v1602_v51 = vand.u32 2147483647, %v4511_v45 }
 0x1e8   :  { %v1448_v14 = vsel %vm1416_vm10, %v1432_v7, %v2762_v25  ;;  %v1618_v28 = vmul.f32 0.5, %v4511_v45  ;;  %v1457_v8 = vmul.f32 %v4606_v59, %v1449_v31  ;;  %v1546_v35 = vsel %vm4641_vm3, %v1530_v62, %v2771_v37  ;;  %v1793_v7 = vld [vmem:[%s5380_s6 + $0x68] sm:$0xff]  ;;  %v1792_v25 = vld [vmem:[%s5380_s6 + $0x60] sm:$0xff] }
 0x1e9   :  { %v1368_v15 = vrot.slane %v1367_v58, 4  ;;  %v1456_v63 = vmul.f32 %v1448_v14, %v1156_v5  ;;  %v1545_v17 = vsel %vm1513_vm4, %v1529_v23, %v2770_v55  ;;  %vm1610_vm5 = vcmp.lt.f32.partialorder %v1602_v51, 1.0  ;;  %v1790_v23 = vld [vmem:[%s5380_s6 + $0x50] sm:$0xff]  ;;  %v1789_v55 = vld [vmem:[%s5380_s6 + $0x48] sm:$0xff]  ;;  %v1788_v14 = vld [vmem:[%s5380_s6 + $0x40] sm:$0xff] }
 0x1ea   :  { %v1553_v20 = vmul.f32 %v1545_v17, %v1156_v5  ;;  %v1626_v30 = vmul.f32 %v1618_v28, %v4511_v45  ;;  %v2778_v19 = vadd.f32 -0.5, %v1602_v51  ;;  %v1656_v49 = vadd.f32 %v1655_v13, %v1649_v57  ;;  %v3093_v51 = vpop.f32.mrf.mxu1  ;;  %v1786_v28 = vld [vmem:[%s5380_s6 + $0x30] sm:$0xff] }
 0x1eb   :  { %v1369_v34 = vadd.f32 %v1368_v15, %v1367_v58  ;;  %v1463_v21 = vadd.f32 %v1462_v43, %v1456_v63  ;;  %v1554_v38 = vmul.f32 %v4606_v59, %v1546_v35  ;;  %v1643_v48 = vsel %vm4649_vm11, %v1627_v52, %v2779_v18  ;;  %v5609_v18 = vld [vmem:[#allocation45_spill] sm:$0xff]  ;;  %v1791_v58 = vld [vmem:[%s5380_s6 + $0x58] sm:$0xff]  ;;  %2567 = vst.msk [vmem:[%s5386_s12 + $0x48] sm:$0xff] %vm843_vm1, %v3093_v51  ;;  %v1785_v15 = vld [vmem:[%s5380_s6 + $0x28] sm:$0xff] }
 0x1ec   :  { %v1560_v9 = vadd.f32 %v1559_v16, %v1553_v20  ;;  %v1642_v42 = vsel %vm1610_vm5, %v1626_v30, %v2778_v19  ;;  %v1651_v45 = vmul.f32 %v4606_v59, %v1643_v48  ;;  %3260 = vtanh.f32 %v3292_v60  ;;  %v1787_v16 = vld [vmem:[%s5380_s6 + $0x38] sm:$0xff]  ;;  %v3293_v63 = vld [vmem:[#allocation2 + $0x8] sm:$0xff]  ;;  %v3294_v17 = vld [vmem:[#allocation2 + $0x10] sm:$0xff] }
 0x1ed   :  { %v1370_v27 = vrot.slane %v1369_v34, 2  ;;  %v1464_v47 = vadd.f32 %v1463_v21, %v1457_v8  ;;  %v1650_v26 = vmul.f32 %v1642_v42, %v1156_v5  ;;  %vm1667_vm6 = vcmp.eq.s32.totalorder %v5608_v41, 0  ;;  %v796_v8 = vpop.f32.mrf.mxu1  ;;  %v1784_v20 = vld [vmem:[%s5380_s6 + $0x20] sm:$0xff]  ;;  %v1783_v30 = vld [vmem:[%s5380_s6 + $0x18] sm:$0xff]  ;;  %v1781_v21 = vld [vmem:[%s5380_s6 + $0x8] sm:$0xff] }
 0x1ee   :  { %v1561_v44 = vadd.f32 %v1560_v9, %v1554_v38  ;;  %vm1671_vm8 = vcmp.eq.s32.totalorder %v5608_v41, 1  ;;  %vm1676_vm12 = vcmp.eq.s32.totalorder %v5608_v41, 2  ;;  %vm1681_vm13 = vcmp.eq.s32.totalorder %v5608_v41, 3  ;;  %2566 = vst.msk [vmem:[%s5386_s12 + $0x40] sm:$0xff] %vm843_vm1, %v796_v8  ;;  %v3295_v19 = vld [vmem:[#allocation2 + $0x18] sm:$0xff]  ;;  %v3296_v35 = vld [vmem:[#allocation2 + $0x20] sm:$0xff] }
 0x1ef   :  { %v1371_v12 = vadd.f32 %v1370_v27, %v1369_v34  ;;  %v1465_v3 = vrot.slane %v1464_v47, 4  ;;  %v1657_v36 = vadd.f32 %v1656_v49, %v1650_v26  ;;  %3262 = vtanh.f32 %v3293_v63  ;;  %v1782_v34 = vld [vmem:[%s5380_s6 + $0x10] sm:$0xff]  ;;  %v3297_v49 = vld [vmem:[#allocation2 + $0x28] sm:$0xff]  ;;  %v1780_v48 = vld [vmem:[%s5380_s6] sm:$0xff] }
 0x1f0   :  { %v1562_v50 = vrot.slane %v1561_v44, 4  ;;  %3264 = vtanh.f32 %v3294_v17  ;;  %v3298_v38 = vld [vmem:[#allocation2 + $0x30] sm:$0xff]  ;;  %v3299_v9 = vld [vmem:[#allocation2 + $0x38] sm:$0xff]  ;;  %vm2510_vm14 = vcmask 125952   ;;  %vm2263_vm15 = vcmask 392448  }
 0x1f1   :  { %v1372_v24 = vrot.slane %v1371_v12, 1  ;;  %v1466_v61 = vadd.f32 %v1465_v3, %v1464_v47  ;;  %v1658_v57 = vadd.f32 %v1657_v36, %v1651_v45  ;;  %3266 = vtanh.f32 %v3295_v19  ;;  %v3096_v3 = vpop.f32.mrf.mxu1 }
 0x1f2   :  { %v1563_v2 = vadd.f32 %v1562_v50, %v1561_v44  ;;  %3268 = vtanh.f32 %v3296_v35  ;;  %2569 = vst.msk [vmem:[%s5386_s12 + $0x58] sm:$0xff] %vm843_vm1, %v3096_v3 }
 0x1f3   :  { %v1467_v22 = vrot.slane %v1466_v61, 2  ;;  %v1659_v56 = vrot.slane %v1658_v57, 4  ;;  %v1373_v53 = vadd.f32 %v1372_v24, %v1371_v12  ;;  %3270 = vtanh.f32 %v3297_v49  ;;  %v806_v36 = vpop.f32.mrf.mxu1 }
 0x1f4   :  { %v1564_v54 = vrot.slane %v1563_v2, 2  ;;  %3272 = vtanh.f32 %v3298_v38  ;;  %2568 = vst.msk [vmem:[%s5386_s12 + $0x50] sm:$0xff] %vm843_vm1, %v806_v36 }
 0x1f5   :  { %v1468_v1 = vadd.f32 %v1467_v22, %v1466_v61  ;;  %v1660_v29 = vadd.f32 %v1659_v56, %v1658_v57  ;;  %v1670_v13 = vsel %vm1667_vm6, %v1373_v53, 0.0  ;;  %3274 = vtanh.f32 %v3299_v9  ;;  %v3099_v50 = vpop.f32.mrf.mxu1 }
 0x1f6   :  { %v1565_v5 = vadd.f32 %v1564_v54, %v1563_v2  ;;  %2571 = vst.msk [vmem:[%s5386_s12 + $0x68] sm:$0xff] %vm843_vm1, %v3099_v50  ;;  %v3326_v2 = vmov 0.001  }
 0x1f7   :  { %v1469_v59 = vrot.slane %v1468_v1, 1  ;;  %v1661_v11 = vrot.slane %v1660_v29, 2  ;;  %v816_v24 = vpop.f32.mrf.mxu1  ;;  %v2506_v22 = vsel %vm1676_vm12, 1e-05, %v3326_v2 }
 0x1f8   :  { %v1566_v32 = vrot.slane %v1565_v5, 1  ;;  %2570 = vst.msk [vmem:[%s5386_s12 + $0x60] sm:$0xff] %vm843_vm1, %v816_v24  ;;  %v2507_v56 = vsel %vm1671_vm8, 0.001, %v2506_v22 }
 0x1f9   :  { %v1470_v10 = vadd.f32 %v1469_v59, %v1468_v1  ;;  %v1662_v62 = vadd.f32 %v1661_v11, %v1660_v29  ;;  %v3261_v4 = vpop.eup %3260  ;;  %v4752_v61 = vpop.f32.mrf.mxu1  ;;  %v2508_v54 = vsel %vm1667_vm6, 1e-05, %v2507_v56 }
 0x1fa   :  { %v1567_v31 = vadd.f32 %v1566_v32, %v1565_v5  ;;  %5610 = vst [vmem:[#allocation13_spill] sm:$0xff] %v4752_v61  ;;  %2573 = vst.msk [vmem:[%s5386_s12 + $0x78] sm:$0xff] %vm843_vm1, %v4752_v61  ;;  %v4777_v5 = vld [vmem:[%s5381_s7] ss:$0 sm:$0xff]  ;;  %s3327_s7 = smov 112  }
 0x1fb   :  { %v1663_v37 = vrot.slane %v1662_v62, 1  ;;  %v1674_v0 = vsel %vm1671_vm8, %v1470_v10, 0.0  ;;  %v826_v57 = vpop.f32.mrf.mxu1 }
 0x1fc   :  { %v1675_v46 = vadd.f32 %v1674_v0, %v1670_v13  ;;  %v1679_v40 = vsel %vm1676_vm12, %v1567_v31, 0.0  ;;  %v3263_v42 = vpop.eup %3262  ;;  %2572 = vst.msk [vmem:[%s5386_s12 + $0x70] sm:$0xff] %vm843_vm1, %v826_v57  ;;  %v4786_v0 = vld [vmem:[%s5384_s10] ss:$0 sm:$0xff]  ;;  %s3328_s10 = smov 96  }
 0x1fd   :  { %v1664_v6 = vadd.f32 %v1663_v37, %v1662_v62  ;;  %v3265_v27 = vpop.eup %3264 }
 0x1fe   :  { %v1680_v43 = vadd.f32 %v1679_v40, %v1675_v46  ;;  %v3267_v47 = vpop.eup %3266 }
 0x1ff   :  { %v1684_v52 = vsel %vm1681_vm13, %v1664_v6, 0.0  ;;  %v3269_v26 = vpop.eup %3268 }
 0x200   :  { %v1685_v39 = vadd.f32 %v1684_v52, %v1680_v43  ;;  %v3271_v44 = vpop.eup %3270  ;;  %v4788_v52 = vpop.permute.xlu0 %2131 }
 0x201   :  { %v3273_v45 = vpop.eup %3272 }
 0x202   :  { %3188 = vmatmul.mubr.f32.vlgmr.msra.gmra.mxu1 %v1685_v39  ;;  %v3275_v12 = vpop.eup %3274 }
 0x203   :  { %3191 = vmatpush3.msra.mxu1 %v5609_v18  ;;  %3222 = vmatprep.mubr.f32.mxu1 %v3261_v4 }
 0x204   :  { %3192 = vmatprep.subr.mxu1 %v1794_v33  ;;  %v4809_v19 = vpop.permute.xlu0 %2233 }
 0x205   :  { %3193 = vmatpush3.msra.mxu1 %v1794_v33 }
 0x206   :  { %3194 = vmatprep.subr.mxu1 %v1793_v7 }
 0x207   :  { %3195 = vmatpush3.msra.mxu1 %v1793_v7  ;;  %v4792_v7 = vpop.permute.xlu1 %2231 }
 0x208   :  { %3196 = vmatprep.subr.mxu1 %v1792_v25 }
 0x209   :  { %3197 = vmatpush3.msra.mxu1 %v1792_v25 }
 0x20a   :  { %3198 = vmatprep.subr.mxu1 %v1791_v58 }
 0x20b   :  { %3199 = vmatpush3.msra.mxu1 %v1791_v58 }
 0x20c   :  { %3200 = vmatprep.subr.mxu1 %v1790_v23 }
 0x20d   :  { %3201 = vmatpush3.msra.mxu1 %v1790_v23 }
 0x20e   :  { %3202 = vmatprep.subr.mxu1 %v1789_v55 }
 0x20f   :  { %3203 = vmatpush3.msra.mxu1 %v1789_v55 }
 0x210   :  { %3204 = vmatprep.subr.mxu1 %v1788_v14 }
 0x211   :  { %3205 = vmatpush3.msra.mxu1 %v1788_v14 }
 0x212   :  { %3206 = vmatprep.subr.mxu1 %v1787_v16 }
 0x213   :  { %3207 = vmatpush3.msra.mxu1 %v1787_v16 }
 0x214   :  { %3208 = vmatprep.subr.mxu1 %v1786_v28 }
 0x215   :  { %3209 = vmatpush3.msra.mxu1 %v1786_v28 }
 0x216   :  { %3210 = vmatprep.subr.mxu1 %v1785_v15 }
 0x217   :  { %3211 = vmatpush3.msra.mxu1 %v1785_v15 }
 0x218   :  { %3212 = vmatprep.subr.mxu1 %v1784_v20 }
 0x219   :  { %3213 = vmatpush3.msra.mxu1 %v1784_v20 }
 0x21a   :  { %3214 = vmatprep.subr.mxu1 %v1783_v30 }
 0x21b   :  { %3215 = vmatpush3.msra.mxu1 %v1783_v30 }
 0x21c   :  { %3216 = vmatprep.subr.mxu1 %v1782_v34 }
 0x21d   :  { %3217 = vmatpush3.msra.mxu1 %v1782_v34  ;;  %v4814_v34 = vpop.permute.xlu1 %2135 }
 0x21e   :  { %3218 = vmatprep.subr.mxu1 %v1781_v21 }
 0x21f   :  { %3219 = vmatpush3.msra.mxu1 %v1781_v21 }
 0x220   :  { %3220 = vmatprep.subr.mxu1 %v1780_v48 }
 0x221   :  { %3221 = vmatpush3.msra.mxu1 %v1780_v48 }
 0x222   :  { %3223 = vmatmul.mubr.f32.vlgmr.msra.gmra.mxu1 %v3263_v42 }
 0x223   :  { %3225 = vmatprep.mubr.f32.mxu1 %v3265_v27 }
 0x226   :  { %3226 = vmatmul.mubr.f32.gmra.mxu1 %v3267_v47 }
 0x227   :  { %3228 = vmatprep.mubr.f32.mxu1 %v3269_v26 }
 0x22a   :  { %3229 = vmatmul.mubr.f32.gmra.mxu1 %v3271_v44 }
 0x22b   :  { %3231 = vmatprep.mubr.f32.mxu1 %v3273_v45 }
 0x22e   :  { %3232 = vmatmul.mubr.f32.gmra.mxu1 %v3275_v12 }
 0x2c2   :  { %v1768_v60 = vpop.f32.mrf.mxu1 }
 0x2c3   :  { %v2509_v53 = vmul.f32 %v2508_v54, %v1768_v60  ;;  %2625 = vst.msk [vmem:[%s5387_s13] sm:$0xf] %vm2510_vm14, %v1768_v60  ;;  %v4844_v54 = vpop.permute.xlu0 %2129 }
 0x2c4   :  { %v3189_v1 = vpop.f32.mrf.mxu1 }
 0x2c5   :  { %v4772_v29 = vsel %vm2510_vm14, %v2509_v53, 0.0 }
 0x2c6   :  { %5611 = vst [vmem:[#allocation14_spill] sm:$0xff] %v4772_v29 }
 0x2e2   :  { %v3224_v59 = vpop.f32.mrf.mxu1 }
 0x2e3   :  { %v1875_v11 = vadd.f32 %v3224_v59, %v4777_v5 }
 0x2e4   :  { %v1869_v32 = vpop.f32.mrf.mxu1 }
 0x2e5   :  { %v1909_v10 = vsub.f32 0.6, %v1875_v11  ;;  %v2782_v62 = vadd.f32 -1.4, %v1875_v11  ;;  %v1949_v13 = vsub.f32 -0.45, %v1875_v11  ;;  %v4781_v37 = vadd.f32 %v4777_v5, %v1869_v32 }
 0x2e6   :  { %v2790_v31 = vadd.f32 -0.45, %v1875_v11  ;;  %v2798_v40 = vadd.f32 -0.16, %v1875_v11  ;;  %v3227_v43 = vpop.f32.mrf.mxu1  ;;  %v2302_v23 = vsub.f32 %v1875_v11, %v4786_v0  ;;  %v4850_v11 = vpop.permute.xlu1 %2133 }
 0x2e7   :  { %v1917_v46 = vmax.f32 %v1909_v10, 0.0  ;;  %v1933_v6 = vmax.f32 %v2782_v62, 0.0  ;;  %v1957_v39 = vmax.f32 %v1949_v13, 0.0  ;;  %v1908_v4 = vsub.f32 0.6, %v4781_v37 }
 0x2e8   :  { %v1973_v33 = vmax.f32 %v2790_v31, 0.0  ;;  %v2781_v18 = vadd.f32 -1.4, %v4781_v37  ;;  %v1948_v25 = vsub.f32 -0.45, %v4781_v37  ;;  %v1879_v16 = vpop.f32.mrf.mxu1  ;;  %v4804_v15 = vadd.f32 %v3227_v43, %v4777_v5 }
 0x2e9   :  { %v2789_v58 = vadd.f32 -0.45, %v4781_v37  ;;  %v4797_v55 = vadd.f32 %v1933_v6, %v1917_v46  ;;  %v4799_v14 = vand.u32 2147483647, %v2798_v40  ;;  %v1916_v28 = vmax.f32 %v1908_v4, 0.0 }
 0x2ea   :  { %v4801_v51 = vadd.f32 %v1973_v33, %v1957_v39  ;;  %v1932_v8 = vmax.f32 %v2781_v18, 0.0  ;;  %v1956_v63 = vmax.f32 %v1948_v25, 0.0  ;;  %v2797_v20 = vadd.f32 -0.16, %v4781_v37  ;;  %v3230_v56 = vpop.f32.mrf.mxu1 }
 0x2eb   :  { %5612 = vst [vmem:[#allocation15_spill] sm:$0xff] %v4797_v55  ;;  %v1972_v17 = vmax.f32 %v2789_v58, 0.0  ;;  %v4807_v30 = vmul.f32 %v2302_v23, %v2302_v23  ;;  %v4812_v35 = vadd.f32 %v4777_v5, %v1879_v16  ;;  %v5446_v21 = vand.u32 2147483647, %v4797_v55 }
 0x2ec   :  { %v2021_v49 = vmul.f32 0.5, %v4797_v55  ;;  %v2200_v38 = vmul.f32 0.5, %v4799_v14  ;;  %v4820_v48 = vadd.f32 -0.5, %v4799_v14  ;;  %v5448_v9 = vand.u32 2147483647, %v4801_v51  ;;  %v1889_v18 = vpop.f32.mrf.mxu1 }
 0x2ed   :  { %5613 = vst [vmem:[#allocation47_spill] sm:$0xff] %v4807_v30  ;;  %2327 = vrot.lane.b32.xlu1 %v4807_v30, %s3327_s7  ;;  %v2098_v42 = vmul.f32 0.5, %v4801_v51  ;;  %v4826_v27 = vadd.f32 %v1932_v8, %v1916_v28  ;;  %v1951_v47 = vsub.f32 -0.45, %v4804_v15  ;;  %v4829_v26 = vadd.f32 %v1972_v17, %v1956_v63 }
 0x2ee   :  { %v4831_v44 = vand.u32 2147483647, %v2797_v20  ;;  %v1911_v45 = vsub.f32 0.6, %v4804_v15  ;;  %v2792_v12 = vadd.f32 -0.45, %v4804_v15  ;;  %v4839_v24 = vmul.f32 %v2200_v38, %v4799_v14  ;;  %v4882_v20 = vpop.permute.xlu0 %2237 }
 0x2ef   :  { %5614 = vst [vmem:[#allocation44_spill] sm:$0xff] %v4826_v27  ;;  %v2784_v3 = vadd.f32 -1.4, %v4804_v15  ;;  %v2800_v36 = vadd.f32 -0.16, %v4804_v15  ;;  %v4847_v60 = vmul.f32 %v2021_v49, %v4797_v55  ;;  %v2020_v53 = vmul.f32 0.5, %v4826_v27 }
 0x2f0   :  { %v1950_v50 = vsub.f32 -0.45, %v4812_v35  ;;  %v1910_v57 = vsub.f32 0.6, %v4812_v35  ;;  %v2783_v2 = vadd.f32 -1.4, %v4812_v35  ;;  %v4857_v40 = vadd.f32 %v3230_v56, %v4777_v5 }
 0x2f1   :  { %v2791_v22 = vadd.f32 -0.45, %v4812_v35  ;;  %5615 = vst [vmem:[#allocation16_spill] sm:$0xff] %v4847_v60  ;;  %v1959_v1 = vmax.f32 %v1951_v47, 0.0  ;;  %v1975_v59 = vmax.f32 %v2792_v12, 0.0  ;;  %v2097_v31 = vmul.f32 0.5, %v4829_v26 }
 0x2f2   :  { %v5447_v32 = vand.u32 2147483647, %v4829_v26  ;;  %v1958_v10 = vmax.f32 %v1950_v50, 0.0  ;;  %v2799_v13 = vadd.f32 -0.16, %v4812_v35  ;;  %v2199_v46 = vmul.f32 0.5, %v4831_v44 }
 0x2f3   :  { %v1974_v62 = vmax.f32 %v2791_v22, 0.0  ;;  %v1919_v6 = vmax.f32 %v1911_v45, 0.0  ;;  %v1935_v43 = vmax.f32 %v2784_v3, 0.0  ;;  %v4859_v39 = vand.u32 2147483647, %v2800_v36  ;;  %v4897_v45 = vpop.permute.xlu1 %2139 }
 0x2f4   :  { %v1918_v33 = vmax.f32 %v1910_v57, 0.0  ;;  %v1934_v4 = vmax.f32 %v2783_v2, 0.0  ;;  %v4863_v25 = vadd.f32 -0.5, %v5446_v21  ;;  %v4866_v58 = vmul.f32 %v2098_v42, %v4801_v51  ;;  %5618 = vst [vmem:[#allocation48_spill] sm:$0xff] %v4897_v45  ;;  %v3233_v57 = vpop.f32.mrf.mxu1 }
 0x2f5   :  { %v4870_v23 = vadd.f32 -0.5, %v5448_v9  ;;  %v4872_v16 = vadd.f32 %v1975_v59, %v1959_v1  ;;  %v4876_v8 = vmul.f32 %v2020_v53, %v4826_v27  ;;  %v4878_v63 = vadd.f32 %v1974_v62, %v1958_v10 }
 0x2f6   :  { %5616 = vst [vmem:[#allocation17_spill] sm:$0xff] %v4863_v25  ;;  %v4880_v17 = vand.u32 2147483647, %v2799_v13  ;;  %v4885_v49 = vmul.f32 %v2097_v31, %v4829_v26  ;;  %v4889_v38 = vadd.f32 -0.5, %v5447_v32  ;;  %v4892_v42 = vmul.f32 %v2199_v46, %v4831_v44 }
 0x2f7   :  { %5617 = vst [vmem:[#allocation46_spill] sm:$0xff] %v4876_v8  ;;  %v4895_v47 = vadd.f32 -0.5, %v4831_v44  ;;  %v4899_v12 = vadd.f32 %v1935_v43, %v1919_v6  ;;  %v4902_v3 = vmul.f32 0.5, %v4859_v39  ;;  %v4904_v36 = vadd.f32 %v1934_v4, %v1918_v33 }
 0x2f8   :  { %v1913_v50 = vsub.f32 0.6, %v4857_v40  ;;  %v2100_v2 = vmul.f32 0.5, %v4872_v16  ;;  %v4909_v22 = vadd.f32 -1.4, %v4857_v40  ;;  %v2301_v56 = vsub.f32 %v4781_v37, %v4786_v0 }
 0x2f9   :  { %5619 = vst [vmem:[#allocation25_spill] sm:$0xff] %v4899_v12  ;;  %v1890_v53 = vadd.f32 %v4777_v5, %v1889_v18  ;;  %v5454_v1 = vand.u32 2147483647, %v4878_v63  ;;  %v2099_v59 = vmul.f32 0.5, %v4878_v63  ;;  %v2201_v10 = vmul.f32 0.5, %v4880_v17  ;;  %v4930_v18 = vpop.permute.xlu0 %2235 }
 0x2fa   :  { %5620 = vst [vmem:[#allocation20_spill] sm:$0xff] %v4909_v22  ;;  %v2304_v62 = vsub.f32 %v4804_v15, %v4786_v0  ;;  %v1953_v13 = vsub.f32 -0.45, %v4857_v40  ;;  %v2794_v31 = vadd.f32 -0.45, %v4857_v40  ;;  %v4921_v46 = vmul.f32 %v2301_v56, %v2301_v56 }
 0x2fb   :  { %v4924_v6 = vadd.f32 %v3233_v57, %v4777_v5  ;;  %v1952_v37 = vsub.f32 -0.45, %v1890_v53  ;;  %v2793_v43 = vadd.f32 -0.45, %v1890_v53  ;;  %v2303_v4 = vsub.f32 %v4812_v35, %v4786_v0  ;;  %v4943_v57 = vpop.permute.xlu1 %2137 }
 0x2fc   :  { %5621 = vst [vmem:[#allocation22_spill] sm:$0xff] %v4921_v46  ;;  %v4926_v33 = vmul.f32 %v2304_v62, %v2304_v62  ;;  %v4934_v28 = vmul.f32 %v2100_v2, %v4872_v16  ;;  %v4937_v56 = vadd.f32 -0.5, %v4880_v17  ;;  %v4939_v21 = vmax.f32 %v1913_v50, 0.0  ;;  %2325 = vrot.lane.b32.xlu0 %v4921_v46, %s3327_s7  ;;  %v1899_v50 = vpop.f32.mrf.mxu1 }
 0x2fd   :  { %v4946_v62 = vmul.f32 %v2099_v59, %v4878_v63  ;;  %v4950_v35 = vadd.f32 -0.5, %v5454_v1  ;;  %v4953_v2 = vmul.f32 %v2201_v10, %v4880_v17  ;;  %v2802_v15 = vadd.f32 -0.16, %v4857_v40 }
 0x2fe   :  { %5622 = vst [vmem:[#allocation26_spill] sm:$0xff] %v4926_v33  ;;  %5623 = vst [vmem:[#allocation21_spill] sm:$0xff] %v4939_v21  ;;  %2331 = vrot.lane.b32.xlu1 %v4926_v33, %s3327_s7  ;;  %v1961_v32 = vmax.f32 %v1953_v13, 0.0  ;;  %v1977_v9 = vmax.f32 %v2794_v31, 0.0  ;;  %v1912_v61 = vsub.f32 0.6, %v1890_v53  ;;  %v4959_v8 = vmul.f32 %v2303_v4, %v2303_v4 }
 0x2ff   :  { %v2801_v29 = vadd.f32 -0.16, %v1890_v53  ;;  %v1960_v46 = vmax.f32 %v1952_v37, 0.0  ;;  %v1976_v59 = vmax.f32 %v2793_v43, 0.0  ;;  %v2804_v30 = vadd.f32 -0.16, %v4924_v6  ;;  %v4982_v25 = vpop.permute.xlu1 %2143 }
 0x300   :  { %5624 = vst [vmem:[#allocation23_spill] sm:$0xff] %v4959_v8  ;;  %v1955_v1 = vsub.f32 -0.45, %v4924_v6  ;;  %v4963_v10 = vadd.f32 -0.45, %v4924_v6  ;;  %v4966_v60 = vadd.f32 %v4777_v5, %v1899_v50  ;;  %v2306_v13 = vsub.f32 %v4857_v40, %v4786_v0  ;;  %2329 = vrot.lane.b32.xlu0 %v4959_v8, %s3327_s7  ;;  %5625 = vst [vmem:[#allocation34_spill] sm:$0xff] %v4982_v25 }
 0x301   :  { %v2001_v31 = vand.u32 2147483647, %v2802_v15  ;;  %v4970_v33 = vadd.f32 -1.4, %v1890_v53  ;;  %v2305_v37 = vsub.f32 %v1890_v53, %v4786_v0  ;;  %v2308_v43 = vsub.f32 %v4924_v6, %v4786_v0  ;;  %v2242_v15 = vpop.permute.xlu0 %2241 }
 0x302   :  { %vm2192_vm7 = vcmp.lt.f32.partialorder %v4799_v14, 1.0  ;;  %vm2191_vm9 = vcmp.lt.f32.partialorder %v4831_v44, 1.0  ;;  %v4979_v5 = vadd.f32 %v1977_v9, %v1961_v32  ;;  %v2000_v4 = vand.u32 2147483647, %v2801_v29 }
 0x303   :  { %v2003_v50 = vand.u32 2147483647, %v2804_v30  ;;  %v1954_v40 = vsub.f32 -0.45, %v4966_v60  ;;  %v2795_v8 = vadd.f32 -0.45, %v4966_v60  ;;  %v4986_v27 = vmul.f32 %v2306_v13, %v2306_v13  ;;  %v5009_v29 = vpop.permute.xlu1 %2141 }
 0x304   :  { %v2803_v53 = vadd.f32 -0.16, %v4966_v60  ;;  %v4988_v55 = vmul.f32 %v2305_v37, %v2305_v37  ;;  %v4990_v21 = vmax.f32 %v1912_v61, 0.0  ;;  %v4992_v12 = vadd.f32 %v1976_v59, %v1960_v46 }
 0x305   :  { %5626 = vst [vmem:[#allocation28_spill] sm:$0xff] %v4986_v27  ;;  %v4994_v9 = vmax.f32 %v1955_v1, 0.0  ;;  %v1962_v30 = vmax.f32 %v1954_v40, 0.0  ;;  %2335 = vrot.lane.b32.xlu1 %v4986_v27, %s3327_s7  ;;  %v5001_v13 = vmul.f32 %v2308_v43, %v2308_v43  ;;  %v2307_v61 = vsub.f32 %v4966_v60, %v4786_v0  ;;  %v2240_v43 = vpop.permute.xlu0 %2239 }
 0x306   :  { %5627 = vst [vmem:[#allocation33_spill] sm:$0xff] %v4988_v55  ;;  %5628 = vst [vmem:[#allocation29_spill] sm:$0xff] %v4990_v21  ;;  %v2002_v32 = vand.u32 2147483647, %v2803_v53  ;;  %2333 = vrot.lane.b32.xlu0 %v4988_v55, %s3327_s7  ;;  %v1978_v46 = vmax.f32 %v2795_v8, 0.0  ;;  %vm2193_vm0 = vcmp.lt.f32.partialorder %v4880_v17, 1.0  ;;  %v2210_v0 = vmul.f32 %v4902_v3, %v4859_v39 }
 0x307   :  { %5629 = vst [vmem:[#allocation24_spill] sm:$0xff] %v5001_v13  ;;  %vm2194_vm2 = vcmp.lt.f32.partialorder %v4859_v39, 1.0  ;;  %vm2195_vm3 = vcmp.lt.f32.partialorder %v2000_v4, 1.0  ;;  %v5007_v1 = vmul.f32 %v2307_v61, %v2307_v61  ;;  %vm2196_vm11 = vcmp.lt.f32.partialorder %v2001_v31, 1.0 }
 0x308   :  { %vm2197_vm10 = vcmp.lt.f32.partialorder %v2002_v32, 1.0  ;;  %vm2198_vm4 = vcmp.lt.f32.partialorder %v2003_v50, 1.0  ;;  %v2203_v59 = vmul.f32 0.5, %v2000_v4  ;;  %v2204_v37 = vmul.f32 0.5, %v2001_v31 }
 0x309   :  { %v2205_v40 = vmul.f32 0.5, %v2002_v32  ;;  %v2206_v53 = vmul.f32 0.5, %v2003_v50  ;;  %2339 = vrot.lane.b32.xlu1 %v5001_v13, %s3327_s7  ;;  %v2824_v8 = vadd.f32 -0.5, %v4859_v39  ;;  %v2825_v61 = vadd.f32 -0.5, %v2000_v4 }
 0x30a   :  { %2337 = vrot.lane.b32.xlu0 %v5007_v1, %s3327_s7  ;;  %v2826_v55 = vadd.f32 -0.5, %v2001_v31  ;;  %v2211_v27 = vmul.f32 %v2203_v59, %v2000_v4  ;;  %v2212_v25 = vmul.f32 %v2204_v37, %v2001_v31  ;;  %v2827_v21 = vadd.f32 -0.5, %v2002_v32 }
 0x30b   :  { %v2213_v41 = vmul.f32 %v2205_v40, %v2002_v32  ;;  %v2214_v45 = vmul.f32 %v2206_v53, %v2003_v50  ;;  %v2828_v22 = vadd.f32 -0.5, %v2003_v50  ;;  %v2223_v13 = vsel %vm2191_vm9, %v4892_v42, %v4895_v47 }
 0x30c   :  { %v2224_v3 = vsel %vm2192_vm7, %v4839_v24, %v4820_v48  ;;  %v2225_v59 = vsel %vm2193_vm0, %v4953_v2, %v4937_v56  ;;  %v2226_v37 = vsel %vm2194_vm2, %v2210_v0, %v2824_v8  ;;  %v2227_v40 = vsel %vm2195_vm3, %v2211_v27, %v2825_v61  ;;  %v2246_v56 = vpop.permute.xlu1 %2245 }
 0x30d   :  { %v2228_v53 = vsel %vm2196_vm11, %v2212_v25, %v2826_v55  ;;  %v5630_v44 = vand.u32 2147483647, %v4801_v51  ;;  %v5633_v14 = vand.u32 2147483647, %v4829_v26  ;;  %v2229_v24 = vsel %vm2197_vm10, %v2213_v41, %v2827_v21  ;;  %v2244_v26 = vpop.permute.xlu0 %2243 }
 0x30e   :  { %v2230_v39 = vsel %vm2198_vm4, %v2214_v45, %v2828_v22  ;;  %v2255_v27 = vmul.f32 %v4792_v7, %v2223_v13  ;;  %v2256_v55 = vmul.f32 %v4809_v19, %v2224_v3  ;;  %v1936_v51 = vmax.f32 %v4970_v33, 0.0 }
 0x30f   :  { %vm5036_vm5 = vcmp.lt.f32.partialorder %v5630_v44, 1.0  ;;  %vm5042_vm14 = vcmp.lt.f32.partialorder %v5633_v14, 1.0  ;;  %v1986_v25 = vadd.f32 %v1978_v46, %v1962_v30  ;;  %v2257_v17 = vmul.f32 %v4930_v18, %v2225_v59  ;;  %v5655_v44 = vld [vmem:[#allocation18_spill] sm:$0xff] }
 0x310   :  { %v2258_v47 = vmul.f32 %v4882_v20, %v2226_v37  ;;  %v2259_v2 = vmul.f32 %v2240_v43, %v2227_v40  ;;  %v2260_v31 = vmul.f32 %v2242_v15, %v2228_v53  ;;  %v2264_v4 = vsel %vm2263_vm15, %v2255_v27, 0.0 }
 0x311   :  { %v2265_v41 = vsel %vm2263_vm15, %v2256_v55, 0.0  ;;  %v2261_v21 = vmul.f32 %v2244_v26, %v2229_v24  ;;  %v2262_v45 = vmul.f32 %v2246_v56, %v2230_v39  ;;  %v2267_v19 = vsel %vm2263_vm15, %v2257_v17, 0.0 }
 0x312   :  { %v2266_v7 = vadd.f32 %v2265_v41, %v2264_v4  ;;  %v2101_v22 = vmul.f32 0.5, %v4992_v12  ;;  %v1915_v50 = vsub.f32 0.6, %v4924_v6  ;;  %v5059_v18 = vadd.f32 -1.4, %v4924_v6 }
 0x313   :  { %v5636_v20 = vmax.f32 %v4963_v10, 0.0  ;;  %v1914_v30 = vsub.f32 0.6, %v4966_v60  ;;  %v2269_v13 = vsel %vm2263_vm15, %v2258_v47, 0.0  ;;  %v2085_v46 = vand.u32 2147483647, %v4992_v12 }
 0x314   :  { %v2268_v32 = vadd.f32 %v2267_v19, %v2266_v7  ;;  %vm2161_vm7 = vcmask 261248   ;;  %v2271_v43 = vsel %vm2263_vm15, %v2259_v2, 0.0  ;;  %v2273_v0 = vsel %vm2263_vm15, %v2260_v31, 0.0 }
 0x315   :  { %v1987_v15 = vadd.f32 %v5636_v20, %v4994_v9  ;;  %v2086_v8 = vand.u32 2147483647, %v4979_v5  ;;  %v2102_v6 = vmul.f32 0.5, %v4979_v5  ;;  %v2275_v10 = vsel %vm2263_vm15, %v2261_v21, 0.0 }
 0x316   :  { %v2270_v61 = vadd.f32 %v2269_v13, %v2268_v32  ;;  %v2277_v9 = vsel %vm2263_vm15, %v2262_v45, 0.0  ;;  %v2087_v3 = vand.u32 2147483647, %v1986_v25  ;;  %v5637_v37 = vand.u32 2147483647, %v4878_v63 }
 0x317   :  { %v2088_v59 = vand.u32 2147483647, %v1987_v15  ;;  %v5640_v53 = vand.u32 2147483647, %v4872_v16  ;;  %v2103_v14 = vmul.f32 0.5, %v1986_v25  ;;  %v2109_v39 = vmul.f32 %v2101_v22, %v4992_v12 }
 0x318   :  { %vm5075_vm9 = vcmp.lt.f32.partialorder %v5637_v37, 1.0  ;;  %v2272_v24 = vadd.f32 %v2271_v43, %v2270_v61  ;;  %v2817_v17 = vadd.f32 -0.5, %v2085_v46  ;;  %vm5088_vm15 = vcmp.lt.f32.partialorder %v2085_v46, 1.0  ;;  %v5652_v46 = vld [vmem:[#allocation20_spill] sm:$0xff] }
 0x319   :  { %vm5081_vm0 = vcmp.lt.f32.partialorder %v5640_v53, 1.0  ;;  %v5643_v27 = vmov %v5640_v53  ;;  %v2104_v47 = vmul.f32 0.5, %v1987_v15  ;;  %v2110_v26 = vmul.f32 %v2102_v6, %v4979_v5  ;;  %v5654_v61 = vld [vmem:[#allocation48_spill] sm:$0xff] }
 0x31a   :  { %v2816_v55 = vadd.f32 -0.5, %v5643_v27  ;;  %v2818_v56 = vadd.f32 -0.5, %v2086_v8  ;;  %v2274_v2 = vadd.f32 %v2273_v0, %v2272_v24  ;;  %v2121_v31 = vsel %vm5042_vm14, %v4885_v49, %v4889_v38  ;;  %v5653_v0 = vld [vmem:[#allocation29_spill] sm:$0xff] }
 0x31b   :  { %v2122_v16 = vsel %vm5036_vm5, %v4866_v58, %v4870_v23  ;;  %v2123_v12 = vsel %vm5075_vm9, %v4946_v62, %v4950_v35  ;;  %vm5105_vm2 = vcmp.lt.f32.partialorder %v2086_v8, 1.0  ;;  %v2111_v5 = vmul.f32 %v2103_v14, %v1986_v25  ;;  %v5656_v14 = vld [vmem:[#allocation25_spill] sm:$0xff] }
 0x31c   :  { %v2819_v41 = vadd.f32 -0.5, %v2087_v3  ;;  %v2124_v49 = vsel %vm5081_vm0, %v4934_v28, %v2816_v55  ;;  %v2276_v38 = vadd.f32 %v2275_v10, %v2274_v2  ;;  %v2125_v42 = vsel %vm5088_vm15, %v2109_v39, %v2817_v17  ;;  %v5657_v27 = vld [vmem:[#allocation21_spill] sm:$0xff]  ;;  %v5658_v55 = vld [vmem:[#allocation34_spill] sm:$0xff] }
 0x31d   :  { %v2153_v58 = vmul.f32 %v4844_v54, %v2121_v31  ;;  %v2154_v23 = vmul.f32 %v4788_v52, %v2122_v16  ;;  %vm5116_vm3 = vcmp.lt.f32.partialorder %v2087_v3, 1.0  ;;  %vm5120_vm11 = vcmp.lt.f32.partialorder %v2088_v59, 1.0 }
 0x31e   :  { %v2112_v48 = vmul.f32 %v2104_v47, %v1987_v15  ;;  %v2155_v25 = vmul.f32 %v4850_v11, %v2123_v12  ;;  %v2278_v28 = vadd.f32 %v2277_v9, %v2276_v38  ;;  %v2820_v21 = vadd.f32 -0.5, %v2088_v59 }
 0x31f   :  { %v2126_v45 = vsel %vm5105_vm2, %v2110_v26, %v2818_v56  ;;  %v2162_v54 = vsel %vm2161_vm7, %v2153_v58, 0.0  ;;  %v2156_v52 = vmul.f32 %v4814_v34, %v2124_v49  ;;  %v2157_v7 = vmul.f32 %v4943_v57, %v2125_v42  ;;  %v5659_v49 = vld [vmem:[#allocation15_spill] sm:$0xff] }
 0x320   :  { %v2163_v19 = vsel %vm2161_vm7, %v2154_v23, 0.0  ;;  %v2165_v22 = vsel %vm2161_vm7, %v2155_v25, 0.0  ;;  %v2787_v20 = vadd.f32 -1.4, %v4966_v60  ;;  %v2279_v15 = vrot.slane %v2278_v28, 4 }
 0x321   :  { %v2127_v11 = vsel %vm5116_vm3, %v2111_v5, %v2819_v41  ;;  %v2164_v32 = vadd.f32 %v2163_v19, %v2162_v54  ;;  %v2022_v13 = vmul.f32 0.5, %v4904_v36  ;;  %v1937_v43 = vmax.f32 %v5652_v46, 0.0 }
 0x322   :  { %v1944_v34 = vadd.f32 %v1936_v51, %v5653_v0  ;;  %v1923_v57 = vmax.f32 %v1915_v50, 0.0  ;;  %v2280_v8 = vadd.f32 %v2279_v15, %v2278_v28  ;;  %v2128_v6 = vsel %vm5120_vm11, %v2112_v48, %v2820_v21 }
 0x323   :  { %v2158_v10 = vmul.f32 %v5654_v61, %v2126_v45  ;;  %v2166_v9 = vadd.f32 %v2165_v22, %v2164_v32  ;;  %v1939_v3 = vmax.f32 %v5059_v18, 0.0  ;;  %v2159_v59 = vmul.f32 %v5009_v29, %v2127_v11  ;;  %v5665_v45 = vld [vmem:[#allocation44_spill] sm:$0xff]  ;;  %v5671_v11 = vld [vmem:[#allocation17_spill] sm:$0xff] }
 0x324   :  { %v2167_v37 = vsel %vm2161_vm7, %v2156_v52, 0.0  ;;  %v2169_v40 = vsel %vm2161_vm7, %v2157_v7, 0.0  ;;  %v1922_v33 = vmax.f32 %v1914_v30, 0.0  ;;  %v1938_v51 = vmax.f32 %v2787_v20, 0.0  ;;  %v5672_v32 = vld [vmem:[#allocation16_spill] sm:$0xff] }
 0x325   :  { %v2281_v50 = vrot.slane %v2280_v8, 2  ;;  %v2168_v53 = vadd.f32 %v2167_v37, %v2166_v9  ;;  %vm2616_vm10 = vcmp.eq.s32.totalorder %v5655_v44, 7  ;;  %v2023_v24 = vmul.f32 0.5, %v5656_v14  ;;  %v5676_v37 = vld [vmem:[#allocation8_spill] sm:$0xff] }
 0x326   :  { %v2006_v39 = vand.u32 2147483647, %v4904_v36  ;;  %v1945_v18 = vadd.f32 %v1937_v43, %v5657_v27  ;;  %v2160_v29 = vmul.f32 %v5658_v55, %v2128_v6  ;;  %v2030_v17 = vmul.f32 %v2022_v13, %v4904_v36 }
 0x327   :  { %v2282_v63 = vadd.f32 %v2281_v50, %v2280_v8  ;;  %v2170_v47 = vadd.f32 %v2169_v40, %v2168_v53  ;;  %v2171_v60 = vsel %vm2161_vm7, %v2158_v10, 0.0  ;;  %v2173_v30 = vsel %vm2161_vm7, %v2159_v59, 0.0 }
 0x328   :  { %v2007_v26 = vand.u32 2147483647, %v5656_v14  ;;  %v2008_v56 = vand.u32 2147483647, %v1944_v34  ;;  %v2024_v2 = vmul.f32 0.5, %v1944_v34  ;;  %v1947_v31 = vadd.f32 %v1939_v3, %v1923_v57  ;;  %v5675_v3 = vld [vmem:[#allocation5_spill] sm:$0xff] }
 0x329   :  { %v1946_v16 = vadd.f32 %v1938_v51, %v1922_v33  ;;  %v2283_v12 = vrot.slane %v2282_v63, 1  ;;  %v2172_v4 = vadd.f32 %v2171_v60, %v2170_v47  ;;  %v2175_v5 = vsel %vm2161_vm7, %v2160_v29, 0.0  ;;  %v5683_v47 = vld [vmem:[#allocation10_spill] sm:$0xff] }
 0x32a   :  { %v2009_v41 = vand.u32 2147483647, %v1945_v18  ;;  %v5660_v38 = vand.u32 2147483647, %v5659_v49  ;;  %v2807_v42 = vadd.f32 -0.5, %v2006_v39  ;;  %vm5165_vm5 = vcmp.lt.f32.partialorder %v2006_v39, 1.0 }
 0x32b   :  { %v2284_v58 = vadd.f32 %v2283_v12, %v2282_v63  ;;  %v2174_v23 = vadd.f32 %v2173_v30, %v2172_v4  ;;  %v2025_v35 = vmul.f32 0.5, %v1945_v18  ;;  %v2031_v48 = vmul.f32 %v2023_v24, %v5656_v14  ;;  %v5678_v14 = vld [vmem:[#allocation46_spill] sm:$0xff]  ;;  %v5684_v49 = vld [vmem:[#allocation9_spill] sm:$0xff] }
 0x32c   :  { %vm5161_vm4 = vcmp.lt.f32.partialorder %v5660_v38, 1.0  ;;  %v2032_v25 = vmul.f32 %v2024_v2, %v1944_v34  ;;  %v2808_v28 = vadd.f32 -0.5, %v2007_v26  ;;  %v2809_v21 = vadd.f32 -0.5, %v2008_v56 }
 0x32d   :  { %v5666_v54 = vand.u32 2147483647, %v5665_v45  ;;  %2291 = vrot.lane.b32.xlu1 %v2284_v58, %s3328_s10  ;;  %v2176_v7 = vadd.f32 %v2175_v5, %v2174_v23  ;;  %vm5172_vm14 = vcmp.lt.f32.partialorder %v2007_v26, 1.0  ;;  %vm5176_vm7 = vcmp.lt.f32.partialorder %v2008_v56, 1.0 }
 0x32e   :  { %v2010_v20 = vand.u32 2147483647, %v1946_v16  ;;  %v2026_v15 = vmul.f32 0.5, %v1946_v16  ;;  %v2045_v13 = vsel %vm5161_vm4, %v5672_v32, %v5671_v11  ;;  %v2046_v46 = vsel %vm5165_vm5, %v2030_v17, %v2807_v42  ;;  %v5682_v17 = vld [vmem:[#allocation7_spill] sm:$0xff] }
 0x32f   :  { %v2805_v52 = vadd.f32 -0.5, %v5666_v54  ;;  %v2177_v43 = vrot.slane %v2176_v7, 4  ;;  %v2011_v0 = vand.u32 2147483647, %v1947_v31  ;;  %vm5186_vm9 = vcmp.lt.f32.partialorder %v2009_v41, 1.0 }
 0x330   :  { %v2033_v57 = vmul.f32 %v2025_v35, %v1945_v18  ;;  %v2619_v8 = vsel %vm2616_vm10, %v2284_v58, 0.0  ;;  %v2810_v6 = vadd.f32 -0.5, %v2009_v41  ;;  %v2047_v61 = vsel %vm5172_vm14, %v2031_v48, %v2808_v28  ;;  %v5681_v18 = vld [vmem:[#allocation6_spill] sm:$0xff]  ;;  %v5685_v58 = vld [vmem:[#allocation12_spill] sm:$0xff]  ;;  %v5686_v28 = vld [vmem:[#allocation11_spill] sm:$0xff] }
 0x331   :  { %v2048_v10 = vsel %vm5176_vm7, %v2032_v25, %v2809_v21  ;;  %v2178_v9 = vadd.f32 %v2177_v43, %v2176_v7  ;;  %2621 = vrot.lane.b32.xlu1 %v2619_v8, %s3328_s10  ;;  %v2053_v59 = vmul.f32 %v2045_v13, %v5675_v3  ;;  %v2054_v40 = vmul.f32 %v2046_v46, %v5676_v37 }
 0x332   :  { %v5677_v33 = vmov %v5666_v54  ;;  %v2027_v51 = vmul.f32 0.5, %v1947_v31  ;;  %v2034_v50 = vmul.f32 %v2026_v15, %v1946_v16  ;;  %v2811_v53 = vadd.f32 -0.5, %v2010_v20 }
 0x333   :  { %vm2012_vm0 = vcmp.lt.f32.partialorder %v5677_v33, 1.0  ;;  %v2179_v39 = vrot.slane %v2178_v9, 2  ;;  %vm5201_vm15 = vcmp.lt.f32.partialorder %v2010_v20, 1.0  ;;  %v2049_v29 = vsel %vm5186_vm9, %v2033_v57, %v2810_v6 }
 0x334   :  { %v2044_v24 = vsel %vm2012_vm0, %v5678_v14, %v2805_v52  ;;  %v2055_v63 = vmul.f32 %v2047_v61, %v5682_v17  ;;  %v2056_v60 = vmul.f32 %v2048_v10, %v5683_v47  ;;  %v2061_v26 = vsel %vm843_vm1, %v2053_v59, 0.0 }
 0x335   :  { %v2052_v55 = vmul.f32 %v2044_v24, %v5681_v18  ;;  %v2180_v30 = vadd.f32 %v2179_v39, %v2178_v9  ;;  %v2063_v56 = vsel %vm843_vm1, %v2054_v40, 0.0  ;;  %v2035_v16 = vmul.f32 %v2027_v51, %v1947_v31 }
 0x336   :  { %v2812_v12 = vadd.f32 -0.5, %v2011_v0  ;;  %v2050_v4 = vsel %vm5201_vm15, %v2034_v50, %v2811_v53  ;;  %vm2019_vm2 = vcmp.lt.f32.partialorder %v2011_v0, 1.0  ;;  %v2057_v38 = vmul.f32 %v2049_v29, %v5684_v49 }
 0x337   :  { %v2060_v2 = vsel %vm843_vm1, %v2052_v55, 0.0  ;;  %v2181_v41 = vrot.slane %v2180_v30, 1  ;;  %v2058_v23 = vmul.f32 %v2050_v4, %v5685_v58  ;;  %v2065_v62 = vsel %vm843_vm1, %v2055_v63, 0.0 }
 0x338   :  { %v2062_v5 = vadd.f32 %v2061_v26, %v2060_v2  ;;  %v2067_v35 = vsel %vm843_vm1, %v2056_v60, 0.0  ;;  %v2051_v48 = vsel %vm2019_vm2, %v2035_v16, %v2812_v12  ;;  %vm2607_vm3 = vcmp.eq.s32.totalorder %v5655_v44, 6 }
 0x339   :  { %v2182_v42 = vadd.f32 %v2181_v41, %v2180_v30  ;;  %v2059_v21 = vmul.f32 %v2051_v48, %v5686_v28  ;;  %v2069_v45 = vsel %vm843_vm1, %v2057_v38, 0.0  ;;  %v2071_v54 = vsel %vm843_vm1, %v2058_v23, 0.0 }
 0x33a   :  { %v2064_v36 = vadd.f32 %v2063_v56, %v2062_v5 }
 0x33b   :  { %2286 = vrot.lane.b32.xlu0 %v2182_v42, %s3327_s7  ;;  %v2610_v52 = vsel %vm2607_vm3, %v2182_v42, 0.0  ;;  %v2073_v22 = vsel %vm843_vm1, %v2059_v21, 0.0 }
 0x33c   :  { %v2066_v25 = vadd.f32 %v2065_v62, %v2064_v36 }
 0x33e   :  { %v2068_v31 = vadd.f32 %v2067_v35, %v2066_v25 }
 0x33f   :  { %2612 = vrot.lane.b32.xlu0 %v2610_v52, %s3327_s7 }
 0x340   :  { %v2070_v7 = vadd.f32 %v2069_v45, %v2068_v31 }
 0x342   :  { %v2072_v19 = vadd.f32 %v2071_v54, %v2070_v7 }
 0x344   :  { %v5226_v20 = vadd.f32 %v2073_v22, %v2072_v19 }
 0x345   :  { %3311 = shalt.err (!%p3308_p4)
}
 0x346   :  { %s3330_s28 = smov 128   ;;  %s3331_s29 = smov 8   ;;  %v5687_v11 = vld [vmem:[#allocation47_spill] sm:$0xff]  ;;  %v5688_v34 = vld [vmem:[#allocation22_spill] sm:$0xff]  ;;  %v5691_v24 = vld [vmem:[#allocation28_spill] sm:$0xff]  ;;  %v2075_v36 = vrot.slane %v5226_v20, 4 }
 0x347   :  { %2638 = dma.vmem_to_hbm [thread:$0]  %s2633_s27, 4096, %s5385_s11, [#allocation3], %s3330_s28, %s3330_s28, %s3331_s29   ;;  %v5689_v61 = vld [vmem:[#allocation26_spill] sm:$0xff]  ;;  %v5690_v33 = vld [vmem:[#allocation23_spill] sm:$0xff]  ;;  %v5692_v29 = vld [vmem:[#allocation33_spill] sm:$0xff] }
 0x348   :  { %v5693_v26 = vld [vmem:[#allocation24_spill] sm:$0xff] }
 0x35f   :  { %v2328_v15 = vpop.permute.xlu1 %2327 }
 0x360   :  { %v2350_v32 = vadd.f32 %v2328_v15, %v5687_v11 }
 0x362   :  { %3276 = vrsqrt.f32 %v2350_v32  ;;  %vm2366_vm11 = vcmp.eq.f32.partialorder %v2350_v32, inf  ;;  %v2369_v0 = vand.u32 2147483648, %v2350_v32  ;;  %vm2368_vm10 = vcmp.eq.f32.partialorder %v2350_v32, 0.0 }
 0x36e   :  { %v2326_v43 = vpop.permute.xlu0 %2325 }
 0x36f   :  { %v3277_v13 = vpop.eup %3276  ;;  %v2349_v57 = vadd.f32 %v2326_v43, %v5688_v34 }
 0x370   :  { %v2365_v46 = vmul.f32 %v3277_v13, %v2350_v32  ;;  %v2332_v8 = vpop.permute.xlu1 %2331 }
 0x371   :  { %v2352_v10 = vadd.f32 %v2332_v8, %v5689_v61  ;;  %3278 = vrsqrt.f32 %v2349_v57  ;;  %vm2359_vm5 = vcmp.eq.f32.partialorder %v2349_v57, inf  ;;  %vm2361_vm14 = vcmp.eq.f32.partialorder %v2349_v57, 0.0 }
 0x372   :  { %v2367_v6 = vsel %vm2366_vm11, %v2350_v32, %v2365_v46  ;;  %v2330_v40 = vpop.permute.xlu0 %2329  ;;  %v2362_v42 = vand.u32 2147483648, %v2349_v57 }
 0x373   :  { %v2370_v9 = vsel %vm2368_vm10, %v2369_v0, %v2367_v6  ;;  %3280 = vrsqrt.f32 %v2352_v10  ;;  %v2351_v51 = vadd.f32 %v2330_v40, %v5690_v33  ;;  %vm2380_vm7 = vcmp.eq.f32.partialorder %v2352_v10, inf }
 0x374   :  { %v2414_v59 = vsub.f32 0.1, %v2370_v9  ;;  %vm2382_vm9 = vcmp.eq.f32.partialorder %v2352_v10, 0.0  ;;  %v2383_v35 = vand.u32 2147483648, %v2352_v10 }
 0x375   :  { %3282 = vrsqrt.f32 %v2351_v51  ;;  %vm2373_vm0 = vcmp.eq.f32.partialorder %v2351_v51, inf  ;;  %vm2375_vm15 = vcmp.eq.f32.partialorder %v2351_v51, 0.0  ;;  %v2376_v54 = vand.u32 2147483648, %v2351_v51 }
 0x376   :  { %v2422_v50 = vmax.f32 %v2414_v59, 0.0 }
 0x377   :  { %v2336_v53 = vpop.permute.xlu1 %2335 }
 0x378   :  { %v2334_v14 = vpop.permute.xlu0 %2333  ;;  %v5236_v39 = vadd.f32 %v2336_v53, %v5691_v24  ;;  %v2430_v27 = vand.u32 2147483647, %v2422_v50  ;;  %v2446_v55 = vmul.f32 0.5, %v2422_v50 }
 0x379   :  { %v5239_v63 = vadd.f32 %v2334_v14, %v5692_v29 }
 0x37a   :  { %3284 = vrsqrt.f32 %v5236_v39  ;;  %v2454_v16 = vmul.f32 %v2446_v55, %v2422_v50  ;;  %v2831_v12 = vadd.f32 -0.5, %v2430_v27  ;;  %vm5249_vm4 = vcmp.lt.f32.partialorder %v2430_v27, 1.0 }
 0x37b   :  { %3286 = vrsqrt.f32 %v5239_v63  ;;  %v2340_v60 = vpop.permute.xlu1 %2339  ;;  %vm2394_vm2 = vcmp.eq.f32.partialorder %v5236_v39, inf  ;;  %vm2396_vm3 = vcmp.eq.f32.partialorder %v5236_v39, 0.0  ;;  %v2397_v15 = vand.u32 2147483648, %v5236_v39 }
 0x37c   :  { %v2338_v30 = vpop.permute.xlu0 %2337  ;;  %v5244_v56 = vadd.f32 %v2340_v60, %v5693_v26  ;;  %v2470_v23 = vsel %vm5249_vm4, %v2454_v16, %v2831_v12  ;;  %vm2387_vm11 = vcmp.eq.f32.partialorder %v5239_v63, inf  ;;  %vm2389_vm10 = vcmp.eq.f32.partialorder %v5239_v63, 0.0 }
 0x37d   :  { %v5247_v2 = vadd.f32 %v2338_v30, %v5007_v1  ;;  %v2478_v52 = vmul.f32 %v2470_v23, %v5675_v3  ;;  %v2390_v13 = vand.u32 2147483648, %v5239_v63 }
 0x37e   :  { %v3279_v4 = vpop.eup %3278  ;;  %3288 = vrsqrt.f32 %v5244_v56  ;;  %vm2408_vm4 = vcmp.eq.f32.partialorder %v5244_v56, inf  ;;  %v2411_v34 = vand.u32 2147483648, %v5244_v56 }
 0x37f   :  { %v2358_v38 = vmul.f32 %v3279_v4, %v2349_v57  ;;  %3290 = vrsqrt.f32 %v5247_v2  ;;  %v2404_v50 = vand.u32 2147483648, %v5247_v2 }
 0x380   :  { %v3281_v41 = vpop.eup %3280 }
 0x381   :  { %v2379_v1 = vmul.f32 %v3281_v41, %v2352_v10  ;;  %v2360_v62 = vsel %vm2359_vm5, %v2349_v57, %v2358_v38  ;;  %vm2410_vm5 = vcmp.eq.f32.partialorder %v5244_v56, 0.0 }
 0x382   :  { %v2363_v48 = vsel %vm2361_vm14, %v2362_v42, %v2360_v62  ;;  %v3283_v31 = vpop.eup %3282 }
 0x383   :  { %v2381_v25 = vsel %vm2380_vm7, %v2352_v10, %v2379_v1  ;;  %v2413_v21 = vsub.f32 0.1, %v2363_v48  ;;  %v2372_v19 = vmul.f32 %v3283_v31, %v2351_v51  ;;  %vm2401_vm7 = vcmp.eq.f32.partialorder %v5247_v2, inf }
 0x384   :  { %v2384_v45 = vsel %vm2382_vm9, %v2383_v35, %v2381_v25  ;;  %vm2403_vm9 = vcmp.eq.f32.partialorder %v5247_v2, 0.0 }
 0x385   :  { %v2416_v7 = vsub.f32 0.1, %v2384_v45  ;;  %v2421_v22 = vmax.f32 %v2413_v21, 0.0  ;;  %v2374_v32 = vsel %vm2373_vm0, %v2351_v51, %v2372_v19 }
 0x386   :  { %v2377_v0 = vsel %vm2375_vm15, %v2376_v54, %v2374_v32 }
 0x387   :  { %v2424_v11 = vmax.f32 %v2416_v7, 0.0  ;;  %v3285_v46 = vpop.eup %3284  ;;  %v2429_v3 = vand.u32 2147483647, %v2421_v22  ;;  %v2445_v43 = vmul.f32 0.5, %v2421_v22  ;;  %v2415_v61 = vsub.f32 0.1, %v2377_v0 }
 0x388   :  { %v3287_v57 = vpop.eup %3286  ;;  %v2393_v10 = vmul.f32 %v3285_v46, %v5236_v39  ;;  %v2486_v7 = vsel %vm843_vm1, %v2478_v52, 0.0 }
 0x389   :  { %v2432_v8 = vand.u32 2147483647, %v2424_v11  ;;  %v2448_v6 = vmul.f32 0.5, %v2424_v11  ;;  %vm5271_vm14 = vcmp.lt.f32.partialorder %v2429_v3, 1.0  ;;  %v2453_v59 = vmul.f32 %v2445_v43, %v2421_v22 }
 0x38a   :  { %v2830_v40 = vadd.f32 -0.5, %v2429_v3  ;;  %v2386_v33 = vmul.f32 %v3287_v57, %v5239_v63  ;;  %v2423_v51 = vmax.f32 %v2415_v61, 0.0  ;;  %v2395_v27 = vsel %vm2394_vm2, %v5236_v39, %v2393_v10 }
 0x38b   :  { %v3289_v53 = vpop.eup %3288  ;;  %vm5279_vm0 = vcmp.lt.f32.partialorder %v2432_v8, 1.0  ;;  %v2456_v24 = vmul.f32 %v2448_v6, %v2424_v11  ;;  %v2833_v30 = vadd.f32 -0.5, %v2432_v8  ;;  %v2398_v12 = vsel %vm2396_vm3, %v2397_v15, %v2395_v27 }
 0x38c   :  { %v2388_v55 = vsel %vm2387_vm11, %v5239_v63, %v2386_v33  ;;  %v3291_v29 = vpop.eup %3290  ;;  %v2469_v60 = vsel %vm5271_vm14, %v2453_v59, %v2830_v40  ;;  %v2431_v26 = vand.u32 2147483647, %v2423_v51  ;;  %v2447_v16 = vmul.f32 0.5, %v2423_v51 }
 0x38d   :  { %v2391_v4 = vsel %vm2389_vm10, %v2390_v13, %v2388_v55  ;;  %v2407_v5 = vmul.f32 %v3289_v53, %v5244_v56  ;;  %v2400_v41 = vmul.f32 %v3291_v29, %v5247_v2  ;;  %v2418_v23 = vsub.f32 0.1, %v2398_v12  ;;  %v5708_v55 = vld [vmem:[#allocation14_spill] sm:$0xff] }
 0x38e   :  { %vm5297_vm15 = vcmp.lt.f32.partialorder %v2431_v26, 1.0  ;;  %v2455_v42 = vmul.f32 %v2447_v16, %v2423_v51  ;;  %v2832_v1 = vadd.f32 -0.5, %v2431_v26  ;;  %v2477_v62 = vmul.f32 %v2469_v60, %v5681_v18 }
 0x38f   :  { %v2417_v35 = vsub.f32 0.1, %v2391_v4  ;;  %v2409_v39 = vsel %vm2408_vm4, %v5244_v56, %v2407_v5  ;;  %v2402_v63 = vsel %vm2401_vm7, %v5247_v2, %v2400_v41  ;;  %v2426_v25 = vmax.f32 %v2418_v23, 0.0 }
 0x390   :  { %v2471_v48 = vsel %vm5297_vm15, %v2455_v42, %v2832_v1  ;;  %v2412_v31 = vsel %vm2410_vm5, %v2411_v34, %v2409_v39  ;;  %v2405_v21 = vsel %vm2403_vm9, %v2404_v50, %v2402_v63  ;;  %v2472_v19 = vsel %vm5279_vm0, %v2456_v24, %v2833_v30 }
 0x391   :  { %v2425_v18 = vmax.f32 %v2417_v35, 0.0  ;;  %v2420_v45 = vsub.f32 0.1, %v2412_v31  ;;  %v2419_v54 = vsub.f32 0.1, %v2405_v21  ;;  %v2479_v22 = vmul.f32 %v2471_v48, %v5676_v37  ;;  %v5709_v21 = vld [vmem:[#allocation13_spill] sm:$0xff] }
 0x392   :  { %v2434_v15 = vand.u32 2147483647, %v2426_v25  ;;  %v2450_v11 = vmul.f32 0.5, %v2426_v25  ;;  %v2485_v0 = vsel %vm843_vm1, %v2477_v62, 0.0  ;;  %v2480_v10 = vmul.f32 %v2472_v19, %v5682_v17 }
 0x393   :  { %v2433_v32 = vand.u32 2147483647, %v2425_v18  ;;  %v2449_v13 = vmul.f32 0.5, %v2425_v18  ;;  %v2428_v46 = vmax.f32 %v2420_v45, 0.0  ;;  %v2427_v56 = vmax.f32 %v2419_v54, 0.0 }
 0x394   :  { %vm5318_vm2 = vcmp.lt.f32.partialorder %v2434_v15, 1.0  ;;  %v2458_v2 = vmul.f32 %v2450_v11, %v2426_v25  ;;  %v2835_v43 = vadd.f32 -0.5, %v2434_v15  ;;  %v2487_v33 = vadd.f32 %v2486_v7, %v2485_v0 }
 0x395   :  { %vm5323_vm3 = vcmp.lt.f32.partialorder %v2433_v32, 1.0  ;;  %v2457_v34 = vmul.f32 %v2449_v13, %v2425_v18  ;;  %v2834_v37 = vadd.f32 -0.5, %v2433_v32  ;;  %v2436_v57 = vand.u32 2147483647, %v2428_v46 }
 0x396   :  { %v2452_v8 = vmul.f32 0.5, %v2428_v46  ;;  %v2435_v6 = vand.u32 2147483647, %v2427_v56  ;;  %v2451_v61 = vmul.f32 0.5, %v2427_v56  ;;  %v2474_v40 = vsel %vm5318_vm2, %v2458_v2, %v2835_v43 }
 0x397   :  { %v2837_v9 = vadd.f32 -0.5, %v2436_v57  ;;  %v2473_v59 = vsel %vm5323_vm3, %v2457_v34, %v2834_v37  ;;  %vm5332_vm10 = vcmp.lt.f32.partialorder %v2436_v57, 1.0  ;;  %v2488_v17 = vsel %vm843_vm1, %v2479_v22, 0.0 }
 0x398   :  { %v2460_v51 = vmul.f32 %v2452_v8, %v2428_v46  ;;  %v2459_v50 = vmul.f32 %v2451_v61, %v2427_v56  ;;  %v2836_v53 = vadd.f32 -0.5, %v2435_v6  ;;  %vm2443_vm11 = vcmp.lt.f32.partialorder %v2435_v6, 1.0  ;;  %v5710_v61 = vld [vmem:[#allocation19_spill] sm:$0xff] }
 0x399   :  { %v2481_v24 = vmul.f32 %v2473_v59, %v5683_v47  ;;  %v2076_v27 = vadd.f32 %v2075_v36, %v5226_v20  ;;  %v2512_v29 = vrot.slane %v5708_v55, 4  ;;  %v2489_v30 = vadd.f32 %v2488_v17, %v2487_v33 }
 0x39a   :  { %v2475_v60 = vsel %vm2443_vm11, %v2459_v50, %v2836_v53  ;;  %v2482_v26 = vmul.f32 %v2474_v40, %v5684_v49  ;;  %v2490_v12 = vsel %vm843_vm1, %v2480_v10, 0.0  ;;  %v2476_v47 = vsel %vm5332_vm10, %v2460_v51, %v2837_v9 }
 0x39b   :  { %v2483_v16 = vmul.f32 %v2475_v60, %v5685_v58  ;;  %v2492_v4 = vsel %vm843_vm1, %v2481_v24, 0.0  ;;  %v2491_v5 = vadd.f32 %v2490_v12, %v2489_v30  ;;  %v2077_v41 = vrot.slane %v2076_v27, 2 }
 0x39c   :  { %v2513_v20 = vadd.f32 %v2512_v29, %v5708_v55  ;;  %v2484_v36 = vmul.f32 %v2476_v47, %v5686_v28  ;;  %v2494_v42 = vsel %vm843_vm1, %v2482_v26, 0.0  ;;  %v835_v18 = vand.u32 2147483647, %v5709_v21 }
 0x39d   :  { %v2493_v38 = vadd.f32 %v2492_v4, %v2491_v5  ;;  %v2496_v49 = vsel %vm843_vm1, %v2483_v16, 0.0  ;;  %v2078_v58 = vadd.f32 %v2077_v41, %v2076_v27  ;;  %v837_v45 = vmul.f32 0.5, %v5709_v21 }
 0x39e   :  { %v2514_v62 = vrot.slane %v2513_v20, 2  ;;  %v2498_v35 = vsel %vm843_vm1, %v2484_v36, 0.0  ;;  %v2715_v13 = vadd.f32 -0.5, %v835_v18  ;;  %vm836_vm4 = vcmp.lt.f32.partialorder %v835_v18, 1.0 }
 0x39f   :  { %v2495_v1 = vadd.f32 %v2494_v42, %v2493_v38  ;;  %v2079_v63 = vrot.slane %v2078_v58, 1  ;;  %v2292_v15 = vpop.permute.xlu1 %2291  ;;  %v838_v32 = vmul.f32 %v5709_v21, %v837_v45  ;;  %v2589_v8 = vsub.s32 7, %v5655_v44 }
 0x3a0   :  { %v2515_v25 = vadd.f32 %v2514_v62, %v2513_v20  ;;  %vm2593_vm5 = vcmp.eq.s32.totalorder %v5655_v44, 4  ;;  %vm2602_vm14 = vcmp.eq.s32.totalorder %v5655_v44, 5 }
 0x3a1   :  { %v2497_v23 = vadd.f32 %v2496_v49, %v2495_v1  ;;  %v2080_v28 = vadd.f32 %v2079_v63, %v2078_v58  ;;  %v840_v0 = vsel %vm836_vm4, %v838_v32, %v2715_v13  ;;  %v2590_v59 = vrot.slane %v5709_v21, %v2589_v8 }
 0x3a2   :  { %v2516_v19 = vrot.slane %v2515_v25, 1  ;;  %v2523_v37 = vrot.slane %v840_v0, 7  ;;  %v2599_v53 = vrot.slane %v840_v0, %v2589_v8 }
 0x3a3   :  { %v2499_v39 = vadd.f32 %v2498_v35, %v2497_v23  ;;  %v2591_v24 = vsel %vm1681_vm13, %v2590_v59, 0.0  ;;  %v2605_v29 = vsel %vm2602_vm14, %v2080_v28, 0.0  ;;  %v2622_v16 = vpop.permute.xlu1 %2621 }
 0x3a4   :  { %v2517_v3 = vadd.f32 %v2516_v19, %v2515_v25  ;;  %v2600_v27 = vsel %vm2593_vm5, %v2599_v53, 0.0 }
 0x3a5   :  { %v2500_v48 = vrot.slane %v2499_v39, 4 }
 0x3a7   :  { %v2501_v31 = vadd.f32 %v2500_v48, %v2499_v39 }
 0x3a9   :  { %v2502_v54 = vrot.slane %v2501_v31, 2 }
 0x3ab   :  { %v2503_v11 = vadd.f32 %v2502_v54, %v2501_v31 }
 0x3ad   :  { %v2287_v7 = vpop.permute.xlu0 %2286  ;;  %v2504_v56 = vrot.slane %v2503_v11, 1 }
 0x3ae   :  { %v2289_v22 = vadd.f32 %v2287_v7, %v2080_v28 }
 0x3af   :  { %v2505_v43 = vadd.f32 %v2504_v56, %v2503_v11 }
 0x3b0   :  { %v2294_v46 = vadd.f32 %v2292_v15, %v2289_v22 }
 0x3b1   :  { %v2520_v34 = vmul.f32 0.1, %v2505_v43  ;;  %v2585_v50 = vsel %vm1676_vm12, %v2505_v43, 0.0  ;;  %v2613_v30 = vpop.permute.xlu0 %2612 }
 0x3b2   :  { %v2518_v2 = vmul.f32 0.1, %v2294_v46  ;;  %v2582_v10 = vrot.slane %v2294_v46, %v5710_v61 }
 0x3b4   :  { %v2519_v52 = vadd.f32 %v2518_v2, %v2517_v3  ;;  %v2583_v33 = vsel %vm1671_vm8, %v2582_v10, 0.0 }
 0x3b6   :  { %v2521_v57 = vadd.f32 %v2520_v34, %v2519_v52 }
 0x3b8   :  { %v2525_v6 = vadd.f32 %v2523_v37, %v2521_v57 }
 0x3ba   :  { %v2577_v9 = vrot.slane %v2525_v6, %v5710_v61 }
 0x3bc   :  { %v2578_v40 = vsel %vm1667_vm6, %v2577_v9, 0.0 }
 0x3bd   :  { %v2584_v51 = vadd.f32 %v2583_v33, %v2578_v40 }
 0x3bf   :  { %v2586_v14 = vadd.f32 %v2585_v50, %v2584_v51 }
 0x3c1   :  { %v2592_v17 = vadd.f32 %v2591_v24, %v2586_v14 }
 0x3c3   :  { %v2601_v55 = vadd.f32 %v2600_v27, %v2592_v17 }
 0x3c5   :  { %v2606_v60 = vadd.f32 %v2605_v29, %v2601_v55 }
 0x3c7   :  { %v2615_v26 = vadd.f32 %v2613_v30, %v2606_v60 }
 0x3c9   :  { %v2624_v12 = vadd.f32 %v2622_v16, %v2615_v26 }
 0x3cb   :  { %2626 = vst.msk [vmem:[%s5387_s13 + $0x4] sm:$0xff] %vm843_vm1, %v2624_v12 }
 0x3cc   :  { %3320 = dma.done.wait [#allocation3], 4096  }
 0x3cd   :  { %3321 = vsyncadd [#allocation3], 4294963200 }
 0x3ce   :  { %2650 = vsyncpa [#allocation3], 1 }

</bundles_post_ra>
